<compile_context>
chip_gen: v5e
topology: v5e:2x2
jax: 0.10.0
libtpu: 0.0.40
codegen_flags: <defaults>
</compile_context>

<pallas_src>
import functools

import jax
import jax.numpy as jnp
from jax import lax
from jax.experimental import pallas as pl
from jax.experimental.pallas import tpu as pltpu


# ----------------------------------------------------------------------------
# helpers
# ----------------------------------------------------------------------------
def _round_up(x, m):
    return (x + m - 1) // m * m


def _pick_strip_height(h, target):
    th = max(1, min(target, h))
    while h % th:
        th -= 1
    return th


def _pad_vec(v, c):
    return jnp.zeros((1, c), jnp.float32).at[0, : v.shape[0]].set(v.astype(jnp.float32))


def fold_bn(gamma, beta, mean, var, eps=1e-5):
    scale = gamma / jnp.sqrt(var + eps)
    shift = beta - mean * scale
    return scale, shift


# ----------------------------------------------------------------------------
# Fused bottleneck kernel (one grid step = one batch element x one row strip)
#
# Layout inside the kernel: the padded image is flattened over (row, col) into the
# sublane axis (row length L, a multiple of 8) with channels (padded to 128) on lanes.
# A strip sees (th + 4) padded rows: [guard, halo, th output rows, halo, guard].
# ----------------------------------------------------------------------------
def _bottleneck_kernel(x_ref, m_ref, s1_ref, b1_ref, w1_ref, s2_ref, b2_ref,
                       w2_ref, s3_ref, b3_ref, w3_ref, o_ref, *, th, L,
                       compute_dtype):
    i = pl.program_id(1)
    sub = th * L                      # flat positions produced by this strip
    rows = (th + 4) * L               # strip + 1 halo row + 1 guard row per side
    start = pl.multiple_of(i * sub, 8)

    xs = x_ref[0, pl.ds(start, rows), :]      # (rows, CP) f32 padded input strip
    msk = m_ref[pl.ds(start, rows), :]        # (rows, 1)  1.0 inside image, 0.0 in padding

    # ---- bn1 -> relu -> conv1 (1x1) -> bn2 -> relu; mask == conv2 zero padding ----
    h = jnp.maximum(xs * s1_ref[...] + b1_ref[...], 0.0)
    y1 = jnp.dot(h.astype(compute_dtype), w1_ref[...],
                 preferred_element_type=jnp.float32)
    y1 = jnp.maximum(y1 * s2_ref[...] + b2_ref[...], 0.0) * msk

    # ---- conv2: 3x3, stride 1, pad 1 ----
    # For each kw, take ONE column-shifted view of the whole strip (the only
    # non-8-aligned slice); the three kh taps are then 8-aligned row-slab views of it.
    # => 9 MXU dots, 2 relayout copies per strip instead of 9 per-tap slice+reshape.
    c2p = w2_ref.shape[2]
    acc = jnp.zeros((sub, c2p), jnp.float32)
    for kw in range(3):
        off = L + (kw - 1)
        shifted = y1[off:off + (th + 2) * L, :].astype(compute_dtype)
        for kh in range(3):
            acc = acc + jnp.dot(shifted[kh * L:kh * L + sub, :],
                                w2_ref[kh * 3 + kw],
                                preferred_element_type=jnp.float32)

    # ---- bn3 -> relu -> conv3 (1x1) -> + identity residual (no downsample) ----
    y2 = jnp.maximum(acc * s3_ref[...] + b3_ref[...], 0.0)
    z = jnp.dot(y2.astype(compute_dtype), w3_ref[...],
                preferred_element_type=jnp.float32)
    o_ref[0] = (z + xs[2 * L:2 * L + sub, :]).astype(o_ref.dtype)


# ----------------------------------------------------------------------------
# Wrapper: full Bottleneck forward (NCHW in / NCHW out, like the PyTorch module)
# ----------------------------------------------------------------------------
def bottleneck_forward(x_nchw, params, *, strip_rows=8,
                       compute_dtype=jnp.bfloat16):
    (w1, w2, w3, s1, b1, s2, b2, s3, b3) = params
    N, cin, H, W = x_nchw.shape
    c1 = w1.shape[1]
    c2 = w2.shape[3]
    cout = w3.shape[1]
    assert cin == cout, "identity residual needs inplanes == planes*4 (no downsample)"

    th = _pick_strip_height(H, strip_rows)
    L = _round_up(W + 2, 8)           # padded row length (>=1 zero col each side), 8-aligned
    Hp = H + 4                        # 1 halo + 1 guard row, top and bottom
    CP = _round_up(cin, 128)          # lane-dense channel padding
    C1P = _round_up(c1, 128)
    C2P = _round_up(c2, 128)

    # NCHW -> NHWC, pad channels to CP and space to (Hp, L), flatten (row, col).
    # TODO(synk): in an NHWC end-to-end model these layout ops disappear entirely.
    x = jnp.transpose(x_nchw, (0, 2, 3, 1)).astype(jnp.float32)
    x = jnp.pad(x, ((0, 0), (2, 2), (1, L - W - 1), (0, CP - cin)))
    x = x.reshape(N, Hp * L, CP)

    # {0,1} "inside the original image" mask over the padded (row, col) grid; applying
    # it to y1 in-kernel reproduces conv2's zero padding exactly.
    row_ok = (jnp.arange(Hp) >= 2) & (jnp.arange(Hp) < H + 2)
    col_ok = (jnp.arange(L) >= 1) & (jnp.arange(L) < W + 1)
    mask = (row_ok[:, None] & col_ok[None, :]).astype(jnp.float32).reshape(Hp * L, 1)

    # Zero-padded (lane-dense) weights, bf16 for the MXU; BN params stay f32.
    w1p = jnp.zeros((CP, C1P), jnp.float32).at[:cin, :c1].set(w1).astype(compute_dtype)
    w2p = (jnp.zeros((3, 3, C1P, C2P), jnp.float32).at[:, :, :c1, :c2].set(w2)
           .reshape(9, C1P, C2P).astype(compute_dtype))
    w3p = jnp.zeros((C2P, CP), jnp.float32).at[:c2, :cout].set(w3).astype(compute_dtype)
    s1p, b1p = _pad_vec(s1, CP), _pad_vec(b1, CP)
    s2p, b2p = _pad_vec(s2, C1P), _pad_vec(b2, C1P)
    s3p, b3p = _pad_vec(s3, C2P), _pad_vec(b3, C2P)

    kernel = functools.partial(_bottleneck_kernel, th=th, L=L,
                               compute_dtype=compute_dtype)

    out_flat = pl.pallas_call(
        kernel,
        out_shape=jax.ShapeDtypeStruct((N, H * L, CP), jnp.float32),
        grid_spec=pltpu.PrefetchScalarGridSpec(
            num_scalar_prefetch=0,
            grid=(N, H // th),
            in_specs=[
                pl.BlockSpec((1, Hp * L, CP), lambda n, i: (n, 0, 0)),   # x (resident per image)
                pl.BlockSpec((Hp * L, 1), lambda n, i: (0, 0)),          # padding mask
                pl.BlockSpec((1, CP), lambda n, i: (0, 0)),              # bn1 scale
                pl.BlockSpec((1, CP), lambda n, i: (0, 0)),              # bn1 shift
                pl.BlockSpec((CP, C1P), lambda n, i: (0, 0)),            # conv1 (1x1)
                pl.BlockSpec((1, C1P), lambda n, i: (0, 0)),             # bn2 scale
                pl.BlockSpec((1, C1P), lambda n, i: (0, 0)),             # bn2 shift
                pl.BlockSpec((9, C1P, C2P), lambda n, i: (0, 0, 0)),     # conv2 (3x3 taps)
                pl.BlockSpec((1, C2P), lambda n, i: (0, 0)),             # bn3 scale
                pl.BlockSpec((1, C2P), lambda n, i: (0, 0)),             # bn3 shift
                pl.BlockSpec((C2P, CP), lambda n, i: (0, 0)),            # conv3 (1x1)
            ],
            out_specs=pl.BlockSpec((1, th * L, CP), lambda n, i: (n, i, 0)),
        ),
        compiler_params=pltpu.CompilerParams(
            dimension_semantics=("parallel", "parallel"),
            vmem_limit_bytes=32 * 1024 * 1024),
    )(x, mask, s1p, b1p, w1p, s2p, b2p, w2p, s3p, b3p, w3p)

    out = out_flat.reshape(N, H, L, CP)[:, :, 1:1 + W, :cout]
    return jnp.transpose(out, (0, 3, 1, 2))                 # back to NCHW


# ----------------------------------------------------------------------------
# Pure-JAX reference (same folded-BN + bf16-matmul semantics) for correctness
# ----------------------------------------------------------------------------
def reference(x_nchw, params, compute_dtype=jnp.bfloat16):
    (w1, w2, w3, s1, b1, s2, b2, s3, b3) = params
    x = jnp.transpose(x_nchw, (0, 2, 3, 1)).astype(jnp.float32)
    out = jnp.maximum(x * s1 + b1, 0.0)
    out = jnp.einsum('nhwc,cd->nhwd', out.astype(compute_dtype),
                     w1.astype(compute_dtype),
                     preferred_element_type=jnp.float32)
    out = jnp.maximum(out * s2 + b2, 0.0)
    out = lax.conv_general_dilated(out.astype(compute_dtype),
                                   w2.astype(compute_dtype),
                                   window_strides=(1, 1),
                                   padding=((1, 1), (1, 1)),
                                   dimension_numbers=('NHWC', 'HWIO', 'NHWC'),
                                   preferred_element_type=jnp.float32)
    out = jnp.maximum(out * s3 + b3, 0.0)
    out = jnp.einsum('nhwc,cd->nhwd', out.astype(compute_dtype),
                     w3.astype(compute_dtype),
                     preferred_element_type=jnp.float32)
    out = out + x
    return jnp.transpose(out, (0, 3, 1, 2))


if __name__ == "__main__":
    # Small deterministic config: inplanes=16, planes=4, cfg=[16, 4, 4]
    N, H, W = 2, 16, 16
    inplanes, planes = 16, 4
    cfg = [16, 4, 4]
    cout = planes * 4                                    # 16 == inplanes

    key = jax.random.PRNGKey(0)
    ks = jax.random.split(key, 16)

    x = jax.random.normal(ks[0], (N, inplanes, H, W), jnp.float32)

    # conv weights (stored channels-last / HWIO)
    w1 = jax.random.normal(ks[1], (cfg[0], cfg[1]), jnp.float32) * 0.2
    w2 = jax.random.normal(ks[2], (3, 3, cfg[1], cfg[2]), jnp.float32) * 0.2
    w3 = jax.random.normal(ks[3], (cfg[2], cout), jnp.float32) * 0.2

    # BatchNorm parameters folded to per-channel scale/shift (eval semantics)
    def bn_params(kg, kb, km, kv, c):
        gamma = 0.5 + jax.random.uniform(kg, (c,), jnp.float32)
        beta = 0.1 * jax.random.normal(kb, (c,), jnp.float32)
        mean = 0.1 * jax.random.normal(km, (c,), jnp.float32)
        var = 0.5 + jax.random.uniform(kv, (c,), jnp.float32)
        return fold_bn(gamma, beta, mean, var)

    s1, b1 = bn_params(ks[4], ks[5], ks[6], ks[7], inplanes)
    s2, b2 = bn_params(ks[8], ks[9], ks[10], ks[11], cfg[1])
    s3, b3 = bn_params(ks[12], ks[13], ks[14], ks[15], cfg[2])

    params = (w1, w2, w3, s1, b1, s2, b2, s3, b3)

    fwd = jax.jit(bottleneck_forward)
    out = jax.block_until_ready(fwd(x, params))
    ref = jax.block_until_ready(reference(x, params))

    assert out.shape == (N, cout, H, W), out.shape
    max_err = float(jnp.max(jnp.abs(out - ref)))
    # bf16 matmul inputs (f32 accumulation) on both sides -> small tolerance headroom
    assert jnp.allclose(out, ref, rtol=2e-2, atol=2e-2), max_err
    print("KERNEL_OK")
</pallas_src>

<mosaic_0001>
module attributes {stable_mosaic.version = 11 : i64} {
  func.func @_bottleneck_kernel(%arg0: i32, %arg1: i32, %arg2: memref<1x480x128xf32, #tpu.memory_space<vmem>>, %arg3: memref<480x1xf32, #tpu.memory_space<vmem>>, %arg4: memref<1x128xf32, #tpu.memory_space<vmem>>, %arg5: memref<1x128xf32, #tpu.memory_space<vmem>>, %arg6: memref<128x128xbf16, #tpu.memory_space<vmem>>, %arg7: memref<1x128xf32, #tpu.memory_space<vmem>>, %arg8: memref<1x128xf32, #tpu.memory_space<vmem>>, %arg9: memref<9x128x128xbf16, #tpu.memory_space<vmem>>, %arg10: memref<1x128xf32, #tpu.memory_space<vmem>>, %arg11: memref<1x128xf32, #tpu.memory_space<vmem>>, %arg12: memref<128x128xbf16, #tpu.memory_space<vmem>>, %arg13: memref<1x192x128xf32, #tpu.memory_space<vmem>>) attributes {dimension_semantics = [#tpu.dimension_semantics<parallel>, #tpu.dimension_semantics<parallel>], iteration_bounds = array<i64: 2, 2>, scalar_prefetch = 0 : i64, scratch_operands = 0 : i64, tpu.core_type = #tpu.core_type<tc>, window_params = [{transform_indices = @transform_0, window_bounds = array<i64: 1, 480, 128>}, {pipeline_mode = #tpu.pipeline_mode<synchronous>, transform_indices = @transform_1, window_bounds = array<i64: 480, 1>}, {pipeline_mode = #tpu.pipeline_mode<synchronous>, transform_indices = @transform_2, window_bounds = array<i64: 1, 128>}, {pipeline_mode = #tpu.pipeline_mode<synchronous>, transform_indices = @transform_3, window_bounds = array<i64: 1, 128>}, {pipeline_mode = #tpu.pipeline_mode<synchronous>, transform_indices = @transform_4, window_bounds = array<i64: 128, 128>}, {pipeline_mode = #tpu.pipeline_mode<synchronous>, transform_indices = @transform_5, window_bounds = array<i64: 1, 128>}, {pipeline_mode = #tpu.pipeline_mode<synchronous>, transform_indices = @transform_6, window_bounds = array<i64: 1, 128>}, {pipeline_mode = #tpu.pipeline_mode<synchronous>, transform_indices = @transform_7, window_bounds = array<i64: 9, 128, 128>}, {pipeline_mode = #tpu.pipeline_mode<synchronous>, transform_indices = @transform_8, window_bounds = array<i64: 1, 128>}, {pipeline_mode = #tpu.pipeline_mode<synchronous>, transform_indices = @transform_9, window_bounds = array<i64: 1, 128>}, {pipeline_mode = #tpu.pipeline_mode<synchronous>, transform_indices = @transform_10, window_bounds = array<i64: 128, 128>}, {transform_indices = @transform_11, window_bounds = array<i64: 1, 192, 128>}]} {
    %c192_i32 = arith.constant 192 : i32
    %0 = arith.muli %arg1, %c192_i32 : i32
    %1 = tpu.assume_multiple %0, 8 : i32
    %c0 = arith.constant 0 : index
    %2 = arith.index_cast %1 : i32 to index
    %c0_0 = arith.constant 0 : index
    %3 = vector.load %arg2[%c0, %2, %c0_0] : memref<1x480x128xf32, #tpu.memory_space<vmem>>, vector<1x288x128xf32>
    %4 = vector.shape_cast %3 : vector<1x288x128xf32> to vector<288x128xf32>
    %5 = arith.index_cast %1 : i32 to index
    %c0_1 = arith.constant 0 : index
    %6 = vector.load %arg3[%5, %c0_1] : memref<480x1xf32, #tpu.memory_space<vmem>>, vector<288x1xf32>
    %c0_2 = arith.constant 0 : index
    %c0_3 = arith.constant 0 : index
    %7 = vector.load %arg4[%c0_2, %c0_3] : memref<1x128xf32, #tpu.memory_space<vmem>>, vector<1x128xf32>
    %8 = vector.broadcast %7 : vector<1x128xf32> to vector<288x128xf32>
    %9 = arith.mulf %4, %8 : vector<288x128xf32>
    %c0_4 = arith.constant 0 : index
    %c0_5 = arith.constant 0 : index
    %10 = vector.load %arg5[%c0_4, %c0_5] : memref<1x128xf32, #tpu.memory_space<vmem>>, vector<1x128xf32>
    %11 = vector.broadcast %10 : vector<1x128xf32> to vector<288x128xf32>
    %12 = arith.addf %9, %11 : vector<288x128xf32>
    %cst = arith.constant 0.000000e+00 : f32
    %13 = vector.broadcast %cst : f32 to vector<288x128xf32>
    %14 = arith.maximumf %12, %13 : vector<288x128xf32>
    %15 = arith.truncf %14 : vector<288x128xf32> to vector<288x128xbf16>
    %c0_6 = arith.constant 0 : index
    %c0_7 = arith.constant 0 : index
    %16 = vector.load %arg6[%c0_6, %c0_7] : memref<128x128xbf16, #tpu.memory_space<vmem>>, vector<128x128xbf16>
    %cst_8 = arith.constant dense<0.000000e+00> : vector<288x128xf32>
    %17 = tpu.matmul %15, %16, %cst_8 {dimension_numbers = #tpu.dot_dimension_numbers<[1], [0], [0], [1], [0, 0, 1, 1], [], []>} : vector<288x128xbf16>, vector<128x128xbf16>, vector<288x128xf32> -> vector<288x128xf32>
    %c0_9 = arith.constant 0 : index
    %c0_10 = arith.constant 0 : index
    %18 = vector.load %arg7[%c0_9, %c0_10] : memref<1x128xf32, #tpu.memory_space<vmem>>, vector<1x128xf32>
    %19 = vector.broadcast %18 : vector<1x128xf32> to vector<288x128xf32>
    %20 = arith.mulf %17, %19 : vector<288x128xf32>
    %c0_11 = arith.constant 0 : index
    %c0_12 = arith.constant 0 : index
    %21 = vector.load %arg8[%c0_11, %c0_12] : memref<1x128xf32, #tpu.memory_space<vmem>>, vector<1x128xf32>
    %22 = vector.broadcast %21 : vector<1x128xf32> to vector<288x128xf32>
    %23 = arith.addf %20, %22 : vector<288x128xf32>
    %cst_13 = arith.constant 0.000000e+00 : f32
    %24 = vector.broadcast %cst_13 : f32 to vector<288x128xf32>
    %25 = arith.maximumf %23, %24 : vector<288x128xf32>
    %26 = vector.broadcast %6 : vector<288x1xf32> to vector<288x128xf32>
    %27 = arith.mulf %25, %26 : vector<288x128xf32>
    %cst_14 = arith.constant 0.000000e+00 : f32
    %28 = vector.broadcast %cst_14 : f32 to vector<192x128xf32>
    %29 = vector.extract_strided_slice %27 {offsets = [23, 0], sizes = [240, 128], strides = [1, 1]} : vector<288x128xf32> to vector<240x128xf32>
    %30 = arith.truncf %29 : vector<240x128xf32> to vector<240x128xbf16>
    %31 = vector.extract_strided_slice %30 {offsets = [0, 0], sizes = [192, 128], strides = [1, 1]} : vector<240x128xbf16> to vector<192x128xbf16>
    %c0_15 = arith.constant 0 : index
    %c0_16 = arith.constant 0 : index
    %c0_17 = arith.constant 0 : index
    %32 = vector.load %arg9[%c0_15, %c0_16, %c0_17] : memref<9x128x128xbf16, #tpu.memory_space<vmem>>, vector<1x128x128xbf16>
    %33 = vector.shape_cast %32 : vector<1x128x128xbf16> to vector<128x128xbf16>
    %cst_18 = arith.constant dense<0.000000e+00> : vector<192x128xf32>
    %34 = tpu.matmul %31, %33, %cst_18 {dimension_numbers = #tpu.dot_dimension_numbers<[1], [0], [0], [1], [0, 0, 1, 1], [], []>} : vector<192x128xbf16>, vector<128x128xbf16>, vector<192x128xf32> -> vector<192x128xf32>
    %35 = arith.addf %28, %34 : vector<192x128xf32>
    %36 = vector.extract_strided_slice %30 {offsets = [24, 0], sizes = [192, 128], strides = [1, 1]} : vector<240x128xbf16> to vector<192x128xbf16>
    %c3 = arith.constant 3 : index
    %c0_19 = arith.constant 0 : index
    %c0_20 = arith.constant 0 : index
    %37 = vector.load %arg9[%c3, %c0_19, %c0_20] : memref<9x128x128xbf16, #tpu.memory_space<vmem>>, vector<1x128x128xbf16>
    %38 = vector.shape_cast %37 : vector<1x128x128xbf16> to vector<128x128xbf16>
    %cst_21 = arith.constant dense<0.000000e+00> : vector<192x128xf32>
    %39 = tpu.matmul %36, %38, %cst_21 {dimension_numbers = #tpu.dot_dimension_numbers<[1], [0], [0], [1], [0, 0, 1, 1], [], []>} : vector<192x128xbf16>, vector<128x128xbf16>, vector<192x128xf32> -> vector<192x128xf32>
    %40 = arith.addf %35, %39 : vector<192x128xf32>
    %41 = vector.extract_strided_slice %30 {offsets = [48, 0], sizes = [192, 128], strides = [1, 1]} : vector<240x128xbf16> to vector<192x128xbf16>
    %c6 = arith.constant 6 : index
    %c0_22 = arith.constant 0 : index
    %c0_23 = arith.constant 0 : index
    %42 = vector.load %arg9[%c6, %c0_22, %c0_23] : memref<9x128x128xbf16, #tpu.memory_space<vmem>>, vector<1x128x128xbf16>
    %43 = vector.shape_cast %42 : vector<1x128x128xbf16> to vector<128x128xbf16>
    %cst_24 = arith.constant dense<0.000000e+00> : vector<192x128xf32>
    %44 = tpu.matmul %41, %43, %cst_24 {dimension_numbers = #tpu.dot_dimension_numbers<[1], [0], [0], [1], [0, 0, 1, 1], [], []>} : vector<192x128xbf16>, vector<128x128xbf16>, vector<192x128xf32> -> vector<192x128xf32>
    %45 = arith.addf %40, %44 : vector<192x128xf32>
    %46 = vector.extract_strided_slice %27 {offsets = [24, 0], sizes = [240, 128], strides = [1, 1]} : vector<288x128xf32> to vector<240x128xf32>
    %47 = arith.truncf %46 : vector<240x128xf32> to vector<240x128xbf16>
    %48 = vector.extract_strided_slice %47 {offsets = [0, 0], sizes = [192, 128], strides = [1, 1]} : vector<240x128xbf16> to vector<192x128xbf16>
    %c1 = arith.constant 1 : index
    %c0_25 = arith.constant 0 : index
    %c0_26 = arith.constant 0 : index
    %49 = vector.load %arg9[%c1, %c0_25, %c0_26] : memref<9x128x128xbf16, #tpu.memory_space<vmem>>, vector<1x128x128xbf16>
    %50 = vector.shape_cast %49 : vector<1x128x128xbf16> to vector<128x128xbf16>
    %cst_27 = arith.constant dense<0.000000e+00> : vector<192x128xf32>
    %51 = tpu.matmul %48, %50, %cst_27 {dimension_numbers = #tpu.dot_dimension_numbers<[1], [0], [0], [1], [0, 0, 1, 1], [], []>} : vector<192x128xbf16>, vector<128x128xbf16>, vector<192x128xf32> -> vector<192x128xf32>
    %52 = arith.addf %45, %51 : vector<192x128xf32>
    %53 = vector.extract_strided_slice %47 {offsets = [24, 0], sizes = [192, 128], strides = [1, 1]} : vector<240x128xbf16> to vector<192x128xbf16>
    %c4 = arith.constant 4 : index
    %c0_28 = arith.constant 0 : index
    %c0_29 = arith.constant 0 : index
    %54 = vector.load %arg9[%c4, %c0_28, %c0_29] : memref<9x128x128xbf16, #tpu.memory_space<vmem>>, vector<1x128x128xbf16>
    %55 = vector.shape_cast %54 : vector<1x128x128xbf16> to vector<128x128xbf16>
    %cst_30 = arith.constant dense<0.000000e+00> : vector<192x128xf32>
    %56 = tpu.matmul %53, %55, %cst_30 {dimension_numbers = #tpu.dot_dimension_numbers<[1], [0], [0], [1], [0, 0, 1, 1], [], []>} : vector<192x128xbf16>, vector<128x128xbf16>, vector<192x128xf32> -> vector<192x128xf32>
    %57 = arith.addf %52, %56 : vector<192x128xf32>
    %58 = vector.extract_strided_slice %47 {offsets = [48, 0], sizes = [192, 128], strides = [1, 1]} : vector<240x128xbf16> to vector<192x128xbf16>
    %c7 = arith.constant 7 : index
    %c0_31 = arith.constant 0 : index
    %c0_32 = arith.constant 0 : index
    %59 = vector.load %arg9[%c7, %c0_31, %c0_32] : memref<9x128x128xbf16, #tpu.memory_space<vmem>>, vector<1x128x128xbf16>
    %60 = vector.shape_cast %59 : vector<1x128x128xbf16> to vector<128x128xbf16>
    %cst_33 = arith.constant dense<0.000000e+00> : vector<192x128xf32>
    %61 = tpu.matmul %58, %60, %cst_33 {dimension_numbers = #tpu.dot_dimension_numbers<[1], [0], [0], [1], [0, 0, 1, 1], [], []>} : vector<192x128xbf16>, vector<128x128xbf16>, vector<192x128xf32> -> vector<192x128xf32>
    %62 = arith.addf %57, %61 : vector<192x128xf32>
    %63 = vector.extract_strided_slice %27 {offsets = [25, 0], sizes = [240, 128], strides = [1, 1]} : vector<288x128xf32> to vector<240x128xf32>
    %64 = arith.truncf %63 : vector<240x128xf32> to vector<240x128xbf16>
    %65 = vector.extract_strided_slice %64 {offsets = [0, 0], sizes = [192, 128], strides = [1, 1]} : vector<240x128xbf16> to vector<192x128xbf16>
    %c2 = arith.constant 2 : index
    %c0_34 = arith.constant 0 : index
    %c0_35 = arith.constant 0 : index
    %66 = vector.load %arg9[%c2, %c0_34, %c0_35] : memref<9x128x128xbf16, #tpu.memory_space<vmem>>, vector<1x128x128xbf16>
    %67 = vector.shape_cast %66 : vector<1x128x128xbf16> to vector<128x128xbf16>
    %cst_36 = arith.constant dense<0.000000e+00> : vector<192x128xf32>
    %68 = tpu.matmul %65, %67, %cst_36 {dimension_numbers = #tpu.dot_dimension_numbers<[1], [0], [0], [1], [0, 0, 1, 1], [], []>} : vector<192x128xbf16>, vector<128x128xbf16>, vector<192x128xf32> -> vector<192x128xf32>
    %69 = arith.addf %62, %68 : vector<192x128xf32>
    %70 = vector.extract_strided_slice %64 {offsets = [24, 0], sizes = [192, 128], strides = [1, 1]} : vector<240x128xbf16> to vector<192x128xbf16>
    %c5 = arith.constant 5 : index
    %c0_37 = arith.constant 0 : index
    %c0_38 = arith.constant 0 : index
    %71 = vector.load %arg9[%c5, %c0_37, %c0_38] : memref<9x128x128xbf16, #tpu.memory_space<vmem>>, vector<1x128x128xbf16>
    %72 = vector.shape_cast %71 : vector<1x128x128xbf16> to vector<128x128xbf16>
    %cst_39 = arith.constant dense<0.000000e+00> : vector<192x128xf32>
    %73 = tpu.matmul %70, %72, %cst_39 {dimension_numbers = #tpu.dot_dimension_numbers<[1], [0], [0], [1], [0, 0, 1, 1], [], []>} : vector<192x128xbf16>, vector<128x128xbf16>, vector<192x128xf32> -> vector<192x128xf32>
    %74 = arith.addf %69, %73 : vector<192x128xf32>
    %75 = vector.extract_strided_slice %64 {offsets = [48, 0], sizes = [192, 128], strides = [1, 1]} : vector<240x128xbf16> to vector<192x128xbf16>
    %c8 = arith.constant 8 : index
    %c0_40 = arith.constant 0 : index
    %c0_41 = arith.constant 0 : index
    %76 = vector.load %arg9[%c8, %c0_40, %c0_41] : memref<9x128x128xbf16, #tpu.memory_space<vmem>>, vector<1x128x128xbf16>
    %77 = vector.shape_cast %76 : vector<1x128x128xbf16> to vector<128x128xbf16>
    %cst_42 = arith.constant dense<0.000000e+00> : vector<192x128xf32>
    %78 = tpu.matmul %75, %77, %cst_42 {dimension_numbers = #tpu.dot_dimension_numbers<[1], [0], [0], [1], [0, 0, 1, 1], [], []>} : vector<192x128xbf16>, vector<128x128xbf16>, vector<192x128xf32> -> vector<192x128xf32>
    %79 = arith.addf %74, %78 : vector<192x128xf32>
    %c0_43 = arith.constant 0 : index
    %c0_44 = arith.constant 0 : index
    %80 = vector.load %arg10[%c0_43, %c0_44] : memref<1x128xf32, #tpu.memory_space<vmem>>, vector<1x128xf32>
    %81 = vector.broadcast %80 : vector<1x128xf32> to vector<192x128xf32>
    %82 = arith.mulf %79, %81 : vector<192x128xf32>
    %c0_45 = arith.constant 0 : index
    %c0_46 = arith.constant 0 : index
    %83 = vector.load %arg11[%c0_45, %c0_46] : memref<1x128xf32, #tpu.memory_space<vmem>>, vector<1x128xf32>
    %84 = vector.broadcast %83 : vector<1x128xf32> to vector<192x128xf32>
    %85 = arith.addf %82, %84 : vector<192x128xf32>
    %cst_47 = arith.constant 0.000000e+00 : f32
    %86 = vector.broadcast %cst_47 : f32 to vector<192x128xf32>
    %87 = arith.maximumf %85, %86 : vector<192x128xf32>
    %88 = arith.truncf %87 : vector<192x128xf32> to vector<192x128xbf16>
    %c0_48 = arith.constant 0 : index
    %c0_49 = arith.constant 0 : index
    %89 = vector.load %arg12[%c0_48, %c0_49] : memref<128x128xbf16, #tpu.memory_space<vmem>>, vector<128x128xbf16>
    %cst_50 = arith.constant dense<0.000000e+00> : vector<192x128xf32>
    %90 = tpu.matmul %88, %89, %cst_50 {dimension_numbers = #tpu.dot_dimension_numbers<[1], [0], [0], [1], [0, 0, 1, 1], [], []>} : vector<192x128xbf16>, vector<128x128xbf16>, vector<192x128xf32> -> vector<192x128xf32>
    %91 = vector.extract_strided_slice %4 {offsets = [48, 0], sizes = [192, 128], strides = [1, 1]} : vector<288x128xf32> to vector<192x128xf32>
    %92 = arith.addf %90, %91 : vector<192x128xf32>
    %c0_51 = arith.constant 0 : index
    %c0_52 = arith.constant 0 : index
    %c0_53 = arith.constant 0 : index
    %93 = vector.load %arg13[%c0_51, %c0_52, %c0_53] : memref<1x192x128xf32, #tpu.memory_space<vmem>>, vector<1x192x128xf32>
    %94 = vector.shape_cast %93 : vector<1x192x128xf32> to vector<192x128xf32>
    %95 = vector.shape_cast %92 : vector<192x128xf32> to vector<1x192x128xf32>
    tpu.vector_store %arg13[%c0_51, %c0_52, %c0_53], %95 {strides = array<i32>} : memref<1x192x128xf32, #tpu.memory_space<vmem>>, vector<1x192x128xf32>,
    return
  }
  func.func @transform_0(%arg0: i32, %arg1: i32) -> (i32, i32, i32) {
    %c0_i32 = arith.constant 0 : i32
    %c0_i32_0 = arith.constant 0 : i32
    %c0_i32_1 = arith.constant 0 : i32
    return %arg0, %c0_i32, %c0_i32_0 : i32, i32, i32
  }
  func.func @transform_1(%arg0: i32, %arg1: i32) -> (i32, i32) {
    %c0_i32 = arith.constant 0 : i32
    %c0_i32_0 = arith.constant 0 : i32
    %c0_i32_1 = arith.constant 0 : i32
    return %c0_i32, %c0_i32_0 : i32, i32
  }
  func.func @transform_2(%arg0: i32, %arg1: i32) -> (i32, i32) {
    %c0_i32 = arith.constant 0 : i32
    %c0_i32_0 = arith.constant 0 : i32
    %c0_i32_1 = arith.constant 0 : i32
    return %c0_i32, %c0_i32_0 : i32, i32
  }
  func.func @transform_3(%arg0: i32, %arg1: i32) -> (i32, i32) {
    %c0_i32 = arith.constant 0 : i32
    %c0_i32_0 = arith.constant 0 : i32
    %c0_i32_1 = arith.constant 0 : i32
    return %c0_i32, %c0_i32_0 : i32, i32
  }
  func.func @transform_4(%arg0: i32, %arg1: i32) -> (i32, i32) {
    %c0_i32 = arith.constant 0 : i32
    %c0_i32_0 = arith.constant 0 : i32
    %c0_i32_1 = arith.constant 0 : i32
    return %c0_i32, %c0_i32_0 : i32, i32
  }
  func.func @transform_5(%arg0: i32, %arg1: i32) -> (i32, i32) {
    %c0_i32 = arith.constant 0 : i32
    %c0_i32_0 = arith.constant 0 : i32
    %c0_i32_1 = arith.constant 0 : i32
    return %c0_i32, %c0_i32_0 : i32, i32
  }
  func.func @transform_6(%arg0: i32, %arg1: i32) -> (i32, i32) {
    %c0_i32 = arith.constant 0 : i32
    %c0_i32_0 = arith.constant 0 : i32
    %c0_i32_1 = arith.constant 0 : i32
    return %c0_i32, %c0_i32_0 : i32, i32
  }
  func.func @transform_7(%arg0: i32, %arg1: i32) -> (i32, i32, i32) {
    %c0_i32 = arith.constant 0 : i32
    %c0_i32_0 = arith.constant 0 : i32
    %c0_i32_1 = arith.constant 0 : i32
    %c0_i32_2 = arith.constant 0 : i32
    return %c0_i32, %c0_i32_0, %c0_i32_1 : i32, i32, i32
  }
  func.func @transform_8(%arg0: i32, %arg1: i32) -> (i32, i32) {
    %c0_i32 = arith.constant 0 : i32
    %c0_i32_0 = arith.constant 0 : i32
    %c0_i32_1 = arith.constant 0 : i32
    return %c0_i32, %c0_i32_0 : i32, i32
  }
  func.func @transform_9(%arg0: i32, %arg1: i32) -> (i32, i32) {
    %c0_i32 = arith.constant 0 : i32
    %c0_i32_0 = arith.constant 0 : i32
    %c0_i32_1 = arith.constant 0 : i32
    return %c0_i32, %c0_i32_0 : i32, i32
  }
  func.func @transform_10(%arg0: i32, %arg1: i32) -> (i32, i32) {
    %c0_i32 = arith.constant 0 : i32
    %c0_i32_0 = arith.constant 0 : i32
    %c0_i32_1 = arith.constant 0 : i32
    return %c0_i32, %c0_i32_0 : i32, i32
  }
  func.func @transform_11(%arg0: i32, %arg1: i32) -> (i32, i32, i32) {
    %c0_i32 = arith.constant 0 : i32
    %c0_i32_0 = arith.constant 0 : i32
    return %arg0, %arg1, %c0_i32 : i32, i32, i32
  }
}

</mosaic_0001>

<bundles_post_ra>
// kernel: bottleneck_forward.1
= control target key start
LH: loop header
LB: loop body
LE: loop exit
PB: predicated region body
PF: predicated region fallthrough
CT: control target
= control target key end

     0   :  { %s4158_s17 = smov 0   ;;  %s4160_s18 = smov 0   ;;  %s5458_s0 = inlined_call_operand.vmem [shape: f32[2,480,128], index: 0, kind: input, shape index: {}]   ;;  %s5459_s1 = inlined_call_operand.vmem [shape: f32[480,1], index: 1, kind: input, shape index: {}]   ;;  %s5460_s2 = inlined_call_operand.vmem [shape: f32[1,128], index: 2, kind: input, shape index: {}]   ;;  %s5461_s3 = inlined_call_operand.vmem [shape: f32[1,128], index: 3, kind: input, shape index: {}]   ;;  %s5462_s4 = inlined_call_operand.vmem [shape: bf16[128,128], index: 4, kind: input, shape index: {}]   ;;  %s5463_s5 = inlined_call_operand.vmem [shape: f32[1,128], index: 5, kind: input, shape index: {}]   ;;  %s5464_s6 = inlined_call_operand.vmem [shape: f32[1,128], index: 6, kind: input, shape index: {}]   ;;  %s5465_s7 = inlined_call_operand.vmem [shape: bf16[9,128,128], index: 7, kind: input, shape index: {}]   ;;  %s5466_s8 = inlined_call_operand.vmem [shape: f32[1,128], index: 8, kind: input, shape index: {}]   ;;  %s5467_s9 = inlined_call_operand.vmem [shape: f32[1,128], index: 9, kind: input, shape index: {}]   ;;  %s5468_s10 = inlined_call_operand.vmem [shape: bf16[128,128], index: 10, kind: input, shape index: {}]   ;;  %s5469_s11 = inlined_call_operand.vmem [shape: f32[2,384,128], index: 11, kind: output, shape index: {}]  }
   0x1   :  { %s4162_s19 = smov 0   ;;  %s4164_s20 = smov 0  }
   0x2   :  { %s4166_s21 = smov 0  }
   0x3 LB: > { %s30_s22 = sadd.s32 1, %s4087_s19  ;;  %s33_s23 = sadd.s32 1, %s4091_s20  ;;  %s4095_s21 = sphi %s4166_s21, %s21_s21   ;;  %s4091_s20 = sphi %s4164_s20, %s5544_s20   ;;  %s4087_s19 = sphi %s4162_s19, %s5543_s19   ;;  %s4083_s18 = sphi %s4160_s18, %s5542_s18   ;;  %s4079_s17 = sphi %s4158_s17, %s5541_s17  }
   0x4   : > { %p31_p0 = scmp.ge.s32.totalorder %s30_s22, 2  ;;  %p3378_p1 = scmp.ge.s32.totalorder %s4095_s21, 1 }
   0x5   : > { %p351_p2 = scmp.lt.s32.totalorder %s4095_s21, 5 }
   0x6   : > { %s5546_s22 = smov (%p31_p0, %s30_s22), 0  ;;  %s5548_s23 = smov (!%p31_p0, %s33_s23), %s4091_s20 }
   0x7   : > { %p352_p3 = pnand %p3378_p1, %p351_p2  ;;  %p35_p4 = scmp.ge.s32.totalorder %s5548_s23, 2 }
   0x9   : > { %s5550_s23 = smov (%p35_p4, %s5548_s23), 0  ;;  %355 = sbr.rel (%p352_p3) target bundleno = 1091 (0x443), region = 64 }
   0xe   : > { %v3870_v0 = vld [vmem:[%s5462_s4 + $0x38] sm:$0xff]  ;;  %s410_s26 = smul.u32 192, %s4079_s17  ;;  %p395_p5 = scmp.lt.s32.totalorder %s4083_s18, 1  ;;  %v4097_v1 = vmov 0   ;;  %v3869_v2 = vld [vmem:[%s5462_s4 + $0x30] sm:$0xff]  ;;  %v3868_v5 = vld [vmem:[%s5462_s4 + $0x28] sm:$0xff] }
   0xf   : > { %4018 = vset.pattern.permute.xlu0 %v4097_v1  ;;  %4019 = vset.pattern.permute.xlu1 %v4097_v1  ;;  %v3867_v8 = vld [vmem:[%s5462_s4 + $0x20] sm:$0xff]  ;;  %v3866_v10 = vld [vmem:[%s5462_s4 + $0x18] sm:$0xff]  ;;  %v3865_v19 = vld [vmem:[%s5462_s4 + $0x10] sm:$0xff]  ;;  %vm1197_vm0 = vsmask.f32 4352  ;;  %s400_s24 = smul.u32 24, %s4079_s17 }
  0x10   : > { %679 = vmatpush.bf16.msra.mxu0 %v3870_v0  ;;  %s4200_s12 = scalar_lea.vmem %s5459_s1, %s410_s26  ;;  %4020 = vset.pattern.permute.xlu2 %v4097_v1  ;;  %s5552_s18 = smov (!%p395_p5, %s4083_s18), 1  ;;  %v4223_v9 = vld [vmem:[%s5460_s2] ss:$0 sm:$0xff]  ;;  %v3864_v22 = vld [vmem:[%s5462_s4 + $0x8] sm:$0xff]  ;;  %vm2438_vm1 = vsmask.f32 7424 }
  0x11   : > { %v449_v3 = vld [vmem:[%s4200_s12 + $0x10] sm:$0xff]  ;;  %v451_v4 = vld [vmem:[%s4200_s12 + $0x20] sm:$0xff]  ;;  %s3975_s13 = smul.u32 480, %s5552_s18  ;;  %v450_v6 = vld [vmem:[%s4200_s12 + $0x18] sm:$0xff]  ;;  %p403_p6 = scmp.lt.s32.totalorder %s400_s24, 47 }
  0x12   : > { %880 = vperm.xlu0 %4018, %v449_v3   ;;  %890 = vperm.xlu1 %4019, %v451_v4   ;;  %v452_v7 = vld [vmem:[%s4200_s12 + $0x28] sm:$0xff]  ;;  %v4233_v13 = vld [vmem:[%s5461_s3] ss:$0 sm:$0xff]  ;;  %v453_v18 = vld [vmem:[%s4200_s12 + $0x30] sm:$0xff]  ;;  %s3976_s17 = smul.u32 48, %s5552_s18 }
  0x13   : > { %s399_s25 = scalar_lea.vmem %s5458_s0, %s3975_s13  ;;  %v455_v16 = vld [vmem:[%s4200_s12 + $0x40] sm:$0xff]  ;;  %v456_v17 = vld [vmem:[%s4200_s12 + $0x48] sm:$0xff]  ;;  %900 = vperm.xlu2 %4020, %v453_v18   ;;  %v458_v25 = vld [vmem:[%s4200_s12 + $0x58] sm:$0xff]  ;;  %s5554_s24 = smov (!%p403_p6, %s400_s24), 47 }
  0x14   : > { %680 = vmatpush.bf16.msra.mxu0 %v3869_v2  ;;  %s4218_s29 = scalar_lea.vmem %s399_s25, %s410_s26  ;;  %v459_v26 = vld [vmem:[%s4200_s12 + $0x60] sm:$0xff]  ;;  %v461_v33 = vld [vmem:[%s4200_s12 + $0x70] sm:$0xff]  ;;  %v462_v34 = vld [vmem:[%s4200_s12 + $0x78] sm:$0xff]  ;;  %s406_s26 = sadd.s32 %s3976_s17, %s5554_s24 }
  0x15   : > { %v412_v11 = vld [vmem:[%s4218_s29] sm:$0xff]  ;;  %v413_v12 = vld [vmem:[%s4218_s29 + $0x8] sm:$0xff]  ;;  %v414_v29 = vld [vmem:[%s4218_s29 + $0x10] sm:$0xff]  ;;  %s3380_s25 = sshll.u32 %s406_s26, 3 }
  0x16   : > { %v485_v14 = vmul.f32 %v4223_v9, %v412_v11  ;;  %v486_v15 = vmul.f32 %v4223_v9, %v413_v12  ;;  %v3863_v27 = vld [vmem:[%s5462_s4] sm:$0xff]  ;;  %v415_v30 = vld [vmem:[%s4218_s29 + $0x18] sm:$0xff]  ;;  %v487_v31 = vmul.f32 %v4223_v9, %v414_v29  ;;  %v457_v38 = vld [vmem:[%s4200_s12 + $0x50] sm:$0xff]  ;;  %s5324_s28 = scalar_lea.vmem %s5469_s11, %s3380_s25 }
  0x17   : > { %v488_v32 = vmul.f32 %v4223_v9, %v415_v30  ;;  %v454_v35 = vld [vmem:[%s4200_s12 + $0x38] sm:$0xff]  ;;  %v464_v41 = vld [vmem:[%s4200_s12 + $0x88] sm:$0xff]  ;;  %v465_v42 = vld [vmem:[%s4200_s12 + $0x90] sm:$0xff] }
  0x18   : > { %681 = vmatpush.bf16.msra.mxu0 %v3868_v5  ;;  %v525_v20 = vadd.f32 %v4233_v13, %v485_v14  ;;  %v526_v21 = vadd.f32 %v4233_v13, %v486_v15  ;;  %v527_v36 = vadd.f32 %v4233_v13, %v487_v31  ;;  %v416_v44 = vld [vmem:[%s4218_s29 + $0x20] sm:$0xff]  ;;  %v417_v45 = vld [vmem:[%s4218_s29 + $0x28] sm:$0xff]  ;;  %v470_v56 = vld [vmem:[%s4200_s12 + $0xb8] sm:$0xff] }
  0x19   : > { %v528_v37 = vadd.f32 %v4233_v13, %v488_v32  ;;  %v489_v46 = vmul.f32 %v4223_v9, %v416_v44  ;;  %v490_v47 = vmul.f32 %v4223_v9, %v417_v45  ;;  %v467_v48 = vld [vmem:[%s4200_s12 + $0xa0] sm:$0xff]  ;;  %v468_v49 = vld [vmem:[%s4200_s12 + $0xa8] sm:$0xff]  ;;  %v418_v59 = vld [vmem:[%s4218_s29 + $0x30] sm:$0xff] }
  0x1a   : > { %885 = vperm.xlu0 %4018, %v450_v6   ;;  %895 = vperm.xlu1 %4019, %v452_v7   ;;  %v561_v23 = vmax.f32 %v525_v20, 0.0  ;;  %v562_v24 = vmax.f32 %v526_v21, 0.0  ;;  %v563_v39 = vmax.f32 %v527_v36, 0.0  ;;  %v460_v50 = vld [vmem:[%s4200_s12 + $0x68] sm:$0xff]  ;;  %v463_v53 = vld [vmem:[%s4200_s12 + $0x80] sm:$0xff]  ;;  %v419_v60 = vld [vmem:[%s4218_s29 + $0x38] sm:$0xff]  ;;  %v491_v61 = vmul.f32 %v4223_v9, %v418_v59 }
  0x1b   : > { %905 = vperm.xlu2 %4020, %v454_v35   ;;  %v564_v40 = vmax.f32 %v528_v37, 0.0  ;;  %v529_v51 = vadd.f32 %v4233_v13, %v489_v46  ;;  %v530_v52 = vadd.f32 %v4233_v13, %v490_v47  ;;  %v471_v57 = vld [vmem:[%s4200_s12 + $0xc0] sm:$0xff]  ;;  %v492_v62 = vmul.f32 %v4223_v9, %v419_v60  ;;  %v473_v63 = vld [vmem:[%s4200_s12 + $0xd0] sm:$0xff]  ;;  %v474_v0 = vld [vmem:[%s4200_s12 + $0xd8] sm:$0xff] }
  0x1c   : > { %682 = vmatpush.bf16.msra.mxu0 %v3867_v8  ;;  %v597_v28 = vpack.c.bf16 %v562_v24, %v561_v23  ;;  %v466_v1 = vld [vmem:[%s4200_s12 + $0x98] sm:$0xff]  ;;  %v531_v2 = vadd.f32 %v4233_v13, %v491_v61  ;;  %v469_v4 = vld [vmem:[%s4200_s12 + $0xb0] sm:$0xff]  ;;  %v476_v7 = vld [vmem:[%s4200_s12 + $0xe8] sm:$0xff] }
  0x1d   : > { %v598_v43 = vpack.c.bf16 %v564_v40, %v563_v39  ;;  %v565_v54 = vmax.f32 %v529_v51, 0.0  ;;  %v566_v55 = vmax.f32 %v530_v52, 0.0  ;;  %v532_v3 = vadd.f32 %v4233_v13, %v492_v62  ;;  %v477_v8 = vld [vmem:[%s4200_s12 + $0xf0] sm:$0xff]  ;;  %v420_v11 = vld [vmem:[%s4218_s29 + $0x40] sm:$0xff]  ;;  %v421_v12 = vld [vmem:[%s4218_s29 + $0x48] sm:$0xff] }
  0x1e   : > { %v567_v5 = vmax.f32 %v531_v2, 0.0  ;;  %v493_v14 = vmul.f32 %v4223_v9, %v420_v11  ;;  %v494_v15 = vmul.f32 %v4223_v9, %v421_v12  ;;  %v472_v18 = vld [vmem:[%s4200_s12 + $0xc8] sm:$0xff]  ;;  %v475_v21 = vld [vmem:[%s4200_s12 + $0xe0] sm:$0xff]  ;;  %v478_v29 = vld [vmem:[%s4200_s12 + $0xf8] sm:$0xff] }
  0x1f   : > { %v599_v58 = vpack.c.bf16 %v566_v55, %v565_v54  ;;  %v568_v6 = vmax.f32 %v532_v3, 0.0  ;;  %v424_v35 = vld [vmem:[%s4218_s29 + $0x60] sm:$0xff]  ;;  %v425_v36 = vld [vmem:[%s4218_s29 + $0x68] sm:$0xff]  ;;  %v426_v44 = vld [vmem:[%s4218_s29 + $0x70] sm:$0xff] }
  0x20   : > { %683 = vmatpush.bf16.msra.mxu0 %v3866_v10  ;;  %v534_v20 = vadd.f32 %v4233_v13, %v494_v15  ;;  %v497_v37 = vmul.f32 %v4223_v9, %v424_v35  ;;  %v427_v45 = vld [vmem:[%s4218_s29 + $0x78] sm:$0xff]  ;;  %v499_v46 = vmul.f32 %v4223_v9, %v426_v44  ;;  %v429_v54 = vld [vmem:[%s4218_s29 + $0x88] sm:$0xff]  ;;  %v3877_v2 = vld [vmem:[%s5465_s7 + $0x30] sm:$0xff] }
  0x21   : > { %v600_v10 = vpack.c.bf16 %v568_v6, %v567_v5  ;;  %v500_v47 = vmul.f32 %v4223_v9, %v427_v45  ;;  %v3878_v61 = vld [vmem:[%s5465_s7 + $0x38] sm:$0xff]  ;;  %v3876_v5 = vld [vmem:[%s5465_s7 + $0x28] sm:$0xff] }
  0x22   : > { %910 = vperm.xlu0 %4018, %v455_v16   ;;  %915 = vperm.xlu1 %4019, %v456_v17   ;;  %v479_v16 = vld [vmem:[%s4200_s12 + $0x100] sm:$0xff]  ;;  %v480_v17 = vld [vmem:[%s4200_s12 + $0x108] sm:$0xff]  ;;  %v570_v23 = vmax.f32 %v534_v20, 0.0  ;;  %v537_v39 = vadd.f32 %v4233_v13, %v497_v37  ;;  %v435_v44 = vld [vmem:[%s4218_s29 + $0xb8] sm:$0xff] }
  0x23   : > { %920 = vperm.xlu2 %4020, %v457_v38   ;;  %v498_v38 = vmul.f32 %v4223_v9, %v425_v36  ;;  %1638 = vmatpush.bf16.msra.mxu2 %v3878_v61 }
  0x24   : > { %684 = vmatpush.bf16.msra.mxu0 %v3865_v19  ;;  %v533_v19 = vadd.f32 %v4233_v13, %v493_v14  ;;  %v3874_v14 = vld [vmem:[%s5465_s7 + $0x18] sm:$0xff] }
  0x25   : > { %v538_v40 = vadd.f32 %v4233_v13, %v498_v38  ;;  %v3884_v38 = vld [vmem:[%s5465_s7 + $0xe8] sm:$0xff] }
  0x27   : > { %1639 = vmatpush.bf16.msra.mxu2 %v3877_v2 }
  0x28   : > { %685 = vmatpush.bf16.msra.mxu0 %v3864_v22  ;;  %v569_v22 = vmax.f32 %v533_v19, 0.0  ;;  %v3873_v19 = vld [vmem:[%s5465_s7 + $0x10] sm:$0xff] }
  0x2a   : > { %925 = vperm.xlu0 %4018, %v458_v25   ;;  %930 = vperm.xlu1 %4019, %v459_v26   ;;  %v601_v24 = vpack.c.bf16 %v570_v23, %v569_v22  ;;  %v422_v25 = vld [vmem:[%s4218_s29 + $0x50] sm:$0xff]  ;;  %v423_v26 = vld [vmem:[%s4218_s29 + $0x58] sm:$0xff]  ;;  %v4355_v22 = vld [vmem:[%s5463_s5] ss:$0 sm:$0xff] }
  0x2b   : > { %935 = vperm.xlu2 %4020, %v460_v50   ;;  %1640 = vmatpush.bf16.msra.mxu2 %v3876_v5  ;;  %v3886_v23 = vld [vmem:[%s5465_s7 + $0xf8] sm:$0xff] }
  0x2c   : > { %686 = vmatpush.bf16.msra.mxu0 %v3863_v27  ;;  %v495_v27 = vmul.f32 %v4223_v9, %v422_v25  ;;  %1374 = vmatpush.bf16.msra.mxu1 %v3886_v23 }
  0x2e   : > { %v535_v30 = vadd.f32 %v4233_v13, %v495_v27 }
  0x2f   : > { %687 = vmatmul.bf16.vlgmr.msra.gmra.mxu0 %v597_v28  ;;  %v496_v28 = vmul.f32 %v4223_v9, %v423_v26 }
  0x30   : > { %v571_v32 = vmax.f32 %v535_v30, 0.0 }
  0x31   : > { %v536_v31 = vadd.f32 %v4233_v13, %v496_v28 }
  0x32   : > { %940 = vperm.xlu0 %4018, %v461_v33   ;;  %945 = vperm.xlu1 %4019, %v462_v34  }
  0x33   : > { %950 = vperm.xlu2 %4020, %v463_v53   ;;  %v572_v33 = vmax.f32 %v536_v31, 0.0  ;;  %v428_v53 = vld [vmem:[%s4218_s29 + $0x80] sm:$0xff] }
  0x34   : > { %v501_v55 = vmul.f32 %v4223_v9, %v428_v53 }
  0x35   : > { %v602_v34 = vpack.c.bf16 %v572_v33, %v571_v32  ;;  %v3885_v32 = vld [vmem:[%s5465_s7 + $0xf0] sm:$0xff]  ;;  %v3871_v33 = vld [vmem:[%s5465_s7] sm:$0xff] }
  0x36   : > { %1375 = vmatpush.bf16.msra.mxu1 %v3885_v32 }
  0x3a   : > { %955 = vperm.xlu0 %4018, %v464_v41   ;;  %960 = vperm.xlu1 %4019, %v465_v42   ;;  %v573_v41 = vmax.f32 %v537_v39, 0.0  ;;  %v574_v42 = vmax.f32 %v538_v40, 0.0 }
  0x3b   : > { %965 = vperm.xlu2 %4020, %v466_v1   ;;  %v431_v1 = vld [vmem:[%s4218_s29 + $0x98] sm:$0xff]  ;;  %1376 = vmatpush.bf16.msra.mxu1 %v3884_v38  ;;  %v3892_v38 = vld [vmem:[%s5465_s7 + $0x1a8] sm:$0xff] }
  0x3f   : > { %690 = vmatmul.bf16.gmra.mxu0 %v598_v43  ;;  %v603_v43 = vpack.c.bf16 %v574_v42, %v573_v41 }
  0x42   : > { %970 = vperm.xlu0 %4018, %v467_v48   ;;  %975 = vperm.xlu1 %4019, %v468_v49   ;;  %v539_v48 = vadd.f32 %v4233_v13, %v499_v46  ;;  %v540_v49 = vadd.f32 %v4233_v13, %v500_v47  ;;  %v3883_v47 = vld [vmem:[%s5465_s7 + $0xe0] sm:$0xff] }
  0x43   : > { %980 = vperm.xlu2 %4020, %v469_v4   ;;  %v504_v4 = vmul.f32 %v4223_v9, %v431_v1  ;;  %1377 = vmatpush.bf16.msra.mxu1 %v3883_v47 }
  0x44   : > { %v575_v50 = vmax.f32 %v539_v48, 0.0  ;;  %v576_v51 = vmax.f32 %v540_v49, 0.0 }
  0x46   : > { %v604_v52 = vpack.c.bf16 %v576_v51, %v575_v50  ;;  %v508_v51 = vmul.f32 %v4223_v9, %v435_v44 }
  0x4a   : > { %985 = vperm.xlu0 %4018, %v470_v56   ;;  %990 = vperm.xlu1 %4019, %v471_v57   ;;  %v502_v56 = vmul.f32 %v4223_v9, %v429_v54  ;;  %v541_v57 = vadd.f32 %v4233_v13, %v501_v55  ;;  %v3882_v55 = vld [vmem:[%s5465_s7 + $0xd8] sm:$0xff] }
  0x4b   : > { %995 = vperm.xlu2 %4020, %v472_v18   ;;  %v433_v18 = vld [vmem:[%s4218_s29 + $0xa8] sm:$0xff]  ;;  %1378 = vmatpush.bf16.msra.mxu1 %v3882_v55 }
  0x4c   : > { %v577_v59 = vmax.f32 %v541_v57, 0.0 }
  0x4f   : > { %695 = vmatmul.bf16.gmra.mxu0 %v599_v58  ;;  %v542_v58 = vadd.f32 %v4233_v13, %v502_v56 }
  0x51   : > { %v578_v60 = vmax.f32 %v542_v58, 0.0 }
  0x52   : > { %1000 = vperm.xlu0 %4018, %v473_v63   ;;  %1005 = vperm.xlu1 %4019, %v474_v0   ;;  %v430_v0 = vld [vmem:[%s4218_s29 + $0x90] sm:$0xff] }
  0x53   : > { %1010 = vperm.xlu2 %4020, %v475_v21   ;;  %v605_v62 = vpack.c.bf16 %v578_v60, %v577_v59  ;;  %v503_v3 = vmul.f32 %v4223_v9, %v430_v0  ;;  %v506_v21 = vmul.f32 %v4223_v9, %v433_v18  ;;  %v548_v59 = vadd.f32 %v4233_v13, %v508_v51  ;;  %v3881_v0 = vld [vmem:[%s5465_s7 + $0xd0] sm:$0xff]  ;;  %v437_v18 = vld [vmem:[%s4218_s29 + $0xc8] sm:$0xff] }
  0x54   : > { %1379 = vmatpush.bf16.msra.mxu1 %v3881_v0  ;;  %v438_v0 = vld [vmem:[%s4218_s29 + $0xd0] sm:$0xff] }
  0x55   : > { %v543_v6 = vadd.f32 %v4233_v13, %v503_v3  ;;  %v546_v27 = vadd.f32 %v4233_v13, %v506_v21  ;;  %v584_v5 = vmax.f32 %v548_v59, 0.0  ;;  %v3902_v59 = vld [vmem:[%s5465_s7 + $0x78] sm:$0xff] }
  0x57   : > { %v579_v11 = vmax.f32 %v543_v6, 0.0  ;;  %v582_v36 = vmax.f32 %v546_v27, 0.0  ;;  %v3893_v27 = vld [vmem:[%s5465_s7 + $0x1b0] sm:$0xff] }
  0x5a   : > { %1015 = vperm.xlu0 %4018, %v476_v7   ;;  %1020 = vperm.xlu1 %4019, %v477_v8   ;;  %v544_v7 = vadd.f32 %v4233_v13, %v504_v4 }
  0x5b   : > { %1025 = vperm.xlu2 %4020, %v478_v29   ;;  %v4369_v29 = vld [vmem:[%s5464_s6] ss:$0 sm:$0xff] }
  0x5c   : > { %v580_v12 = vmax.f32 %v544_v7, 0.0 }
  0x5e   : > { %v606_v15 = vpack.c.bf16 %v580_v12, %v579_v11  ;;  %v3880_v12 = vld [vmem:[%s5465_s7 + $0xc8] sm:$0xff] }
  0x5f   : > { %700 = vmatmul.bf16.gmra.mxu0 %v600_v10  ;;  %v3875_v10 = vld [vmem:[%s5465_s7 + $0x20] sm:$0xff]  ;;  %1380 = vmatpush.bf16.msra.mxu1 %v3880_v12 }
  0x60   : > { %1641 = vmatpush.bf16.msra.mxu2 %v3875_v10 }
  0x62   : > { %1030 = vperm.xlu0 %4018, %v479_v16   ;;  %1035 = vperm.xlu1 %4019, %v480_v17   ;;  %v432_v17 = vld [vmem:[%s4218_s29 + $0xa0] sm:$0xff] }
  0x63   : > { %v505_v20 = vmul.f32 %v4223_v9, %v432_v17  ;;  %v436_v17 = vld [vmem:[%s4218_s29 + $0xc0] sm:$0xff] }
  0x64   : > { %1642 = vmatpush.bf16.msra.mxu2 %v3874_v14  ;;  %v3894_v14 = vld [vmem:[%s5465_s7 + $0x1b8] sm:$0xff] }
  0x65   : > { %v545_v26 = vadd.f32 %v4233_v13, %v505_v20  ;;  %1822 = vmatpush.bf16.msra.mxu3 %v3894_v14 }
  0x67   : > { %v581_v35 = vmax.f32 %v545_v26, 0.0  ;;  %v3879_v26 = vld [vmem:[%s5465_s7 + $0xc0] sm:$0xff] }
  0x68   : > { %1643 = vmatpush.bf16.msra.mxu2 %v3873_v19  ;;  %1381 = vmatpush.bf16.msra.mxu1 %v3879_v26 }
  0x69   : > { %v607_v40 = vpack.c.bf16 %v582_v36, %v581_v35  ;;  %1823 = vmatpush.bf16.msra.mxu3 %v3893_v27 }
  0x6c   : > { %1993 = vmatpush.bf16.msrb.mxu1 %v3902_v59 }
  0x6d   : > { %v901_v32 = vpop.permute.xlu2 %900  ;;  %1824 = vmatpush.bf16.msra.mxu3 %v3892_v38 }
  0x6f   : > { %705 = vmatmul.bf16.gmra.mxu0 %v601_v24  ;;  %v3872_v24 = vld [vmem:[%s5465_s7 + $0x8] sm:$0xff] }
  0x70   : > { %1644 = vmatpush.bf16.msra.mxu2 %v3872_v24  ;;  %v509_v24 = vmul.f32 %v4223_v9, %v436_v17 }
  0x72   : > { %v549_v36 = vadd.f32 %v4233_v13, %v509_v24 }
  0x74   : > { %1645 = vmatpush.bf16.msra.mxu2 %v3871_v33 }
  0x7f   : > { %710 = vmatmul.bf16.gmra.mxu0 %v602_v34 }
  0x84   : > { %v881_v25 = vpop.permute.xlu0 %880 }
  0x8c   : > { %v886_v45 = vpop.permute.xlu0 %885 }
  0x8f   : > { %715 = vmatmul.bf16.gmra.mxu0 %v603_v43  ;;  %v434_v43 = vld [vmem:[%s4218_s29 + $0xb0] sm:$0xff] }
  0x90   : > { %v507_v50 = vmul.f32 %v4223_v9, %v434_v43 }
  0x92   : > { %v547_v58 = vadd.f32 %v4233_v13, %v507_v50  ;;  %v3891_v50 = vld [vmem:[%s5465_s7 + $0x1a0] sm:$0xff] }
  0x93   : > { %1825 = vmatpush.bf16.msra.mxu3 %v3891_v50 }
  0x94   : > { %v583_v4 = vmax.f32 %v547_v58, 0.0  ;;  %v3910_v58 = vld [vmem:[%s5465_s7 + $0x138] sm:$0xff] }
  0x95   : > { %2163 = vmatpush.bf16.msrb.mxu2 %v3910_v58 }
  0x9f   : > { %720 = vmatmul.bf16.gmra.mxu0 %v604_v52  ;;  %v891_v52 = vpop.permute.xlu1 %890 }
  0xa7   : > { %v896_v10 = vpop.permute.xlu1 %895 }
  0xac   : > { %v688_v63 = vpop.f32.mrf.mxu0 }
  0xaf   : > { %725 = vmatmul.bf16.gmra.mxu0 %v605_v62 }
  0xb4   : > { %v689_v8 = vpop.f32.mrf.mxu0 }
  0xbc   : > { %v691_v16 = vpop.f32.mrf.mxu0 }
  0xbd   : > { %v778_v28 = vmul.f32 %v4355_v22, %v691_v16  ;;  %v608_v16 = vpack.c.bf16 %v584_v5, %v583_v4 }
  0xbf   : > { %730 = vmatmul.bf16.gmra.mxu0 %v606_v15  ;;  %v814_v37 = vadd.f32 %v4369_v29, %v778_v28 }
  0xc1   : > { %v846_v41 = vmax.f32 %v814_v37, 0.0 }
  0xc3   : > { %v1038_v53 = vmul.f32 %v881_v25, %v846_v41  ;;  %v510_v25 = vmul.f32 %v4223_v9, %v437_v18 }
  0xc4   : > { %v693_v30 = vpop.f32.mrf.mxu0 }
  0xc5   : > { %v779_v31 = vmul.f32 %v4355_v22, %v693_v30  ;;  %v1070_v60 = vpack.c.bf16 %v1038_v53, %v1038_v53  ;;  %v550_v37 = vadd.f32 %v4233_v13, %v510_v25 }
  0xc7   : > { %v815_v34 = vadd.f32 %v4369_v29, %v779_v31  ;;  %v1446_v6 = vunpack.c.l.b16 %v1070_v60  ;;  %v906_v60 = vpop.permute.xlu2 %905 }
  0xc9   : > { %v847_v39 = vmax.f32 %v815_v34, 0.0 }
  0xcb   : > { %v1039_v48 = vmul.f32 %v886_v45, %v847_v39 }
  0xcc   : > { %v696_v42 = vpop.f32.mrf.mxu0 }
  0xcd   : > { %v780_v46 = vmul.f32 %v4355_v22, %v696_v42  ;;  %v1071_v56 = vpack.c.bf16 %v1039_v48, %v1039_v48  ;;  %v585_v48 = vmax.f32 %v549_v36, 0.0  ;;  %v3887_v36 = vld [vmem:[%s5465_s7 + $0x180] sm:$0xff] }
  0xcf   : > { %v816_v49 = vadd.f32 %v4369_v29, %v780_v46  ;;  %735 = vmatmul.bf16.gmra.mxu0 %v607_v40  ;;  %v1447_v1 = vunpack.c.l.b16 %v1071_v56 }
  0xd1   : > { %v848_v54 = vmax.f32 %v816_v49, 0.0  ;;  %v1449_v11 = vpack.c.b16 %v1447_v1, %v1446_v6  ;;  %v586_v49 = vmax.f32 %v550_v37, 0.0  ;;  %v511_v6 = vmul.f32 %v4223_v9, %v438_v0 }
  0xd3   : > { %v1040_v57 = vmul.f32 %v891_v52, %v848_v54  ;;  %v1463_v23 = vshrl.u32 %v1449_v11, 16  ;;  %v1466_v31 = vshll.u32 %v1449_v11, 16  ;;  %v3889_v11 = vld [vmem:[%s5465_s7 + $0x190] sm:$0xff] }
  0xd4   : > { %v698_v61 = vpop.f32.mrf.mxu0 }
  0xd5   : > { %v1072_v62 = vpack.c.bf16 %v1040_v57, %v1040_v57  ;;  %v781_v63 = vmul.f32 %v4355_v22, %v698_v61  ;;  %v1465_v35 = vrot.slane %v1463_v23, 3  ;;  %v1468_v40 = vrot.slane %v1466_v31, 4  ;;  %v3890_v61 = vld [vmem:[%s5465_s7 + $0x198] sm:$0xff]  ;;  %v3888_v23 = vld [vmem:[%s5465_s7 + $0x188] sm:$0xff] }
  0xd6   : > { %1826 = vmatpush.bf16.msra.mxu3 %v3890_v61 }
  0xd7   : > { %v1448_v2 = vunpack.c.l.b16 %v1072_v62  ;;  %v817_v3 = vadd.f32 %v4369_v29, %v781_v63  ;;  %v1469_v53 = vor.u32 %v1468_v40, %v1465_v35  ;;  %v609_v63 = vpack.c.bf16 %v586_v49, %v585_v48 }
  0xd9   : > { %v4402_v7 = vpack.c.b16 %v1448_v2, %v1447_v1  ;;  %v849_v8 = vmax.f32 %v817_v3, 0.0  ;;  %v439_v1 = vld [vmem:[%s4218_s29 + $0xd8] sm:$0xff] }
  0xda   : > { %1827 = vmatpush.bf16.msra.mxu3 %v3889_v11  ;;  %v921_v11 = vpop.permute.xlu2 %920 }
  0xdb   : > { %v1041_v15 = vmul.f32 %v896_v10, %v849_v8  ;;  %v512_v8 = vmul.f32 %v4223_v9, %v439_v1 }
  0xdc   : > { %v701_v19 = vpop.f32.mrf.mxu0 }
  0xdd   : > { %v1073_v20 = vpack.c.bf16 %v1041_v15, %v1041_v15  ;;  %v782_v21 = vmul.f32 %v4355_v22, %v701_v19  ;;  %v911_v19 = vpop.permute.xlu0 %910 }
  0xde   : > { %1828 = vmatpush.bf16.msra.mxu3 %v3888_v23 }
  0xdf   : > { %v1159_v28 = vunpack.c.l.b16 %v1073_v20  ;;  %v818_v30 = vadd.f32 %v4369_v29, %v782_v21  ;;  %740 = vmatmul.bf16.gmra.mxu0 %v608_v16  ;;  %v551_v20 = vadd.f32 %v4233_v13, %v511_v6  ;;  %v552_v21 = vadd.f32 %v4233_v13, %v512_v8  ;;  %v3909_v8 = vld [vmem:[%s5465_s7 + $0x130] sm:$0xff] }
  0xe0   : > { %2164 = vmatpush.bf16.msrb.mxu2 %v3909_v8 }
  0xe1   : > { %v1450_v33 = vpack.c.b16 %v1159_v28, %v1448_v2  ;;  %v850_v34 = vmax.f32 %v818_v30, 0.0  ;;  %v588_v35 = vmax.f32 %v552_v21, 0.0 }
  0xe2   : > { %1829 = vmatpush.bf16.msra.mxu3 %v3887_v36 }
  0xe3   : > { %v1042_v39 = vmul.f32 %v901_v32, %v850_v34  ;;  %v1471_v41 = vshrl.u32 %v1450_v33, 16  ;;  %v1474_v42 = vshll.u32 %v1450_v33, 16  ;;  %v587_v34 = vmax.f32 %v551_v20, 0.0 }
  0xe4   : > { %v703_v43 = vpop.f32.mrf.mxu0 }
  0xe5   : > { %v1074_v44 = vpack.c.bf16 %v1042_v39, %v1042_v39  ;;  %v783_v45 = vmul.f32 %v4355_v22, %v703_v43  ;;  %v1473_v46 = vrot.slane %v1471_v41, 3  ;;  %v1476_v47 = vrot.slane %v1474_v42, 4 }
  0xe7   : > { %v1160_v51 = vunpack.c.l.b16 %v1074_v44  ;;  %v819_v52 = vadd.f32 %v4369_v29, %v783_v45  ;;  %v1477_v54 = vor.u32 %v1476_v47, %v1473_v46  ;;  %v916_v44 = vpop.permute.xlu1 %915  ;;  %v610_v45 = vpack.c.bf16 %v588_v35, %v587_v34 }
  0xe9   : > { %v4432_v55 = vpack.c.b16 %v1160_v51, %v1159_v28  ;;  %v851_v56 = vmax.f32 %v819_v52, 0.0  ;;  %v1478_v57 = vsel %vm1197_vm0, %v1469_v53, %v1477_v54  ;;  %v441_v52 = vld [vmem:[%s4218_s29 + $0xe8] sm:$0xff] }
  0xea   : > { %1646 = vmatmul.bf16.vlgmr.msra.gmra.mxu2 %v1478_v57 }
  0xeb   : > { %v1043_v62 = vmul.f32 %v906_v60, %v851_v56  ;;  %v1202_v2 = vshll.u32 %v4432_v55, 16  ;;  %v1199_v10 = vshrl.u32 %v4432_v55, 16  ;;  %v514_v60 = vmul.f32 %v4223_v9, %v441_v52 }
  0xec   : > { %v706_v3 = vpop.f32.mrf.mxu0 }
  0xed   : > { %v1075_v4 = vpack.c.bf16 %v1043_v62, %v1043_v62  ;;  %v784_v5 = vmul.f32 %v4355_v22, %v706_v3  ;;  %v4454_v12 = vrot.slane %v1202_v2, 1  ;;  %v1201_v46 = vrot.slane %v1199_v10, 3 }
  0xee   : > { %v1204_v48 = vrot.slane %v1202_v2, 4 }
  0xef   : > { %v1161_v14 = vunpack.c.l.b16 %v1075_v4  ;;  %v820_v15 = vadd.f32 %v4369_v29, %v784_v5  ;;  %745 = vmatmul.bf16.gmra.mxu0 %v609_v63  ;;  %v2448_v16 = vor.u32 %v4454_v12, %v1199_v10  ;;  %v3901_v10 = vld [vmem:[%s5465_s7 + $0x70] sm:$0xff] }
  0xf0   : > { %v1205_v0 = vor.u32 %v1204_v48, %v1201_v46  ;;  %1994 = vmatpush.bf16.msrb.mxu1 %v3901_v10  ;;  %v442_v46 = vld [vmem:[%s4218_s29 + $0xf0] sm:$0xff]  ;;  %v443_v48 = vld [vmem:[%s4218_s29 + $0xf8] sm:$0xff] }
  0xf1   : > { %v4458_v17 = vpack.c.b16 %v1161_v14, %v1160_v51  ;;  %v852_v18 = vmax.f32 %v820_v15, 0.0  ;;  %v440_v51 = vld [vmem:[%s4218_s29 + $0xe0] sm:$0xff]  ;;  %v515_v52 = vmul.f32 %v4223_v9, %v442_v46 }
  0xf2   : > { %v3923_v46 = vld [vmem:[%s5465_s7 + $0xa0] sm:$0xff] }
  0xf3   : > { %v1044_v24 = vmul.f32 %v911_v19, %v852_v18  ;;  %v1480_v25 = vshrl.u32 %v4458_v17, 16  ;;  %v1483_v26 = vshll.u32 %v4458_v17, 16  ;;  %v554_v19 = vadd.f32 %v4233_v13, %v514_v60 }
  0xf4   : > { %v708_v27 = vpop.f32.mrf.mxu0 }
  0xf5   : > { %v1076_v28 = vpack.c.bf16 %v1044_v24, %v1044_v24  ;;  %v785_v30 = vmul.f32 %v4355_v22, %v708_v27  ;;  %v1482_v31 = vrot.slane %v1480_v25, 3  ;;  %v1485_v32 = vrot.slane %v1483_v26, 4 }
  0xf6   : > { %v2655_v33 = vrot.slane %v1483_v26, 1 }
  0xf7   : > { %v1162_v37 = vunpack.c.l.b16 %v1076_v28  ;;  %v821_v38 = vadd.f32 %v4369_v29, %v785_v30  ;;  %v1486_v39 = vor.u32 %v1485_v32, %v1482_v31  ;;  %v590_v32 = vmax.f32 %v554_v19, 0.0 }
  0xf8   : > { %v2656_v40 = vor.u32 %v2655_v33, %v1480_v25 }
  0xf9   : > { %v4472_v41 = vpack.c.b16 %v1162_v37, %v1161_v14  ;;  %v853_v42 = vmax.f32 %v821_v38, 0.0  ;;  %v1487_v43 = vsel %vm1197_vm0, %v1477_v54, %v1486_v39  ;;  %v513_v54 = vmul.f32 %v4223_v9, %v440_v51  ;;  %v926_v38 = vpop.permute.xlu0 %925 }
  0xfa   : > { %1651 = vmatmul.bf16.gmra.mxu2 %v1487_v43 }
  0xfb   : > { %v1045_v47 = vmul.f32 %v916_v44, %v853_v42  ;;  %v1207_v49 = vshrl.u32 %v4472_v41, 16  ;;  %v1210_v50 = vshll.u32 %v4472_v41, 16  ;;  %v553_v14 = vadd.f32 %v4233_v13, %v513_v54 }
  0xfc   : > { %v711_v53 = vpop.f32.mrf.mxu0 }
  0xfd   : > { %v1077_v56 = vpack.c.bf16 %v1045_v47, %v1045_v47  ;;  %v786_v57 = vmul.f32 %v4355_v22, %v711_v53  ;;  %v1209_v58 = vrot.slane %v1207_v49, 3  ;;  %v1212_v59 = vrot.slane %v1210_v50, 4 }
  0xfe   : > { %v2449_v61 = vrot.slane %v1210_v50, 1  ;;  %v589_v26 = vmax.f32 %v553_v14, 0.0 }
  0xff   : > { %v1163_v62 = vunpack.c.l.b16 %v1077_v56  ;;  %v822_v63 = vadd.f32 %v4369_v29, %v786_v57  ;;  %750 = vmatmul.bf16.gmra.mxu0 %v610_v45  ;;  %v1213_v1 = vor.u32 %v1212_v59, %v1209_v58  ;;  %v516_v58 = vmul.f32 %v4223_v9, %v443_v48  ;;  %v3926_v59 = vld [vmem:[%s5465_s7 + $0xb8] sm:$0xff]  ;;  %v445_v48 = vld [vmem:[%s4218_s29 + $0x108] sm:$0xff] }
 0x100   : > { %v4484_v2 = vsel %vm2438_vm1, %v2448_v16, %v2449_v61  ;;  %v2451_v3 = vor.u32 %v2449_v61, %v1207_v49  ;;  %v611_v43 = vpack.c.bf16 %v590_v32, %v589_v26  ;;  %2544 = vmatpush.bf16.msrb.mxu0 %v3926_v59  ;;  %v3924_v26 = vld [vmem:[%s5465_s7 + $0xa8] sm:$0xff]  ;;  %v518_v59 = vmul.f32 %v4223_v9, %v445_v48 }
 0x101   : > { %v4486_v4 = vpack.c.b16 %v1163_v62, %v1162_v37  ;;  %v854_v5 = vmax.f32 %v822_v63, 0.0  ;;  %v1214_v6 = vsel %vm1197_vm0, %v1205_v0, %v1213_v1  ;;  %v931_v0 = vpop.permute.xlu1 %930 }
 0x102   : > { %1382 = vmatmul.bf16.vlgmr.msra.gmra.mxu1 %v1214_v6 }
 0x103   : > { %v1046_v15 = vmul.f32 %v921_v11, %v854_v5  ;;  %v1489_v16 = vshrl.u32 %v4486_v4, 16  ;;  %v1492_v18 = vshll.u32 %v4486_v4, 16  ;;  %v555_v5 = vadd.f32 %v4233_v13, %v515_v52  ;;  %v3925_v11 = vld [vmem:[%s5465_s7 + $0xb0] sm:$0xff] }
 0x104   : > { %v713_v20 = vpop.f32.mrf.mxu0  ;;  %2545 = vmatpush.bf16.msrb.mxu0 %v3925_v11 }
 0x105   : > { %v1078_v21 = vpack.c.bf16 %v1046_v15, %v1046_v15  ;;  %v787_v23 = vmul.f32 %v4355_v22, %v713_v20  ;;  %v1491_v24 = vrot.slane %v1489_v16, 3  ;;  %v1494_v25 = vrot.slane %v1492_v18, 4 }
 0x106   : > { %v2657_v27 = vrot.slane %v1492_v18, 1  ;;  %v591_v19 = vmax.f32 %v555_v5, 0.0 }
 0x107   : > { %v1164_v28 = vunpack.c.l.b16 %v1078_v21  ;;  %v823_v30 = vadd.f32 %v4369_v29, %v787_v23  ;;  %v1495_v31 = vor.u32 %v1494_v25, %v1491_v24 }
 0x108   : > { %v4502_v33 = vsel %vm2438_vm1, %v2656_v40, %v2657_v27  ;;  %v2659_v34 = vor.u32 %v2657_v27, %v1489_v16  ;;  %2546 = vmatpush.bf16.msrb.mxu0 %v3924_v26 }
 0x109   : > { %v4504_v35 = vpack.c.b16 %v1164_v28, %v1163_v62  ;;  %v855_v36 = vmax.f32 %v823_v30, 0.0  ;;  %v1496_v37 = vsel %vm1197_vm0, %v1486_v39, %v1495_v31 }
 0x10a   : > { %1656 = vmatmul.bf16.gmra.mxu2 %v1496_v37  ;;  %v3908_v37 = vld [vmem:[%s5465_s7 + $0x128] sm:$0xff] }
 0x10b   : > { %v1047_v42 = vmul.f32 %v926_v38, %v855_v36  ;;  %v1216_v44 = vshrl.u32 %v4504_v35, 16  ;;  %v1219_v45 = vshll.u32 %v4504_v35, 16  ;;  %v3900_v38 = vld [vmem:[%s5465_s7 + $0x68] sm:$0xff]  ;;  %2165 = vmatpush.bf16.msrb.mxu2 %v3908_v37 }
 0x10c   : > { %v716_v47 = vpop.f32.mrf.mxu0  ;;  %1995 = vmatpush.bf16.msrb.mxu1 %v3900_v38  ;;  %2547 = vmatpush.bf16.msrb.mxu0 %v3923_v46  ;;  %v446_v46 = vld [vmem:[%s4218_s29 + $0x110] sm:$0xff] }
 0x10d   : > { %v1079_v49 = vpack.c.bf16 %v1047_v42, %v1047_v42  ;;  %v788_v40 = vmul.f32 %v4355_v22, %v716_v47  ;;  %v1218_v50 = vrot.slane %v1216_v44, 3  ;;  %v1221_v51 = vrot.slane %v1219_v45, 4 }
 0x10e   : > { %v2452_v53 = vrot.slane %v1219_v45, 1 }
 0x10f   : > { %v1165_v39 = vunpack.c.l.b16 %v1079_v49  ;;  %v824_v56 = vadd.f32 %v4369_v29, %v788_v40  ;;  %755 = vmatmul.bf16.gmra.mxu0 %v611_v43  ;;  %v4514_v57 = vor.u32 %v1221_v51, %v1218_v50 }
 0x110   : > { %v4521_v54 = vsel %vm2438_vm1, %v2451_v3, %v2452_v53  ;;  %v2454_v60 = vor.u32 %v2452_v53, %v1216_v44  ;;  %v556_v3 = vadd.f32 %v4233_v13, %v516_v58 }
 0x111   : > { %v4523_v61 = vpack.c.b16 %v1165_v39, %v1164_v28  ;;  %v856_v62 = vmax.f32 %v824_v56, 0.0  ;;  %v1223_v63 = vsel %vm1197_vm0, %v1213_v1, %v4514_v57 }
 0x112   : > { %1387 = vmatmul.bf16.gmra.mxu1 %v1223_v63  ;;  %v592_v25 = vmax.f32 %v556_v3, 0.0 }
 0x113   : > { %v1048_v6 = vmul.f32 %v931_v0, %v856_v62  ;;  %v1498_v8 = vshrl.u32 %v4523_v61, 16  ;;  %v1501_v10 = vshll.u32 %v4523_v61, 16  ;;  %v3922_v62 = vld [vmem:[%s5465_s7 + $0x98] sm:$0xff] }
 0x114   : > { %v718_v14 = vpop.f32.mrf.mxu0  ;;  %v612_v43 = vpack.c.bf16 %v592_v25, %v591_v19  ;;  %2548 = vmatpush.bf16.msrb.mxu0 %v3922_v62 }
 0x115   : > { %v1080_v15 = vpack.c.bf16 %v1048_v6, %v1048_v6  ;;  %v789_v1 = vmul.f32 %v4355_v22, %v718_v14  ;;  %v1500_v16 = vrot.slane %v1498_v8, 3  ;;  %v1503_v18 = vrot.slane %v1501_v10, 4 }
 0x116   : > { %v2660_v20 = vrot.slane %v1501_v10, 1  ;;  %v941_v10 = vpop.permute.xlu0 %940 }
 0x117   : > { %v1166_v21 = vunpack.c.l.b16 %v1080_v15  ;;  %v825_v23 = vadd.f32 %v4369_v29, %v789_v1  ;;  %v4536_v24 = vor.u32 %v1503_v18, %v1500_v16  ;;  %v3921_v15 = vld [vmem:[%s5465_s7 + $0x90] sm:$0xff] }
 0x118   : > { %v4542_v27 = vsel %vm2438_vm1, %v2659_v34, %v2660_v20  ;;  %v2662_v28 = vor.u32 %v2660_v20, %v1498_v8  ;;  %v936_v34 = vpop.permute.xlu2 %935  ;;  %2549 = vmatpush.bf16.msrb.mxu0 %v3921_v15 }
 0x119   : > { %5479 = vst [vmem:[#allocation2_spill] sm:$0xff] %v4542_v27  ;;  %v4544_v30 = vpack.c.b16 %v1166_v21, %v1165_v39  ;;  %v857_v32 = vmax.f32 %v825_v23, 0.0  ;;  %v1505_v36 = vsel %vm1197_vm0, %v1495_v31, %v4536_v24  ;;  %v444_v31 = vld [vmem:[%s4218_s29 + $0x100] sm:$0xff] }
 0x11a   : > { %1661 = vmatmul.bf16.gmra.mxu2 %v1505_v36  ;;  %1830 = vmatmul.bf16.vlgmr.msra.gmra.mxu3 %v1505_v36  ;;  %v517_v52 = vmul.f32 %v4223_v9, %v444_v31 }
 0x11b   : > { %v1049_v42 = vmul.f32 %v936_v34, %v857_v32  ;;  %v1225_v44 = vshrl.u32 %v4544_v30, 16  ;;  %v1228_v45 = vshll.u32 %v4544_v30, 16  ;;  %v3920_v32 = vld [vmem:[%s5465_s7 + $0x88] sm:$0xff] }
 0x11c   : > { %v721_v47 = vpop.f32.mrf.mxu0  ;;  %v557_v9 = vadd.f32 %v4233_v13, %v517_v52  ;;  %2550 = vmatpush.bf16.msrb.mxu0 %v3920_v32  ;;  %v4027_v52 = vld [vmem:[%s5460_s2] ss:$0 sm:$0xff] }
 0x11d   : > { %v1081_v49 = vpack.c.bf16 %v1049_v42, %v1049_v42  ;;  %v790_v40 = vmul.f32 %v4355_v22, %v721_v47  ;;  %v1227_v50 = vrot.slane %v1225_v44, 3  ;;  %v1230_v51 = vrot.slane %v1228_v45, 4  ;;  %v3919_v47 = vld [vmem:[%s5465_s7 + $0x80] sm:$0xff] }
 0x11e   : > { %v2455_v53 = vrot.slane %v1228_v45, 1  ;;  %v593_v20 = vmax.f32 %v557_v9, 0.0 }
 0x11f   : > { %v1167_v39 = vunpack.c.l.b16 %v1081_v49  ;;  %v826_v56 = vadd.f32 %v4369_v29, %v790_v40  ;;  %760 = vmatmul.bf16.gmra.mxu0 %v612_v43  ;;  %v4564_v58 = vor.u32 %v1230_v51, %v1227_v50  ;;  %v946_v43 = vpop.permute.xlu1 %945  ;;  %v447_v49 = vld [vmem:[%s4218_s29 + $0x118] sm:$0xff] }
 0x120   : > { %v4571_v63 = vsel %vm2438_vm1, %v2454_v60, %v2455_v53  ;;  %v2457_v0 = vor.u32 %v2455_v53, %v1225_v44  ;;  %v558_v60 = vadd.f32 %v4233_v13, %v518_v59  ;;  %2551 = vmatpush.bf16.msrb.mxu0 %v3919_v47  ;;  %v519_v53 = vmul.f32 %v4027_v52, %v446_v46  ;;  %v951_v15 = vpop.permute.xlu2 %950 }
 0x121   : > { %v4573_v5 = vpack.c.b16 %v1167_v39, %v1166_v21  ;;  %v858_v6 = vmax.f32 %v826_v56, 0.0  ;;  %v1232_v8 = vsel %vm1197_vm0, %v4514_v57, %v4564_v58 }
 0x122   : > { %1392 = vmatmul.bf16.gmra.mxu1 %v1232_v8  ;;  %v594_v13 = vmax.f32 %v558_v60, 0.0  ;;  %v3899_v60 = vld [vmem:[%s5465_s7 + $0x60] sm:$0xff] }
 0x123   : > { %v1050_v3 = vmul.f32 %v941_v10, %v858_v6  ;;  %v1507_v11 = vshrl.u32 %v4573_v5, 16  ;;  %v1510_v14 = vshll.u32 %v4573_v5, 16  ;;  %v520_v6 = vmul.f32 %v4027_v52, %v447_v49  ;;  %1996 = vmatpush.bf16.msrb.mxu1 %v3899_v60 }
 0x124   : > { %v723_v1 = vpop.f32.mrf.mxu0  ;;  %v613_v45 = vpack.c.bf16 %v594_v13, %v593_v20 }
 0x125   : > { %v1082_v16 = vpack.c.bf16 %v1050_v3, %v1050_v3  ;;  %v791_v57 = vmul.f32 %v4355_v22, %v723_v1  ;;  %v1509_v18 = vrot.slane %v1507_v11, 3  ;;  %v1512_v19 = vrot.slane %v1510_v14, 4 }
 0x126   : > { %v2663_v21 = vrot.slane %v1510_v14, 1  ;;  %v3907_v14 = vld [vmem:[%s5465_s7 + $0x120] sm:$0xff] }
 0x127   : > { %v1168_v23 = vunpack.c.l.b16 %v1082_v16  ;;  %v827_v25 = vadd.f32 %v4369_v29, %v791_v57  ;;  %v4587_v26 = vor.u32 %v1512_v19, %v1509_v18  ;;  %2166 = vmatpush.bf16.msrb.mxu2 %v3907_v14 }
 0x128   : > { %v4593_v36 = vsel %vm2438_vm1, %v2662_v28, %v2663_v21  ;;  %v2665_v37 = vor.u32 %v2663_v21, %v1507_v11 }
 0x129   : > { %5480 = vst [vmem:[#allocation3_spill] sm:$0xff] %v4593_v36  ;;  %v4595_v38 = vpack.c.b16 %v1168_v23, %v1167_v39  ;;  %v859_v34 = vmax.f32 %v827_v25, 0.0  ;;  %v1514_v42 = vsel %vm1197_vm0, %v4536_v24, %v4587_v26 }
 0x12a   : > { %1666 = vmatmul.bf16.gmra.mxu2 %v1514_v42  ;;  %1835 = vmatmul.bf16.gmra.mxu3 %v1514_v42 }
 0x12b   : > { %v1051_v44 = vmul.f32 %v946_v43, %v859_v34  ;;  %v1234_v31 = vshrl.u32 %v4595_v38, 16  ;;  %v1237_v28 = vshll.u32 %v4595_v38, 16 }
 0x12c   : > { %v726_v48 = vpop.f32.mrf.mxu0 }
 0x12d   : > { %v1083_v40 = vpack.c.bf16 %v1051_v44, %v1051_v44  ;;  %v792_v24 = vmul.f32 %v4355_v22, %v726_v48  ;;  %v1236_v50 = vrot.slane %v1234_v31, 3  ;;  %v1239_v51 = vrot.slane %v1237_v28, 4  ;;  %v956_v48 = vpop.permute.xlu0 %955 }
 0x12e   : > { %v2458_v39 = vrot.slane %v1237_v28, 1 }
 0x12f   : > { %v1169_v56 = vunpack.c.l.b16 %v1083_v40  ;;  %v828_v59 = vadd.f32 %v4369_v29, %v792_v24  ;;  %765 = vmatmul.bf16.gmra.mxu0 %v613_v45  ;;  %v1240_v62 = vor.u32 %v1239_v51, %v1236_v50 }
 0x130   : > { %v4613_v8 = vsel %vm2438_vm1, %v2457_v0, %v2458_v39  ;;  %v2460_v10 = vor.u32 %v2458_v39, %v1234_v31  ;;  %v4028_v0 = vld [vmem:[%s5461_s3] ss:$0 sm:$0xff] }
 0x131   : > { %5481 = vst [vmem:[#allocation4_spill] sm:$0xff] %v4613_v8  ;;  %v4615_v9 = vpack.c.b16 %v1169_v56, %v1168_v23  ;;  %v860_v3 = vmax.f32 %v828_v59, 0.0  ;;  %v1241_v11 = vsel %vm1197_vm0, %v4564_v58, %v1240_v62  ;;  %v559_v1 = vadd.f32 %v4028_v0, %v519_v53 }
 0x132   : > { %1397 = vmatmul.bf16.gmra.mxu1 %v1241_v11  ;;  %v560_v18 = vadd.f32 %v4028_v0, %v520_v6  ;;  %v961_v0 = vpop.permute.xlu1 %960 }
 0x133   : > { %v1052_v16 = vmul.f32 %v951_v15, %v860_v3  ;;  %v1516_v57 = vshrl.u32 %v4615_v9, 16  ;;  %v1519_v58 = vshll.u32 %v4615_v9, 16  ;;  %v595_v13 = vmax.f32 %v559_v1, 0.0 }
 0x134   : > { %v728_v19 = vpop.f32.mrf.mxu0  ;;  %v596_v44 = vmax.f32 %v560_v18, 0.0  ;;  %v2442_v18 = vshll.u32 %v4402_v7, 16 }
 0x135   : > { %v1084_v20 = vpack.c.bf16 %v1052_v16, %v1052_v16  ;;  %v793_v21 = vmul.f32 %v4355_v22, %v728_v19  ;;  %v1518_v23 = vrot.slane %v1516_v57, 3  ;;  %v1521_v25 = vrot.slane %v1519_v58, 4 }
 0x136   : > { %v2666_v32 = vrot.slane %v1519_v58, 1  ;;  %v614_v40 = vpack.c.bf16 %v596_v44, %v595_v13 }
 0x137   : > { %v1170_v34 = vunpack.c.l.b16 %v1084_v20  ;;  %v829_v42 = vadd.f32 %v4369_v29, %v793_v21  ;;  %v1522_v43 = vor.u32 %v1521_v25, %v1518_v23 }
 0x138   : > { %v4633_v45 = vsel %vm2438_vm1, %v2665_v37, %v2666_v32  ;;  %v2668_v31 = vor.u32 %v2666_v32, %v1516_v57  ;;  %v2444_v32 = vrot.slane %v2442_v18, 1 }
 0x139   : > { %5482 = vst [vmem:[#allocation5_spill] sm:$0xff] %v4633_v45  ;;  %v4635_v28 = vpack.c.b16 %v1170_v34, %v1169_v56  ;;  %v861_v46 = vmax.f32 %v829_v42, 0.0  ;;  %v1523_v47 = vsel %vm1197_vm0, %v4587_v26, %v1522_v43 }
 0x13a   : > { %1671 = vmatmul.bf16.gmra.mxu2 %v1523_v47  ;;  %1840 = vmatmul.bf16.gmra.mxu3 %v1523_v47 }
 0x13b   : > { %v1053_v49 = vmul.f32 %v956_v48, %v861_v46  ;;  %v1243_v24 = vshrl.u32 %v4635_v28, 16  ;;  %v1246_v50 = vshll.u32 %v4635_v28, 16  ;;  %v3906_v48 = vld [vmem:[%s5465_s7 + $0x118] sm:$0xff] }
 0x13c   : > { %v731_v51 = vpop.f32.mrf.mxu0  ;;  %2167 = vmatpush.bf16.msrb.mxu2 %v3906_v48 }
 0x13d   : > { %v1085_v52 = vpack.c.bf16 %v1053_v49, %v1053_v49  ;;  %v794_v37 = vmul.f32 %v4355_v22, %v731_v51  ;;  %v1245_v53 = vrot.slane %v1243_v24, 3  ;;  %v1248_v39 = vrot.slane %v1246_v50, 4  ;;  %v3898_v49 = vld [vmem:[%s5465_s7 + $0x58] sm:$0xff] }
 0x13e   : > { %v2461_v56 = vrot.slane %v1246_v50, 1  ;;  %1997 = vmatpush.bf16.msrb.mxu1 %v3898_v49 }
 0x13f   : > { %v1171_v59 = vunpack.c.l.b16 %v1085_v52  ;;  %v830_v6 = vadd.f32 %v4369_v29, %v794_v37  ;;  %770 = vmatmul.bf16.gmra.mxu0 %v614_v40  ;;  %v1249_v26 = vor.u32 %v1248_v39, %v1245_v53  ;;  %v966_v40 = vpop.permute.xlu2 %965 }
 0x140   : > { %v4644_v3 = vsel %vm2438_vm1, %v2460_v10, %v2461_v56  ;;  %v2463_v11 = vor.u32 %v2461_v56, %v1243_v24 }
 0x141   : > { %5483 = vst [vmem:[#allocation6_spill] sm:$0xff] %v4644_v3  ;;  %v4646_v14 = vpack.c.b16 %v1171_v59, %v1170_v34  ;;  %v862_v60 = vmax.f32 %v830_v6, 0.0  ;;  %v1250_v15 = vsel %vm1197_vm0, %v1240_v62, %v1249_v26 }
 0x142   : > { %1402 = vmatmul.bf16.gmra.mxu1 %v1250_v15 }
 0x143   : > { %v1054_v1 = vmul.f32 %v961_v0, %v862_v60  ;;  %v1525_v16 = vshrl.u32 %v4646_v14, 16  ;;  %v1528_v57 = vshll.u32 %v4646_v14, 16 }
 0x144   : > { %v733_v58 = vpop.f32.mrf.mxu0 }
 0x145   : > { %v1086_v19 = vpack.c.bf16 %v1054_v1, %v1054_v1  ;;  %v795_v10 = vmul.f32 %v4355_v22, %v733_v58  ;;  %v1527_v20 = vrot.slane %v1525_v16, 3  ;;  %v1530_v21 = vrot.slane %v1528_v57, 4 }
 0x146   : > { %v2669_v23 = vrot.slane %v1528_v57, 1 }
 0x147   : > { %v1172_v25 = vunpack.c.l.b16 %v1086_v19  ;;  %v831_v13 = vadd.f32 %v4369_v29, %v795_v10  ;;  %v1531_v62 = vor.u32 %v1530_v21, %v1527_v20  ;;  %v971_v19 = vpop.permute.xlu0 %970 }
 0x148   : > { %v4655_v34 = vsel %vm2438_vm1, %v2668_v31, %v2669_v23  ;;  %v2671_v42 = vor.u32 %v2669_v23, %v1525_v16  ;;  %v2440_v31 = vshrl.u32 %v4402_v7, 16 }
 0x149   : > { %5484 = vst [vmem:[#allocation7_spill] sm:$0xff] %v4655_v34  ;;  %v4657_v44 = vpack.c.b16 %v1172_v25, %v1171_v59  ;;  %v863_v46 = vmax.f32 %v831_v13, 0.0  ;;  %v1532_v47 = vsel %vm1197_vm0, %v1522_v43, %v1531_v62 }
 0x14a   : > { %1676 = vmatmul.bf16.gmra.mxu2 %v1532_v47  ;;  %1845 = vmatmul.bf16.gmra.mxu3 %v1532_v47  ;;  %v2445_v52 = vor.u32 %v2444_v32, %v2440_v31 }
 0x14b   : > { %v1055_v24 = vmul.f32 %v966_v40, %v863_v46  ;;  %v1252_v50 = vshrl.u32 %v4657_v44, 16  ;;  %v1255_v51 = vshll.u32 %v4657_v44, 16 }
 0x14c   : > { %v736_v43 = vpop.f32.mrf.mxu0  ;;  %v2447_v59 = vsel %vm2438_vm1, %v2445_v52, %v4454_v12 }
 0x14d   : > { %v1087_v37 = vpack.c.bf16 %v1055_v24, %v1055_v24  ;;  %v796_v53 = vmul.f32 %v4355_v22, %v736_v43  ;;  %v1254_v39 = vrot.slane %v1252_v50, 3  ;;  %v1257_v56 = vrot.slane %v1255_v51, 4 }
 0x14e   : > { %v2464_v6 = vrot.slane %v1255_v51, 1 }
 0x14f   : > { %v1173_v60 = vunpack.c.l.b16 %v1087_v37  ;;  %v832_v15 = vadd.f32 %v4369_v29, %v796_v53  ;;  %2552 = vmatmul.bf16.vlgmr.msrb.gmra.mxu0 %v2447_v59  ;;  %v1258_v0 = vor.u32 %v1257_v56, %v1254_v39 }
 0x150   : > { %v4674_v1 = vsel %vm2438_vm1, %v2463_v11, %v2464_v6  ;;  %v2466_v16 = vor.u32 %v2464_v6, %v1252_v50  ;;  %v976_v50 = vpop.permute.xlu1 %975 }
 0x151   : > { %v4676_v57 = vpack.c.b16 %v1173_v60, %v1172_v25  ;;  %v864_v58 = vmax.f32 %v832_v15, 0.0  ;;  %v1259_v18 = vsel %vm1197_vm0, %v1249_v26, %v1258_v0 }
 0x152   : > { %1407 = vmatmul.bf16.gmra.mxu1 %v1259_v18 }
 0x153   : > { %v1056_v10 = vmul.f32 %v971_v19, %v864_v58  ;;  %v1534_v12 = vshrl.u32 %v4676_v57, 16  ;;  %v1537_v20 = vshll.u32 %v4676_v57, 16 }
 0x154   : > { %v738_v21 = vpop.f32.mrf.mxu0 }
 0x155   : > { %v1088_v23 = vpack.c.bf16 %v1056_v10, %v1056_v10  ;;  %v797_v13 = vmul.f32 %v4355_v22, %v738_v21  ;;  %v1536_v32 = vrot.slane %v1534_v12, 3  ;;  %v1539_v11 = vrot.slane %v1537_v20, 4 }
 0x156   : > { %v2672_v46 = vrot.slane %v1537_v20, 1  ;;  %v981_v20 = vpop.permute.xlu2 %980 }
 0x157   : > { %v1174_v47 = vunpack.c.l.b16 %v1088_v23  ;;  %v833_v25 = vadd.f32 %v4369_v29, %v797_v13  ;;  %v1540_v48 = vor.u32 %v1539_v11, %v1536_v32 }
 0x158   : > { %v4684_v26 = vsel %vm2438_vm1, %v2671_v42, %v2672_v46  ;;  %v2674_v49 = vor.u32 %v2672_v46, %v1534_v12  ;;  %v3897_v12 = vld [vmem:[%s5465_s7 + $0x50] sm:$0xff] }
 0x159   : > { %5485 = vst [vmem:[#allocation8_spill] sm:$0xff] %v4684_v26  ;;  %v4686_v40 = vpack.c.b16 %v1174_v47, %v1173_v60  ;;  %v865_v31 = vmax.f32 %v833_v25, 0.0  ;;  %v1541_v24 = vsel %vm1197_vm0, %v1531_v62, %v1540_v48  ;;  %1998 = vmatpush.bf16.msrb.mxu1 %v3897_v12 }
 0x15a   : > { %1681 = vmatmul.bf16.gmra.mxu2 %v1541_v24  ;;  %1850 = vmatmul.bf16.gmra.mxu3 %v1541_v24 }
 0x15b   : > { %v1057_v51 = vmul.f32 %v976_v50, %v865_v31  ;;  %v1261_v43 = vshrl.u32 %v4686_v40, 16  ;;  %v1264_v52 = vshll.u32 %v4686_v40, 16 }
 0x15c   : > { %v741_v37 = vpop.f32.mrf.mxu0 }
 0x15d   : > { %v1089_v53 = vpack.c.bf16 %v1057_v51, %v1057_v51  ;;  %v798_v39 = vmul.f32 %v4355_v22, %v741_v37  ;;  %v1263_v42 = vrot.slane %v1261_v43, 3  ;;  %v1266_v56 = vrot.slane %v1264_v52, 4  ;;  %v3905_v22 = vld [vmem:[%s5465_s7 + $0x110] sm:$0xff] }
 0x15e   : > { %v2467_v59 = vrot.slane %v1264_v52, 1  ;;  %2168 = vmatpush.bf16.msrb.mxu2 %v3905_v22 }
 0x15f   : > { %v1175_v6 = vunpack.c.l.b16 %v1089_v53  ;;  %v834_v60 = vadd.f32 %v4369_v29, %v798_v39  ;;  %2557 = vmatmul.bf16.gmra.mxu0 %v4484_v2  ;;  %v1267_v62 = vor.u32 %v1266_v56, %v1263_v42  ;;  %v986_v53 = vpop.permute.xlu0 %985 }
 0x160   : > { %v4695_v15 = vsel %vm2438_vm1, %v2466_v16, %v2467_v59  ;;  %v2469_v58 = vor.u32 %v2467_v59, %v1261_v43 }
 0x161   : > { %v4697_v18 = vpack.c.b16 %v1175_v6, %v1174_v47  ;;  %v866_v19 = vmax.f32 %v834_v60, 0.0  ;;  %v1268_v10 = vsel %vm1197_vm0, %v1258_v0, %v1267_v62  ;;  %v4711_v0 = vld [vmem:[%s5463_s5] ss:$0 sm:$0xff] }
 0x162   : > { %1412 = vmatmul.bf16.gmra.mxu1 %v1268_v10 }
 0x163   : > { %v1058_v2 = vmul.f32 %v981_v20, %v866_v19  ;;  %v1543_v16 = vshrl.u32 %v4697_v18, 16  ;;  %v1546_v21 = vshll.u32 %v4697_v18, 16 }
 0x164   : > { %v743_v23 = vpop.f32.mrf.mxu0 }
 0x165   : > { %v1090_v13 = vpack.c.bf16 %v1058_v2, %v1058_v2  ;;  %v799_v32 = vmul.f32 %v4711_v0, %v743_v23  ;;  %v1545_v11 = vrot.slane %v1543_v16, 3  ;;  %v1548_v46 = vrot.slane %v1546_v21, 4 }
 0x166   : > { %v2675_v47 = vrot.slane %v1546_v21, 1 }
 0x167   : > { %v1176_v25 = vunpack.c.l.b16 %v1090_v13  ;;  %v835_v31 = vadd.f32 %v4369_v29, %v799_v32  ;;  %v1549_v24 = vor.u32 %v1548_v46, %v1545_v11  ;;  %v991_v32 = vpop.permute.xlu1 %990 }
 0x168   : > { %v4716_v50 = vsel %vm2438_vm1, %v2674_v49, %v2675_v47  ;;  %v2677_v51 = vor.u32 %v2675_v47, %v1543_v16 }
 0x169   : > { %5486 = vst [vmem:[#allocation9_spill] sm:$0xff] %v4716_v50  ;;  %v4718_v43 = vpack.c.b16 %v1176_v25, %v1175_v6  ;;  %v867_v52 = vmax.f32 %v835_v31, 0.0  ;;  %v1550_v37 = vsel %vm1197_vm0, %v1540_v48, %v1549_v24  ;;  %v4727_v48 = vld [vmem:[%s5464_s6] ss:$0 sm:$0xff] }
 0x16a   : > { %1686 = vmatmul.bf16.gmra.mxu2 %v1550_v37  ;;  %1855 = vmatmul.bf16.gmra.mxu3 %v1550_v37 }
 0x16b   : > { %v1059_v39 = vmul.f32 %v986_v53, %v867_v52  ;;  %v1270_v42 = vshrl.u32 %v4718_v43, 16  ;;  %v1273_v56 = vshll.u32 %v4718_v43, 16 }
 0x16c   : > { %v746_v59 = vpop.f32.mrf.mxu0 }
 0x16d   : > { %v1091_v29 = vpack.c.bf16 %v1059_v39, %v1059_v39  ;;  %v800_v60 = vmul.f32 %v4711_v0, %v746_v59  ;;  %v1647_v49 = vpop.f32.mrf.mxu2  ;;  %v1272_v19 = vrot.slane %v1270_v42, 3  ;;  %v1275_v10 = vrot.slane %v1273_v56, 4 }
 0x16e   : > { %v2470_v6 = vrot.slane %v1273_v56, 1 }
 0x16f   : > { %v1177_v22 = vunpack.c.l.b16 %v1091_v29  ;;  %v836_v12 = vadd.f32 %v4727_v48, %v800_v60  ;;  %2562 = vmatmul.bf16.gmra.mxu0 %v4521_v54  ;;  %v1276_v20 = vor.u32 %v1275_v10, %v1272_v19  ;;  %v3904_v10 = vld [vmem:[%s5465_s7 + $0x108] sm:$0xff] }
 0x170   : > { %v4732_v2 = vsel %vm2438_vm1, %v2469_v58, %v2470_v6  ;;  %v2472_v16 = vor.u32 %v2470_v6, %v1270_v42  ;;  %v3896_v6 = vld [vmem:[%s5465_s7 + $0x48] sm:$0xff]  ;;  %2169 = vmatpush.bf16.msrb.mxu2 %v3904_v10 }
 0x171   : > { %v4734_v21 = vpack.c.b16 %v1177_v22, %v1176_v25  ;;  %v868_v23 = vmax.f32 %v836_v12, 0.0  ;;  %v1277_v13 = vsel %vm1197_vm0, %v1267_v62, %v1276_v20  ;;  %v996_v12 = vpop.permute.xlu2 %995  ;;  %1999 = vmatpush.bf16.msrb.mxu1 %v3896_v6 }
 0x172   : > { %1417 = vmatmul.bf16.gmra.mxu1 %v1277_v13 }
 0x173   : > { %v1060_v11 = vmul.f32 %v991_v32, %v868_v23  ;;  %v1552_v46 = vshrl.u32 %v4734_v21, 16  ;;  %v1555_v47 = vshll.u32 %v4734_v21, 16 }
 0x174   : > { %v748_v31 = vpop.f32.mrf.mxu0 }
 0x175   : > { %v1092_v52 = vpack.c.bf16 %v1060_v11, %v1060_v11  ;;  %v801_v54 = vmul.f32 %v4711_v0, %v748_v31  ;;  %v1649_v37 = vpop.f32.mrf.mxu2  ;;  %v1554_v58 = vrot.slane %v1552_v46, 3  ;;  %v1557_v53 = vrot.slane %v1555_v47, 4 }
 0x176   : > { %v2678_v39 = vrot.slane %v1555_v47, 1 }
 0x177   : > { %v1178_v25 = vunpack.c.l.b16 %v1092_v52  ;;  %v837_v42 = vadd.f32 %v4727_v48, %v801_v54  ;;  %v1558_v56 = vor.u32 %v1557_v53, %v1554_v58 }
 0x178   : > { %v4742_v62 = vsel %vm2438_vm1, %v2677_v51, %v2678_v39  ;;  %v2680_v59 = vor.u32 %v2678_v39, %v1552_v46 }
 0x179   : > { %5487 = vst [vmem:[#allocation10_spill] sm:$0xff] %v4742_v62  ;;  %v4744_v29 = vpack.c.b16 %v1178_v25, %v1177_v22  ;;  %v869_v60 = vmax.f32 %v837_v42, 0.0  ;;  %v1559_v19 = vsel %vm1197_vm0, %v1549_v24, %v1558_v56 }
 0x17a   : > { %1691 = vmatmul.bf16.gmra.mxu2 %v1559_v19  ;;  %1860 = vmatmul.bf16.gmra.mxu3 %v1559_v19 }
 0x17b   : > { %5488 = vst [vmem:[#allocation11_spill] sm:$0xff] %v4744_v29  ;;  %v1061_v23 = vmul.f32 %v996_v12, %v869_v60  ;;  %v1279_v51 = vshrl.u32 %v4744_v29, 16  ;;  %v1282_v22 = vshll.u32 %v4744_v29, 16  ;;  %v3918_v12 = vld [vmem:[%s5465_s7 + $0x1f8] sm:$0xff] }
 0x17c   : > { %v751_v13 = vpop.f32.mrf.mxu0  ;;  %2326 = vmatpush.bf16.msrb.mxu3 %v3918_v12 }
 0x17d   : > { %v1093_v24 = vpack.c.bf16 %v1061_v23, %v1061_v23  ;;  %v802_v32 = vmul.f32 %v4711_v0, %v751_v13  ;;  %v4756_v11 = vpop.f32.mrf.mxu2  ;;  %v1281_v46 = vrot.slane %v1279_v51, 3  ;;  %v1284_v47 = vrot.slane %v1282_v22, 4  ;;  %v1001_v23 = vpop.permute.xlu0 %1000 }
 0x17e   : > { %v2473_v31 = vrot.slane %v1282_v22, 1 }
 0x17f   : > { %v1179_v52 = vunpack.c.l.b16 %v1093_v24  ;;  %v838_v54 = vadd.f32 %v4727_v48, %v802_v32  ;;  %v1383_v58 = vpop.f32.mrf.mxu1  ;;  %2567 = vmatmul.bf16.gmra.mxu0 %v4571_v63  ;;  %v1285_v53 = vor.u32 %v1284_v47, %v1281_v46  ;;  %v3903_v46 = vld [vmem:[%s5465_s7 + $0x100] sm:$0xff] }
 0x180   : > { %v4760_v39 = vadd.f32 %v1647_v49, %v1383_v58  ;;  %v4763_v42 = vsel %vm2438_vm1, %v2472_v16, %v2473_v31  ;;  %v2475_v60 = vor.u32 %v2473_v31, %v1279_v51  ;;  %2170 = vmatpush.bf16.msrb.mxu2 %v3903_v46 }
 0x181   : > { %v4765_v19 = vpack.c.b16 %v1179_v52, %v1178_v25  ;;  %v870_v10 = vmax.f32 %v838_v54, 0.0  ;;  %v1286_v6 = vsel %vm1197_vm0, %v1276_v20, %v1285_v53 }
 0x182   : > { %1422 = vmatmul.bf16.gmra.mxu1 %v1286_v6 }
 0x183   : > { %v1062_v22 = vmul.f32 %v1001_v23, %v870_v10  ;;  %v1561_v13 = vshrl.u32 %v4765_v19, 16  ;;  %v1564_v49 = vshll.u32 %v4765_v19, 16 }
 0x184   : > { %v753_v16 = vpop.f32.mrf.mxu0 }
 0x185   : > { %v1094_v24 = vpack.c.bf16 %v1062_v22, %v1062_v22  ;;  %v803_v25 = vmul.f32 %v4711_v0, %v753_v16  ;;  %v4774_v51 = vpop.f32.mrf.mxu2  ;;  %v1563_v32 = vrot.slane %v1561_v13, 3  ;;  %v1566_v20 = vrot.slane %v1564_v49, 4 }
 0x186   : > { %v2681_v47 = vrot.slane %v1564_v49, 1 }
 0x187   : > { %v1180_v31 = vunpack.c.l.b16 %v1094_v24  ;;  %v839_v54 = vadd.f32 %v4727_v48, %v803_v25  ;;  %v1385_v58 = vpop.f32.mrf.mxu1  ;;  %v4780_v10 = vor.u32 %v1566_v20, %v1563_v32  ;;  %v1006_v24 = vpop.permute.xlu1 %1005 }
 0x188   : > { %v4782_v6 = vadd.f32 %v1649_v37, %v1385_v58  ;;  %v4785_v12 = vsel %vm2438_vm1, %v2680_v59, %v2681_v47  ;;  %v2683_v23 = vor.u32 %v2681_v47, %v1561_v13 }
 0x189   : > { %5489 = vst [vmem:[#allocation12_spill] sm:$0xff] %v4785_v12  ;;  %v4787_v22 = vpack.c.b16 %v1180_v31, %v1179_v52  ;;  %v871_v16 = vmax.f32 %v839_v54, 0.0  ;;  %v1568_v62 = vsel %vm1197_vm0, %v1558_v56, %v4780_v10  ;;  %v1461_v49 = vpack.c.b16 %v1180_v31, %v1180_v31 }
 0x18a   : > { %1696 = vmatmul.bf16.gmra.mxu2 %v1568_v62  ;;  %1865 = vmatmul.bf16.gmra.mxu3 %v1568_v62 }
 0x18b   : > { %5490 = vst [vmem:[#allocation13_spill] sm:$0xff] %v4787_v22  ;;  %v1063_v25 = vmul.f32 %v1006_v24, %v871_v16  ;;  %v1288_v32 = vshrl.u32 %v4787_v22, 16  ;;  %v1291_v37 = vshll.u32 %v4787_v22, 16  ;;  %v1570_v20 = vshrl.u32 %v1461_v49, 16 }
 0x18c   : > { %v756_v46 = vpop.f32.mrf.mxu0  ;;  %v1573_v59 = vshll.u32 %v1461_v49, 16 }
 0x18d   : > { %v1095_v58 = vpack.c.bf16 %v1063_v25, %v1063_v25  ;;  %v804_v52 = vmul.f32 %v4711_v0, %v756_v46  ;;  %v4794_v13 = vpop.f32.mrf.mxu2  ;;  %v1290_v47 = vrot.slane %v1288_v32, 3  ;;  %v1293_v54 = vrot.slane %v1291_v37, 4 }
 0x18e   : > { %v2476_v56 = vrot.slane %v1291_v37, 1  ;;  %v1572_v24 = vrot.slane %v1570_v20, 3  ;;  %v1575_v49 = vrot.slane %v1573_v59, 4  ;;  %v1011_v20 = vpop.permute.xlu2 %1010 }
 0x18f   : > { %v1181_v12 = vunpack.c.l.b16 %v1095_v58  ;;  %v840_v50 = vadd.f32 %v4727_v48, %v804_v52  ;;  %v1388_v62 = vpop.f32.mrf.mxu1  ;;  %2572 = vmatmul.bf16.gmra.mxu0 %v4613_v8  ;;  %v4798_v16 = vor.u32 %v1293_v54, %v1290_v47  ;;  %v3895_v52 = vld [vmem:[%s5465_s7 + $0x40] sm:$0xff] }
 0x190   : > { %v4801_v26 = vadd.f32 %v4756_v11, %v1388_v62  ;;  %v4804_v25 = vsel %vm2438_vm1, %v2475_v60, %v2476_v56  ;;  %v2478_v46 = vor.u32 %v2476_v56, %v1288_v32  ;;  %2000 = vmatpush.bf16.msrb.mxu1 %v3895_v52  ;;  %v1576_v54 = vor.u32 %v1575_v49, %v1572_v24 }
 0x191   : > { %v4806_v34 = vpack.c.b16 %v1181_v12, %v1180_v31  ;;  %v872_v37 = vmax.f32 %v840_v50, 0.0  ;;  %v1295_v58 = vsel %vm1197_vm0, %v1285_v53, %v4798_v16  ;;  %v2437_v47 = vpack.c.b16 %v1181_v12, %v1181_v12 }
 0x192   : > { %1427 = vmatmul.bf16.gmra.mxu1 %v1295_v58 }
 0x193   : > { %5491 = vst [vmem:[#allocation14_spill] sm:$0xff] %v4806_v34  ;;  %v1064_v11 = vmul.f32 %v1011_v20, %v872_v37  ;;  %v1735_v59 = vshrl.u32 %v4806_v34, 16  ;;  %v1738_v60 = vshll.u32 %v4806_v34, 16  ;;  %v2480_v32 = vshll.u32 %v2437_v47, 16 }
 0x194   : > { %v758_v31 = vpop.f32.mrf.mxu0 }
 0x195   : > { %v1096_v50 = vpack.c.bf16 %v1064_v11, %v1064_v11  ;;  %v805_v56 = vmul.f32 %v4711_v0, %v758_v31  ;;  %v4816_v53 = vpop.f32.mrf.mxu2  ;;  %v1737_v62 = vrot.slane %v1735_v59, 3  ;;  %v1740_v45 = vrot.slane %v1738_v60, 4 }
 0x196   : > { %v2482_v36 = vrot.slane %v2480_v32, 1  ;;  %v2684_v27 = vrot.slane %v1738_v60, 1  ;;  %v1577_v32 = vsel %vm1197_vm0, %v4780_v10, %v1576_v54  ;;  %v1026_v34 = vpop.permute.xlu2 %1025 }
 0x197   : > { %v1182_v8 = vunpack.c.l.b16 %v1096_v50  ;;  %v841_v37 = vadd.f32 %v4727_v48, %v805_v56  ;;  %v1390_v58 = vpop.f32.mrf.mxu1  ;;  %v4819_v20 = vor.u32 %v1740_v45, %v1737_v62 }
 0x198   : > { %v4822_v52 = vadd.f32 %v4774_v51, %v1390_v58  ;;  %v4825_v24 = vsel %vm2438_vm1, %v2478_v46, %v2482_v36  ;;  %v4828_v49 = vsel %vm2438_vm1, %v2683_v23, %v2684_v27  ;;  %v4830_v47 = vor.u32 %v2684_v27, %v1735_v59  ;;  %v3917_v36 = vld [vmem:[%s5465_s7 + $0x1f0] sm:$0xff]  ;;  %v1016_v51 = vpop.permute.xlu0 %1015 }
 0x199   : > { %5492 = vst [vmem:[#allocation15_spill] sm:$0xff] %v4828_v49  ;;  %v4832_v11 = vpack.c.b16 %v1182_v8, %v1181_v12  ;;  %v873_v60 = vmax.f32 %v841_v37, 0.0  ;;  %v1742_v45 = vsel %vm1197_vm0, %v4780_v10, %v4819_v20  ;;  %2327 = vmatpush.bf16.msrb.mxu3 %v3917_v36 }
 0x19a   : > { %1701 = vmatmul.bf16.gmra.mxu2 %v1577_v32  ;;  %1870 = vmatmul.bf16.gmra.mxu3 %v1742_v45 }
 0x19b   : > { %5493 = vst [vmem:[#allocation16_spill] sm:$0xff] %v4832_v11  ;;  %v1065_v23 = vmul.f32 %v1016_v51, %v873_v60  ;;  %v1297_v27 = vshrl.u32 %v4832_v11, 16  ;;  %v1300_v12 = vshll.u32 %v4832_v11, 16  ;;  %v4857_v51 = vld [vmem:[%s5465_s7 + $0x238] sm:$0xff] }
 0x19c   : > { %v761_v59 = vpop.f32.mrf.mxu0  ;;  %3959 = vmatpush.bf16.msra.mxu2 %v4857_v51 }
 0x19d   : > { %v1097_v31 = vpack.c.bf16 %v1065_v23, %v1065_v23  ;;  %v806_v54 = vmul.f32 %v4711_v0, %v761_v59  ;;  %v4845_v50 = vpop.f32.mrf.mxu2  ;;  %v1831_v10 = vpop.f32.mrf.mxu3  ;;  %v1299_v56 = vrot.slane %v1297_v27, 3  ;;  %v1302_v62 = vrot.slane %v1300_v12, 4 }
 0x19e   : > { %v4848_v37 = vadd.f32 %v1831_v10, %v4760_v39  ;;  %v2868_v58 = vrot.slane %v1300_v12, 1 }
 0x19f   : > { %v1183_v32 = vunpack.c.l.b16 %v1097_v31  ;;  %v842_v60 = vadd.f32 %v4727_v48, %v806_v54  ;;  %v1393_v45 = vpop.f32.mrf.mxu1  ;;  %2577 = vmatmul.bf16.gmra.mxu0 %v4644_v3  ;;  %v4852_v36 = vor.u32 %v1302_v62, %v1299_v56  ;;  %v1021_v56 = vpop.permute.xlu1 %1020 }
 0x1a0   : > { %v4860_v23 = vadd.f32 %v4794_v13, %v1393_v45  ;;  %v4863_v39 = vsel %vm2438_vm1, %v2478_v46, %v2868_v58  ;;  %v4865_v12 = vor.u32 %v2868_v58, %v1297_v27  ;;  %v3934_v13 = vld [vmem:[%s5465_s7 + $0x178] sm:$0xff]  ;;  %v3916_v46 = vld [vmem:[%s5465_s7 + $0x1e8] sm:$0xff] }
 0x1a1   : > { %5494 = vst [vmem:[#allocation17_spill] sm:$0xff] %v4863_v39  ;;  %v4867_v59 = vpack.c.b16 %v1183_v32, %v1182_v8  ;;  %v874_v31 = vmax.f32 %v842_v60, 0.0  ;;  %v1304_v54 = vsel %vm1197_vm0, %v4798_v16, %v4852_v36  ;;  %v1196_v10 = vpack.c.b16 %v1183_v32, %v1183_v32  ;;  %3951 = vmatpush.bf16.msra.mxu1 %v3934_v13 }
 0x1a2   : > { %5495 = vst [vmem:[#allocation18_spill] sm:$0xff] %v4865_v12  ;;  %1432 = vmatmul.bf16.gmra.mxu1 %v1304_v54  ;;  %2328 = vmatpush.bf16.msrb.mxu3 %v3916_v46 }
 0x1a3   : > { %5496 = vst [vmem:[#allocation19_spill] sm:$0xff] %v4867_v59  ;;  %v1066_v8 = vmul.f32 %v1021_v56, %v874_v31  ;;  %v1744_v27 = vshrl.u32 %v4867_v59, 16  ;;  %v1747_v62 = vshll.u32 %v4867_v59, 16  ;;  %v1306_v58 = vshrl.u32 %v1196_v10, 16  ;;  %2755 = vmatpush.bf16.msra.mxu0 %v3934_v13  ;;  %v3915_v56 = vld [vmem:[%s5465_s7 + $0x1e0] sm:$0xff] }
 0x1a4   : > { %v763_v16 = vpop.f32.mrf.mxu0  ;;  %v1309_v60 = vshll.u32 %v1196_v10, 16 }
 0x1a5   : > { %v1098_v45 = vpack.c.bf16 %v1066_v8, %v1066_v8  ;;  %v807_v54 = vmul.f32 %v4711_v0, %v763_v16  ;;  %v4882_v49 = vpop.f32.mrf.mxu2  ;;  %v1833_v12 = vpop.f32.mrf.mxu3  ;;  %v1746_v39 = vrot.slane %v1744_v27, 3  ;;  %v1749_v3 = vrot.slane %v1747_v62, 4 }
 0x1a6   : > { %v4885_v31 = vadd.f32 %v1833_v12, %v4782_v6  ;;  %v2687_v11 = vrot.slane %v1747_v62, 1  ;;  %v1308_v16 = vrot.slane %v1306_v58, 3  ;;  %v1311_v29 = vrot.slane %v1309_v60, 4  ;;  %2329 = vmatpush.bf16.msrb.mxu3 %v3915_v56 }
 0x1a7   : > { %v1727_v10 = vunpack.c.l.b16 %v1098_v45  ;;  %v843_v46 = vadd.f32 %v4727_v48, %v807_v54  ;;  %v1395_v8 = vpop.f32.mrf.mxu1  ;;  %v1750_v22 = vor.u32 %v1749_v3, %v1746_v39  ;;  %v3914_v3 = vld [vmem:[%s5465_s7 + $0x1d8] sm:$0xff] }
 0x1a8   : > { %v4892_v59 = vadd.f32 %v4816_v53, %v1395_v8  ;;  %v4896_v6 = vsel %vm2438_vm1, %v4830_v47, %v2687_v11  ;;  %v2689_v12 = vor.u32 %v2687_v11, %v1744_v27 }
 0x1a9   : > { %v875_v13 = vmax.f32 %v843_v46, 0.0  ;;  %v1751_v62 = vsel %vm1197_vm0, %v4819_v20, %v1750_v22  ;;  %v4900_v45 = vpack.c.b16 %v1727_v10, %v1183_v32  ;;  %v2654_v54 = vpack.c.b16 %v1727_v10, %v1727_v10 }
 0x1aa   : > { %1875 = vmatmul.bf16.gmra.mxu3 %v1751_v62  ;;  %2171 = vmatmul.bf16.vlgmr.msrb.gmra.mxu2 %v4458_v17  ;;  %v1312_v32 = vor.u32 %v1311_v29, %v1308_v16  ;;  %v3913_v17 = vld [vmem:[%s5465_s7 + $0x1d0] sm:$0xff]  ;;  %v1031_v62 = vpop.permute.xlu0 %1030 }
 0x1ab   : > { %v1067_v53 = vmul.f32 %v1026_v34, %v875_v13  ;;  %v2691_v39 = vshll.u32 %v2654_v54, 16  ;;  %2330 = vmatpush.bf16.msrb.mxu3 %v3914_v3 }
 0x1ac   : > { %v766_v47 = vpop.f32.mrf.mxu0  ;;  %v1313_v16 = vsel %vm1197_vm0, %v4852_v36, %v1312_v32  ;;  %v4934_v36 = vld [vmem:[%s5465_s7 + $0x230] sm:$0xff] }
 0x1ad   : > { %v1099_v11 = vpack.c.bf16 %v1067_v53, %v1067_v53  ;;  %v808_v27 = vmul.f32 %v4711_v0, %v766_v47  ;;  %v1667_v58 = vpop.f32.mrf.mxu2  ;;  %v1836_v20 = vpop.f32.mrf.mxu3  ;;  %v2693_v60 = vrot.slane %v2691_v39, 1  ;;  %3960 = vmatpush.bf16.msra.mxu2 %v4934_v36 }
 0x1ae   : > { %v4908_v56 = vadd.f32 %v1836_v20, %v4801_v26  ;;  %v3911_v20 = vld [vmem:[%s5465_s7 + $0x1c0] sm:$0xff] }
 0x1af   : > { %v1728_v46 = vunpack.c.l.b16 %v1099_v11  ;;  %v844_v34 = vadd.f32 %v4727_v48, %v808_v27  ;;  %v1398_v8 = vpop.f32.mrf.mxu1  ;;  %2582 = vmatmul.bf16.gmra.mxu0 %v4674_v1  ;;  %2331 = vmatpush.bf16.msrb.mxu3 %v3913_v17  ;;  %v4919_v0 = vsel %vm2438_vm1, %v2689_v12, %v2693_v60  ;;  %v3912_v48 = vld [vmem:[%s5465_s7 + $0x1c8] sm:$0xff] }
 0x1b0   : > { %v4916_v13 = vadd.f32 %v4845_v50, %v1398_v8 }
 0x1b1   : > { %v1732_v29 = vpack.c.b16 %v1728_v46, %v1727_v10  ;;  %v876_v26 = vmax.f32 %v844_v34, 0.0 }
 0x1b2   : > { %1437 = vmatmul.bf16.gmra.mxu1 %v1313_v16 }
 0x1b3   : > { %v1068_v54 = vmul.f32 %v1031_v62, %v876_v26  ;;  %v1753_v3 = vshrl.u32 %v1732_v29, 16  ;;  %v1756_v53 = vshll.u32 %v1732_v29, 16  ;;  %2332 = vmatpush.bf16.msrb.mxu3 %v3912_v48  ;;  %v3933_v26 = vld [vmem:[%s5465_s7 + $0x170] sm:$0xff] }
 0x1b4   : > { %v4926_v50 = vpop.f32.mrf.mxu0  ;;  %3952 = vmatpush.bf16.msra.mxu1 %v3933_v26  ;;  %2756 = vmatpush.bf16.msra.mxu0 %v3933_v26 }
 0x1b5   : > { %v1100_v39 = vpack.c.bf16 %v1068_v54, %v1068_v54  ;;  %v1669_v12 = vpop.f32.mrf.mxu2  ;;  %v1838_v47 = vpop.f32.mrf.mxu3  ;;  %v1755_v10 = vrot.slane %v1753_v3, 3  ;;  %v1758_v11 = vrot.slane %v1756_v53, 4 }
 0x1b6   : > { %v4929_v27 = vadd.f32 %v1838_v47, %v4822_v52 }
 0x1b7   : > { %v1729_v32 = vunpack.c.l.b16 %v1100_v39  ;;  %v1400_v60 = vpop.f32.mrf.mxu1  ;;  %v1759_v17 = vor.u32 %v1758_v11, %v1755_v10  ;;  %2333 = vmatpush.bf16.msrb.mxu3 %v3911_v20 }
 0x1b8   : > { %v1665_v34 = vadd.f32 %v4882_v49, %v1400_v60 }
 0x1b9   : > { %v1733_v8 = vpack.c.b16 %v1729_v32, %v1729_v32  ;;  %v1760_v52 = vsel %vm1197_vm0, %v1750_v22, %v1759_v17  ;;  %v4942_v29 = vpack.c.b16 %v1729_v32, %v1728_v46 }
 0x1ba   : > { %1880 = vmatmul.bf16.gmra.mxu3 %v1760_v52  ;;  %2176 = vmatmul.bf16.gmra.mxu2 %v4486_v4 }
 0x1bb   : > { %v1762_v48 = vshrl.u32 %v1733_v8, 16  ;;  %v1765_v54 = vshll.u32 %v1733_v8, 16 }
 0x1bc   : > { %v771_v16 = vpop.f32.mrf.mxu0 }
 0x1bd   : > { %v1672_v62 = vpop.f32.mrf.mxu2  ;;  %v1841_v49 = vpop.f32.mrf.mxu3  ;;  %v1764_v53 = vrot.slane %v1762_v48, 3  ;;  %v1767_v4 = vrot.slane %v1765_v54, 4 }
 0x1be   : > { %v4949_v3 = vadd.f32 %v1841_v49, %v4860_v23 }
 0x1bf   : > { %v1403_v22 = vpop.f32.mrf.mxu1  ;;  %2587 = vmatmul.bf16.gmra.mxu0 %v4695_v15  ;;  %v1768_v11 = vor.u32 %v1767_v4, %v1764_v53 }
 0x1c0   : > { %v1668_v46 = vadd.f32 %v1667_v58, %v1403_v22  ;;  %v3932_v58 = vld [vmem:[%s5465_s7 + $0x168] sm:$0xff] }
 0x1c1   : > { %v1769_v23 = vsel %vm1197_vm0, %v1759_v17, %v1768_v11  ;;  %2757 = vmatpush.bf16.msra.mxu0 %v3932_v58  ;;  %3953 = vmatpush.bf16.msra.mxu1 %v3932_v58 }
 0x1c2   : > { %2001 = vmatmul.bf16.vlgmr.msrb.gmra.mxu1 %v4402_v7 }
 0x1c4   : > { %v772_v39 = vpop.f32.mrf.mxu0 }
 0x1c5   : > { %v1674_v47 = vpop.f32.mrf.mxu2  ;;  %v1843_v10 = vpop.f32.mrf.mxu3 }
 0x1c6   : > { %v4954_v20 = vadd.f32 %v1843_v10, %v4892_v59 }
 0x1c7   : > { %v1405_v32 = vpop.f32.mrf.mxu1 }
 0x1c8   : > { %v1670_v60 = vadd.f32 %v1669_v12, %v1405_v32  ;;  %v3940_v12 = vld [vmem:[%s5465_s7 + $0x228] sm:$0xff] }
 0x1c9   : > { %3961 = vmatpush.bf16.msra.mxu2 %v3940_v12 }
 0x1ca   : > { %1885 = vmatmul.bf16.gmra.mxu3 %v1769_v23  ;;  %2181 = vmatmul.bf16.gmra.mxu2 %v4523_v61  ;;  %v3931_v61 = vld [vmem:[%s5465_s7 + $0x160] sm:$0xff] }
 0x1cb   : > { %2758 = vmatpush.bf16.msra.mxu0 %v3931_v61  ;;  %3954 = vmatpush.bf16.msra.mxu1 %v3931_v61 }
 0x1cc   : > { %v4961_v8 = vpop.f32.mrf.mxu0 }
 0x1cd   : > { %v1677_v7 = vpop.f32.mrf.mxu2  ;;  %v1846_v52 = vpop.f32.mrf.mxu3 }
 0x1ce   : > { %v4964_v59 = vadd.f32 %v1846_v52, %v4916_v13  ;;  %v3930_v13 = vld [vmem:[%s5465_s7 + $0x158] sm:$0xff]  ;;  %v3939_v52 = vld [vmem:[%s5465_s7 + $0x220] sm:$0xff] }
 0x1cf   : > { %v1408_v17 = vpop.f32.mrf.mxu1  ;;  %2592 = vmatmul.bf16.gmra.mxu0 %v4732_v2  ;;  %3955 = vmatpush.bf16.msra.mxu1 %v3930_v13 }
 0x1d0   : > { %v1673_v26 = vadd.f32 %v1672_v62, %v1408_v17  ;;  %2759 = vmatpush.bf16.msra.mxu0 %v3930_v13  ;;  %v3929_v62 = vld [vmem:[%s5465_s7 + $0x150] sm:$0xff]  ;;  %3962 = vmatpush.bf16.msra.mxu2 %v3939_v52  ;;  %v3938_v13 = vld [vmem:[%s5465_s7 + $0x218] sm:$0xff] }
 0x1d2   : > { %2006 = vmatmul.bf16.gmra.mxu1 %v4432_v55  ;;  %v3928_v55 = vld [vmem:[%s5465_s7 + $0x148] sm:$0xff] }
 0x1d3   : > { %3956 = vmatpush.bf16.msra.mxu1 %v3929_v62 }
 0x1d4   : > { %v4977_v16 = vpop.f32.mrf.mxu0  ;;  %2760 = vmatpush.bf16.msra.mxu0 %v3929_v62  ;;  %3963 = vmatpush.bf16.msra.mxu2 %v3938_v13 }
 0x1d5   : > { %v1679_v49 = vpop.f32.mrf.mxu2  ;;  %v1848_v48 = vpop.f32.mrf.mxu3 }
 0x1d6   : > { %v4979_v54 = vadd.f32 %v1848_v48, %v1665_v34 }
 0x1d7   : > { %v1410_v22 = vpop.f32.mrf.mxu1  ;;  %3957 = vmatpush.bf16.msra.mxu1 %v3928_v55 }
 0x1d8   : > { %v1675_v53 = vadd.f32 %v1674_v47, %v1410_v22  ;;  %2761 = vmatpush.bf16.msra.mxu0 %v3928_v55  ;;  %v3927_v47 = vld [vmem:[%s5465_s7 + $0x140] sm:$0xff]  ;;  %v3936_v55 = vld [vmem:[%s5465_s7 + $0x208] sm:$0xff] }
 0x1da   : > { %2186 = vmatmul.bf16.gmra.mxu2 %v4573_v5  ;;  %2334 = vmatmul.bf16.vlgmr.msrb.gmra.mxu3 %v4504_v35 }
 0x1db   : > { %3958 = vmatpush.bf16.msra.mxu1 %v3927_v47 }
 0x1dc   : > { %v4989_v4 = vpop.f32.mrf.mxu0  ;;  %2762 = vmatpush.bf16.msra.mxu0 %v3927_v47 }
 0x1dd   : > { %v1682_v34 = vpop.f32.mrf.mxu2  ;;  %v1851_v39 = vpop.f32.mrf.mxu3 }
 0x1de   : > { %v4991_v10 = vadd.f32 %v1851_v39, %v1668_v46 }
 0x1df   : > { %v1413_v11 = vpop.f32.mrf.mxu1  ;;  %2597 = vmatmul.bf16.gmra.mxu0 %v4763_v42 }
 0x1e0   : > { %v1678_v5 = vadd.f32 %v1677_v7, %v1413_v11  ;;  %2944 = vmatpush.bf16.msrb.mxu0 %v4857_v51 }
 0x1e2   : > { %2011 = vmatmul.bf16.gmra.mxu1 %v4472_v41 }
 0x1e4   : > { %v4999_v32 = vpop.f32.mrf.mxu0  ;;  %2945 = vmatpush.bf16.msrb.mxu0 %v4934_v36 }
 0x1e5   : > { %v1684_v23 = vpop.f32.mrf.mxu2  ;;  %v1853_v58 = vpop.f32.mrf.mxu3 }
 0x1e6   : > { %v5002_v46 = vadd.f32 %v1853_v58, %v1670_v60 }
 0x1e7   : > { %v1415_v61 = vpop.f32.mrf.mxu1 }
 0x1e8   : > { %v1680_v7 = vadd.f32 %v1679_v49, %v1415_v61  ;;  %2946 = vmatpush.bf16.msrb.mxu0 %v3940_v12 }
 0x1ea   : > { %2191 = vmatmul.bf16.gmra.mxu2 %v4615_v9  ;;  %2339 = vmatmul.bf16.gmra.mxu3 %v4544_v30  ;;  %v3937_v9 = vld [vmem:[%s5465_s7 + $0x210] sm:$0xff] }
 0x1eb   : > { %3964 = vmatpush.bf16.msra.mxu2 %v3937_v9 }
 0x1ec   : > { %v5009_v41 = vpop.f32.mrf.mxu0  ;;  %2947 = vmatpush.bf16.msrb.mxu0 %v3939_v52 }
 0x1ed   : > { %v1687_v51 = vpop.f32.mrf.mxu2  ;;  %v1856_v17 = vpop.f32.mrf.mxu3 }
 0x1ee   : > { %v5011_v36 = vadd.f32 %v1856_v17, %v1673_v26 }
 0x1ef   : > { %v1418_v60 = vpop.f32.mrf.mxu1  ;;  %2602 = vmatmul.bf16.gmra.mxu0 %v4804_v25  ;;  %3965 = vmatpush.bf16.msra.mxu2 %v3936_v55 }
 0x1f0   : > { %v1683_v49 = vadd.f32 %v1682_v34, %v1418_v60  ;;  %2948 = vmatpush.bf16.msrb.mxu0 %v3938_v13 }
 0x1f2   : > { %2016 = vmatmul.bf16.gmra.mxu1 %v4504_v35  ;;  %v3935_v35 = vld [vmem:[%s5465_s7 + $0x200] sm:$0xff] }
 0x1f3   : > { %3966 = vmatpush.bf16.msra.mxu2 %v3935_v35 }
 0x1f4   : > { %v5021_v12 = vpop.f32.mrf.mxu0  ;;  %2949 = vmatpush.bf16.msrb.mxu0 %v3937_v9 }
 0x1f5   : > { %v1689_v26 = vpop.f32.mrf.mxu2  ;;  %v1858_v48 = vpop.f32.mrf.mxu3 }
 0x1f6   : > { %v5023_v62 = vadd.f32 %v1858_v48, %v1675_v53 }
 0x1f7   : > { %v1420_v22 = vpop.f32.mrf.mxu1 }
 0x1f8   : > { %v1685_v34 = vadd.f32 %v1684_v23, %v1420_v22  ;;  %2950 = vmatpush.bf16.msrb.mxu0 %v3936_v55 }
 0x1fa   : > { %2196 = vmatmul.bf16.gmra.mxu2 %v4646_v14  ;;  %2344 = vmatmul.bf16.gmra.mxu3 %v4595_v38 }
 0x1fc   : > { %v5033_v39 = vpop.f32.mrf.mxu0  ;;  %2951 = vmatpush.bf16.msrb.mxu0 %v3935_v35 }
 0x1fd   : > { %v1692_v53 = vpop.f32.mrf.mxu2  ;;  %v1861_v47 = vpop.f32.mrf.mxu3 }
 0x1fe   : > { %v5035_v11 = vadd.f32 %v1861_v47, %v1678_v5 }
 0x1ff   : > { %v1423_v58 = vpop.f32.mrf.mxu1  ;;  %2607 = vmatmul.bf16.gmra.mxu0 %v4825_v24 }
 0x200   : > { %v1688_v23 = vadd.f32 %v1687_v51, %v1423_v58 }
 0x202   : > { %2021 = vmatmul.bf16.gmra.mxu1 %v4544_v30 }
 0x204   : > { %v5039_v14 = vpop.f32.mrf.mxu0 }
 0x205   : > { %v1694_v52 = vpop.f32.mrf.mxu2  ;;  %v1863_v61 = vpop.f32.mrf.mxu3 }
 0x206   : > { %v5041_v17 = vadd.f32 %v1863_v61, %v1680_v7 }
 0x207   : > { %v1425_v60 = vpop.f32.mrf.mxu1 }
 0x208   : > { %v1690_v13 = vadd.f32 %v1689_v26, %v1425_v60 }
 0x20a   : > { %2201 = vmatmul.bf16.gmra.mxu2 %v4676_v57  ;;  %2349 = vmatmul.bf16.gmra.mxu3 %v4635_v28 }
 0x20c   : > { %v5045_v5 = vpop.f32.mrf.mxu0 }
 0x20d   : > { %v1697_v9 = vpop.f32.mrf.mxu2  ;;  %v1866_v48 = vpop.f32.mrf.mxu3 }
 0x20e   : > { %v5047_v24 = vadd.f32 %v1866_v48, %v1683_v49 }
 0x20f   : > { %v1428_v51 = vpop.f32.mrf.mxu1  ;;  %2763 = vmatmul.bf16.vlgmr.msra.gmra.mxu0 %v4502_v33 }
 0x210   : > { %v1693_v30 = vadd.f32 %v1692_v53, %v1428_v51 }
 0x212   : > { %2026 = vmatmul.bf16.gmra.mxu1 %v4595_v38 }
 0x214   : > { %v5051_v7 = vpop.f32.mrf.mxu0 }
 0x215   : > { %v1699_v22 = vpop.f32.mrf.mxu2  ;;  %v1868_v26 = vpop.f32.mrf.mxu3 }
 0x216   : > { %v5053_v55 = vadd.f32 %v1868_v26, %v1685_v34 }
 0x217   : > { %v1430_v57 = vpop.f32.mrf.mxu1 }
 0x218   : > { %v1695_v35 = vadd.f32 %v1694_v52, %v1430_v57 }
 0x21a   : > { %2206 = vmatmul.bf16.gmra.mxu2 %v4697_v18  ;;  %2354 = vmatmul.bf16.gmra.mxu3 %v4657_v44 }
 0x21c   : > { %v5057_v49 = vpop.f32.mrf.mxu0 }
 0x21d   : > { %v1702_v47 = vpop.f32.mrf.mxu2  ;;  %v1871_v58 = vpop.f32.mrf.mxu3 }
 0x21e   : > { %v5059_v33 = vadd.f32 %v1871_v58, %v1688_v23 }
 0x21f   : > { %v1433_v53 = vpop.f32.mrf.mxu1  ;;  %2952 = vmatmul.bf16.vlgmr.msrb.gmra.mxu0 %v4571_v63 }
 0x220   : > { %v1698_v38 = vadd.f32 %v1697_v9, %v1433_v53 }
 0x222   : > { %2031 = vmatmul.bf16.gmra.mxu1 %v4635_v28 }
 0x224   : > { %v5063_v34 = vpop.f32.mrf.mxu0 }
 0x225   : > { %v1704_v61 = vpop.f32.mrf.mxu2  ;;  %v1873_v52 = vpop.f32.mrf.mxu3 }
 0x226   : > { %v5065_v60 = vadd.f32 %v1873_v52, %v1690_v13  ;;  %v3950_v13 = vld [vmem:[%s5468_s10 + $0x38] sm:$0xff] }
 0x227   : > { %v1435_v18 = vpop.f32.mrf.mxu1  ;;  %3967 = vmatpush.bf16.msra.mxu3 %v3950_v13  ;;  %3193 = vmatpush.bf16.msra.mxu0 %v3950_v13 }
 0x228   : > { %v1700_v48 = vadd.f32 %v1699_v22, %v1435_v18 }
 0x22a   : > { %2211 = vmatmul.bf16.gmra.mxu2 %v4734_v21  ;;  %2359 = vmatmul.bf16.gmra.mxu3 %v4686_v40 }
 0x22c   : > { %v5069_v23 = vpop.f32.mrf.mxu0 }
 0x22d   : > { %v1876_v51 = vpop.f32.mrf.mxu3  ;;  %v2172_v26 = vpop.f32.mrf.mxu2 }
 0x22e   : > { %v5071_v63 = vadd.f32 %v1876_v51, %v1693_v30 }
 0x22f   : > { %v1438_v9 = vpop.f32.mrf.mxu1 }
 0x230   : > { %v1703_v28 = vadd.f32 %v1702_v47, %v1438_v9 }
 0x232   : > { %2036 = vmatmul.bf16.gmra.mxu1 %v4657_v44 }
 0x234   : > { %v5074_v57 = vpop.f32.mrf.mxu0 }
 0x235   : > { %5497 = vst [vmem:[#allocation20_spill] sm:$0xff] %v5074_v57  ;;  %v1878_v22 = vpop.f32.mrf.mxu3  ;;  %v2174_v21 = vpop.f32.mrf.mxu2  ;;  %v5500_v57 = vld [vmem:[#allocation14_spill] sm:$0xff] }
 0x236   : > { %v5079_v58 = vadd.f32 %v1878_v22, %v1695_v35 }
 0x237   : > { %v1440_v53 = vpop.f32.mrf.mxu1 }
 0x238   : > { %v1705_v52 = vadd.f32 %v1704_v61, %v1440_v53 }
 0x23a   : > { %2216 = vmatmul.bf16.gmra.mxu2 %v4765_v19  ;;  %2364 = vmatmul.bf16.gmra.mxu3 %v4718_v43 }
 0x23c   : > { %v5083_v30 = vpop.f32.mrf.mxu0 }
 0x23d   : > { %5498 = vst [vmem:[#allocation21_spill] sm:$0xff] %v5083_v30  ;;  %v1881_v44 = vpop.f32.mrf.mxu3  ;;  %v2177_v47 = vpop.f32.mrf.mxu2 }
 0x23e   : > { %v5085_v18 = vadd.f32 %v1881_v44, %v1698_v38  ;;  %v5501_v38 = vld [vmem:[#allocation11_spill] sm:$0xff] }
 0x23f   : > { %v2002_v51 = vpop.f32.mrf.mxu1 }
 0x240   : > { %v2062_v9 = vadd.f32 %v2002_v51, %v4848_v37 }
 0x242   : > { %2041 = vmatmul.bf16.gmra.mxu1 %v4686_v40  ;;  %v5089_v35 = vadd.f32 %v2172_v26, %v2062_v9  ;;  %v3949_v40 = vld [vmem:[%s5468_s10 + $0x30] sm:$0xff] }
 0x243   : > { %3968 = vmatpush.bf16.msra.mxu3 %v3949_v40  ;;  %3194 = vmatpush.bf16.msra.mxu0 %v3949_v40 }
 0x244   : > { %v5091_v13 = vpop.f32.mrf.mxu0 }
 0x245   : > { %5499 = vst [vmem:[#allocation22_spill] sm:$0xff] %v5091_v13  ;;  %v1883_v61 = vpop.f32.mrf.mxu3  ;;  %v2179_v22 = vpop.f32.mrf.mxu2 }
 0x246   : > { %v5093_v19 = vadd.f32 %v1883_v61, %v1700_v48 }
 0x247   : > { %v2004_v53 = vpop.f32.mrf.mxu1 }
 0x248   : > { %v2063_v30 = vadd.f32 %v2004_v53, %v4885_v31 }
 0x24a   : > { %2221 = vmatmul.bf16.gmra.mxu2 %v5500_v57  ;;  %2369 = vmatmul.bf16.gmra.mxu3 %v5501_v38  ;;  %v5098_v44 = vadd.f32 %v2174_v21, %v2063_v30 }
 0x24c   : > { %v5100_v37 = vpop.f32.mrf.mxu0 }
 0x24d   : > { %5502 = vst [vmem:[#allocation14_spill] sm:$0xff] %v5100_v37  ;;  %v1886_v26 = vpop.f32.mrf.mxu3  ;;  %v2182_v51 = vpop.f32.mrf.mxu2 }
 0x24e   : > { %v5105_v9 = vadd.f32 %v1886_v26, %v1703_v28  ;;  %v5504_v28 = vld [vmem:[#allocation19_spill] sm:$0xff]  ;;  %v5505_v26 = vld [vmem:[#allocation13_spill] sm:$0xff] }
 0x24f   : > { %v2007_v48 = vpop.f32.mrf.mxu1 }
 0x250   : > { %v2064_v31 = vadd.f32 %v2007_v48, %v4908_v56 }
 0x252   : > { %2046 = vmatmul.bf16.gmra.mxu1 %v4718_v43  ;;  %v5109_v57 = vadd.f32 %v2177_v47, %v2064_v31 }
 0x254   : > { %v5111_v21 = vpop.f32.mrf.mxu0 }
 0x255   : > { %5503 = vst [vmem:[#allocation11_spill] sm:$0xff] %v5111_v21  ;;  %v1888_v30 = vpop.f32.mrf.mxu3  ;;  %v2184_v61 = vpop.f32.mrf.mxu2 }
 0x256   : > { %v5113_v53 = vadd.f32 %v1888_v30, %v1705_v52  ;;  %v5508_v30 = vld [vmem:[#allocation16_spill] sm:$0xff] }
 0x257   : > { %v2009_v37 = vpop.f32.mrf.mxu1 }
 0x258   : > { %v2065_v13 = vadd.f32 %v2009_v37, %v4929_v27  ;;  %v3948_v27 = vld [vmem:[%s5468_s10 + $0x28] sm:$0xff] }
 0x259   : > { %3969 = vmatpush.bf16.msra.mxu3 %v3948_v27  ;;  %3195 = vmatpush.bf16.msra.mxu0 %v3948_v27 }
 0x25a   : > { %2226 = vmatmul.bf16.gmra.mxu2 %v5504_v28  ;;  %2374 = vmatmul.bf16.gmra.mxu3 %v5505_v26  ;;  %v5118_v40 = vadd.f32 %v2179_v22, %v2065_v13  ;;  %v5509_v28 = vld [vmem:[#allocation4_spill] sm:$0xff] }
 0x25c   : > { %v5120_v56 = vpop.f32.mrf.mxu0 }
 0x25d   : > { %5506 = vst [vmem:[#allocation19_spill] sm:$0xff] %v5120_v56  ;;  %v2187_v43 = vpop.f32.mrf.mxu2 }
 0x25f   : > { %v2012_v47 = vpop.f32.mrf.mxu1 }
 0x260   : > { %v2066_v48 = vadd.f32 %v2012_v47, %v4949_v3 }
 0x262   : > { %2051 = vmatmul.bf16.gmra.mxu1 %v5501_v38  ;;  %v5124_v31 = vadd.f32 %v2182_v51, %v2066_v48 }
 0x264   : > { %v5126_v52 = vpop.f32.mrf.mxu0 }
 0x265   : > { %5507 = vst [vmem:[#allocation13_spill] sm:$0xff] %v5126_v52  ;;  %v2189_v37 = vpop.f32.mrf.mxu2 }
 0x267   : > { %v2014_v13 = vpop.f32.mrf.mxu1 }
 0x268   : > { %v2067_v22 = vadd.f32 %v2014_v13, %v4954_v20 }
 0x26a   : > { %2379 = vmatmul.bf16.gmra.mxu3 %v5508_v30  ;;  %2957 = vmatmul.bf16.vlgmr.msra.gmra.mxu2 %v5509_v28  ;;  %v5134_v3 = vadd.f32 %v2184_v61, %v2067_v22  ;;  %v5512_v61 = vld [vmem:[#allocation6_spill] sm:$0xff] }
 0x26c   : > { %v5136_v38 = vpop.f32.mrf.mxu0 }
 0x26d   : > { %5510 = vst [vmem:[#allocation16_spill] sm:$0xff] %v5136_v38  ;;  %v2192_v51 = vpop.f32.mrf.mxu2 }
 0x26f   : > { %v2017_v47 = vpop.f32.mrf.mxu1 }
 0x270   : > { %v2068_v48 = vadd.f32 %v2017_v47, %v4964_v59  ;;  %v3947_v59 = vld [vmem:[%s5468_s10 + $0x20] sm:$0xff] }
 0x271   : > { %3196 = vmatpush.bf16.msra.mxu0 %v3947_v59  ;;  %3970 = vmatpush.bf16.msra.mxu3 %v3947_v59 }
 0x272   : > { %2056 = vmatmul.bf16.gmra.mxu1 %v5505_v26  ;;  %v5140_v52 = vadd.f32 %v2187_v43, %v2068_v48  ;;  %v3945_v48 = vld [vmem:[%s5468_s10 + $0x10] sm:$0xff] }
 0x274   : > { %v5142_v27 = vpop.f32.mrf.mxu0 }
 0x275   : > { %5511 = vst [vmem:[#allocation4_spill] sm:$0xff] %v5142_v27  ;;  %v2194_v56 = vpop.f32.mrf.mxu2 }
 0x277   : > { %v2019_v20 = vpop.f32.mrf.mxu1 }
 0x278   : > { %v2069_v13 = vadd.f32 %v2019_v20, %v4979_v54  ;;  %v3946_v54 = vld [vmem:[%s5468_s10 + $0x18] sm:$0xff] }
 0x279   : > { %3197 = vmatpush.bf16.msra.mxu0 %v3946_v54  ;;  %3971 = vmatpush.bf16.msra.mxu3 %v3946_v54 }
 0x27a   : > { %2384 = vmatmul.bf16.gmra.mxu3 %v4900_v45  ;;  %2962 = vmatmul.bf16.gmra.mxu2 %v5512_v61  ;;  %v5147_v22 = vadd.f32 %v2189_v37, %v2069_v13  ;;  %v5514_v37 = vld [vmem:[#allocation2_spill] sm:$0xff] }
 0x27c   : > { %v5152_v30 = vpop.f32.mrf.mxu0 }
 0x27d   : > { %5513 = vst [vmem:[#allocation6_spill] sm:$0xff] %v5152_v30  ;;  %v2197_v26 = vpop.f32.mrf.mxu2  ;;  %3198 = vmatpush.bf16.msra.mxu0 %v3945_v48  ;;  %3972 = vmatpush.bf16.msra.mxu3 %v3945_v48  ;;  %v2335_v48 = vpop.f32.mrf.mxu3 }
 0x27f   : > { %v2022_v43 = vpop.f32.mrf.mxu1 }
 0x280   : > { %v2070_v28 = vadd.f32 %v2022_v43, %v4991_v10  ;;  %v3944_v10 = vld [vmem:[%s5468_s10 + $0x8] sm:$0xff]  ;;  %v3943_v43 = vld [vmem:[%s5468_s10] sm:$0xff] }
 0x281   : > { %3199 = vmatpush.bf16.msra.mxu0 %v3944_v10  ;;  %3973 = vmatpush.bf16.msra.mxu3 %v3944_v10 }
 0x282   : > { %2768 = vmatmul.bf16.vlgmr.msra.gmra.mxu1 %v5514_v37  ;;  %v5159_v47 = vadd.f32 %v2192_v51, %v2070_v28 }
 0x284   : > { %v5164_v20 = vpop.f32.mrf.mxu0 }
 0x285   : > { %5515 = vst [vmem:[#allocation2_spill] sm:$0xff] %v5164_v20  ;;  %v2199_v13 = vpop.f32.mrf.mxu2  ;;  %3200 = vmatpush.bf16.msra.mxu0 %v3943_v43  ;;  %3974 = vmatpush.bf16.msra.mxu3 %v3943_v43  ;;  %v2337_v27 = vpop.f32.mrf.mxu3 }
 0x287   : > { %v2024_v61 = vpop.f32.mrf.mxu1 }
 0x288   : > { %v2071_v59 = vadd.f32 %v2024_v61, %v5002_v46  ;;  %v5516_v61 = vld [vmem:[#allocation3_spill] sm:$0xff] }
 0x28a   : > { %2389 = vmatmul.bf16.gmra.mxu3 %v4942_v29  ;;  %2967 = vmatmul.bf16.gmra.mxu2 %v4674_v1  ;;  %v5172_v51 = vadd.f32 %v2194_v56, %v2071_v59  ;;  %v2395_v56 = vadd.f32 %v2335_v48, %v5089_v35  ;;  %v5191_v35 = vld [vmem:[%s5466_s8] ss:$0 sm:$0xff] }
 0x28c   : > { %v2764_v54 = vpop.f32.mrf.mxu0  ;;  %v2613_v43 = vadd.f32 %v4961_v8, %v2395_v56 }
 0x28d   : > { %v2202_v28 = vpop.f32.mrf.mxu2 }
 0x28f   : > { %v2027_v37 = vpop.f32.mrf.mxu1 }
 0x290   : > { %v2072_v46 = vadd.f32 %v2027_v37, %v5011_v36  ;;  %v2396_v36 = vadd.f32 %v2337_v27, %v5098_v44  ;;  %v2824_v37 = vadd.f32 %v2764_v54, %v2613_v43 }
 0x292   : > { %2773 = vmatmul.bf16.gmra.mxu1 %v5516_v61  ;;  %v5179_v10 = vadd.f32 %v2197_v26, %v2072_v46 }
 0x294   : > { %v2766_v20 = vpop.f32.mrf.mxu0 }
 0x295   : > { %v2204_v1 = vpop.f32.mrf.mxu2 }
 0x297   : > { %v2029_v59 = vpop.f32.mrf.mxu1 }
 0x298   : > { %v2073_v30 = vadd.f32 %v2029_v59, %v5023_v62 }
 0x29a   : > { %2972 = vmatmul.bf16.gmra.mxu2 %v4695_v15  ;;  %v5184_v38 = vadd.f32 %v2199_v13, %v2073_v30  ;;  %v2614_v15 = vadd.f32 %v4977_v16, %v2396_v36  ;;  %v5517_v30 = vld [vmem:[#allocation5_spill] sm:$0xff] }
 0x29c   : > { %v2953_v21 = vpop.f32.mrf.mxu0  ;;  %v2825_v8 = vadd.f32 %v2766_v20, %v2614_v15  ;;  %v5518_v15 = vld [vmem:[#allocation7_spill] sm:$0xff] }
 0x29d   : > { %v2207_v26 = vpop.f32.mrf.mxu2  ;;  %v3013_v46 = vadd.f32 %v2953_v21, %v2824_v37  ;;  %v5202_v21 = vld [vmem:[%s5467_s9] ss:$0 sm:$0xff] }
 0x29f   : > { %v2032_v48 = vpop.f32.mrf.mxu1  ;;  %v3041_v44 = vmul.f32 %v5191_v35, %v3013_v46 }
 0x2a0   : > { %v2074_v62 = vadd.f32 %v2032_v48, %v5035_v11 }
 0x2a1   : > { %v3069_v56 = vadd.f32 %v5202_v21, %v3041_v44 }
 0x2a2   : > { %2778 = vmatmul.bf16.gmra.mxu1 %v5517_v30  ;;  %v5196_v13 = vadd.f32 %v2202_v28, %v2074_v62 }
 0x2a3   : > { %v3093_v43 = vmax.f32 %v3069_v56, 0.0 }
 0x2a4   : > { %v2955_v27 = vpop.f32.mrf.mxu0 }
 0x2a5   : > { %v3014_v54 = vadd.f32 %v2955_v27, %v2825_v8  ;;  %v2209_v61 = vpop.f32.mrf.mxu2 }
 0x2a7   : > { %v3042_v11 = vmul.f32 %v5191_v35, %v3014_v54  ;;  %v2034_v16 = vpop.f32.mrf.mxu1 }
 0x2a8   : > { %v2075_v59 = vadd.f32 %v2034_v16, %v5041_v17 }
 0x2a9   : > { %v3070_v28 = vadd.f32 %v5202_v21, %v3042_v11  ;;  %v5519_v11 = vld [vmem:[#allocation8_spill] sm:$0xff] }
 0x2aa   : > { %2977 = vmatmul.bf16.gmra.mxu2 %v4732_v2  ;;  %v5209_v20 = vadd.f32 %v2204_v1, %v2075_v59  ;;  %v5219_v1 = vpop.f32.mrf.mxu3 }
 0x2ab   : > { %v3094_v36 = vmax.f32 %v3070_v28, 0.0 }
 0x2ad   : > { %v3117_v37 = vpack.c.bf16 %v3094_v36, %v3093_v43  ;;  %v2212_v46 = vpop.f32.mrf.mxu2 }
 0x2af   : > { %v2037_v48 = vpop.f32.mrf.mxu1  ;;  %3201 = vmatmul.bf16.vlgmr.msra.gmra.mxu0 %v3117_v37 }
 0x2b0   : > { %v2076_v62 = vadd.f32 %v2037_v48, %v5047_v24 }
 0x2b2   : > { %2783 = vmatmul.bf16.gmra.mxu1 %v5518_v15  ;;  %v5213_v30 = vadd.f32 %v2207_v26, %v2076_v62  ;;  %v5225_v16 = vpop.f32.mrf.mxu3  ;;  %v5521_v15 = vld [vmem:[#allocation17_spill] sm:$0xff] }
 0x2b5   : > { %v2214_v8 = vpop.f32.mrf.mxu2 }
 0x2b7   : > { %v2039_v17 = vpop.f32.mrf.mxu1 }
 0x2b8   : > { %v2077_v44 = vadd.f32 %v2039_v17, %v5053_v55 }
 0x2ba   : > { %2982 = vmatmul.bf16.gmra.mxu2 %v4763_v42  ;;  %v5217_v2 = vadd.f32 %v2209_v61, %v2077_v44  ;;  %v5232_v36 = vpop.f32.mrf.mxu3  ;;  %v2872_v44 = vshll.u32 %v4900_v45, 16 }
 0x2bd   : > { %v2217_v27 = vpop.f32.mrf.mxu2 }
 0x2bf   : > { %v2042_v54 = vpop.f32.mrf.mxu1 }
 0x2c0   : > { %v2078_v56 = vadd.f32 %v2042_v54, %v5059_v33  ;;  %v5520_v33 = vld [vmem:[#allocation9_spill] sm:$0xff]  ;;  %v5522_v54 = vld [vmem:[#allocation10_spill] sm:$0xff] }
 0x2c2   : > { %2788 = vmatmul.bf16.gmra.mxu1 %v5519_v11  ;;  %v5223_v24 = vadd.f32 %v2212_v46, %v2078_v56 }
 0x2c5   : > { %v2219_v26 = vpop.f32.mrf.mxu2 }
 0x2c7   : > { %v2044_v59 = vpop.f32.mrf.mxu1 }
 0x2c8   : > { %v2079_v55 = vadd.f32 %v2044_v59, %v5065_v60  ;;  %v2874_v59 = vrot.slane %v2872_v44, 1 }
 0x2ca   : > { %2987 = vmatmul.bf16.gmra.mxu2 %v4804_v25  ;;  %v5229_v42 = vadd.f32 %v2214_v8, %v2079_v55  ;;  %v5241_v25 = vpop.f32.mrf.mxu3 }
 0x2cd   : > { %v2222_v61 = vpop.f32.mrf.mxu2 }
 0x2cf   : > { %v2047_v28 = vpop.f32.mrf.mxu1 }
 0x2d0   : > { %v2080_v43 = vadd.f32 %v2047_v28, %v5071_v63 }
 0x2d2   : > { %2793 = vmatmul.bf16.gmra.mxu1 %v5520_v33  ;;  %v5235_v37 = vadd.f32 %v2217_v27, %v2080_v43  ;;  %v5252_v11 = vpop.f32.mrf.mxu3 }
 0x2d5   : > { %v2224_v46 = vpop.f32.mrf.mxu2 }
 0x2d7   : > { %v2049_v48 = vpop.f32.mrf.mxu1 }
 0x2d8   : > { %v2081_v62 = vadd.f32 %v2049_v48, %v5079_v58  ;;  %v4031_v58 = vld [vmem:[%s5463_s5] ss:$0 sm:$0xff] }
 0x2d9   : > { %v809_v56 = vmul.f32 %v4031_v58, %v4926_v50  ;;  %v5526_v58 = vld [vmem:[#allocation12_spill] sm:$0xff] }
 0x2da   : > { %2992 = vmatmul.bf16.gmra.mxu2 %v5521_v15  ;;  %v5239_v60 = vadd.f32 %v2219_v26, %v2081_v62  ;;  %v5262_v15 = vpop.f32.mrf.mxu3 }
 0x2dd   : > { %v2227_v8 = vpop.f32.mrf.mxu2 }
 0x2df   : > { %v2052_v17 = vpop.f32.mrf.mxu1 }
 0x2e0   : > { %v2082_v63 = vadd.f32 %v2052_v17, %v5085_v18  ;;  %v4032_v18 = vld [vmem:[%s5464_s6] ss:$0 sm:$0xff] }
 0x2e1   : > { %v845_v43 = vadd.f32 %v4032_v18, %v809_v56 }
 0x2e2   : > { %2798 = vmatmul.bf16.gmra.mxu1 %v5522_v54  ;;  %v5246_v27 = vadd.f32 %v2222_v61, %v2082_v63  ;;  %v5524_v61 = vld [vmem:[#allocation18_spill] sm:$0xff]  ;;  %v1036_v63 = vpop.permute.xlu1 %1035  ;;  %v2880_v54 = vshll.u32 %v4942_v29, 16 }
 0x2e3   : > { %v2875_v33 = vsel %vm2438_vm1, %v5524_v61, %v2874_v59  ;;  %v877_v62 = vmax.f32 %v845_v43, 0.0 }
 0x2e4   : > { %5523 = vst [vmem:[#allocation3_spill] sm:$0xff] %v5246_v27  ;;  %v5271_v27 = vpop.f32.mrf.mxu3 }
 0x2e5   : > { %v2229_v26 = vpop.f32.mrf.mxu2 }
 0x2e7   : > { %v2054_v55 = vpop.f32.mrf.mxu1 }
 0x2e8   : > { %v2083_v28 = vadd.f32 %v2054_v55, %v5093_v19  ;;  %v1069_v19 = vmul.f32 %v1036_v63, %v877_v62  ;;  %v2397_v62 = vadd.f32 %v5219_v1, %v5109_v57  ;;  %v2884_v57 = vshrl.u32 %v4942_v29, 16 }
 0x2ea   : > { %2997 = vmatmul.bf16.gmra.mxu2 %v2875_v33  ;;  %v5260_v48 = vadd.f32 %v2224_v46, %v2083_v28  ;;  %v2419_v55 = vpack.c.bf16 %v1069_v19, %v1069_v19  ;;  %v2876_v46 = vshrl.u32 %v4900_v45, 16  ;;  %v2882_v28 = vrot.slane %v2880_v54, 1  ;;  %v5527_v54 = vld [vmem:[#allocation15_spill] sm:$0xff] }
 0x2eb   : > { %v2615_v45 = vadd.f32 %v4989_v4, %v2397_v62 }
 0x2ec   : > { %5525 = vst [vmem:[#allocation5_spill] sm:$0xff] %v5260_v48  ;;  %v2878_v61 = vor.u32 %v2876_v46, %v2874_v59  ;;  %v2866_v48 = vunpack.c.l.b16 %v2419_v55 }
 0x2ed   : > { %v2958_v50 = vpop.f32.mrf.mxu2 }
 0x2ee   : > { %v2867_v63 = vpack.c.b16 %v2866_v48, %v2866_v48 }
 0x2ef   : > { %v2057_v17 = vpop.f32.mrf.mxu1 }
 0x2f0   : > { %v2084_v44 = vadd.f32 %v2057_v17, %v5105_v9  ;;  %v2883_v9 = vsel %vm2438_vm1, %v2878_v61, %v2882_v28  ;;  %v2888_v59 = vshll.u32 %v2867_v63, 16 }
 0x2f2   : > { %2803 = vmatmul.bf16.gmra.mxu1 %v5526_v58  ;;  %v5267_v56 = vadd.f32 %v2227_v8, %v2084_v44  ;;  %v5282_v58 = vpop.f32.mrf.mxu3  ;;  %v2890_v1 = vrot.slane %v2888_v59, 1 }
 0x2f5   : > { %v2960_v18 = vpop.f32.mrf.mxu2 }
 0x2f7   : > { %v2059_v43 = vpop.f32.mrf.mxu1 }
 0x2f8   : > { %v2085_v33 = vadd.f32 %v2059_v43, %v5113_v53  ;;  %v2398_v53 = vadd.f32 %v5225_v16, %v5118_v40  ;;  %v2886_v43 = vor.u32 %v2884_v57, %v2882_v28  ;;  %v2399_v40 = vadd.f32 %v5232_v36, %v5124_v31 }
 0x2f9   : > { %v2400_v31 = vadd.f32 %v5241_v25, %v5134_v3 }
 0x2fa   : > { %3002 = vmatmul.bf16.gmra.mxu2 %v2883_v9  ;;  %v5276_v8 = vadd.f32 %v2229_v26, %v2085_v33  ;;  %v2616_v26 = vadd.f32 %v4999_v32, %v2398_v53  ;;  %v2891_v33 = vsel %vm2438_vm1, %v2886_v43, %v2890_v1  ;;  %v5292_v29 = vpop.f32.mrf.mxu3  ;;  %v2617_v28 = vadd.f32 %v5009_v41, %v2399_v40 }
 0x2fb   : > { %v2618_v53 = vadd.f32 %v5021_v12, %v2400_v31  ;;  %v2401_v1 = vadd.f32 %v5252_v11, %v5140_v52  ;;  %v2402_v52 = vadd.f32 %v5262_v15, %v5147_v22 }
 0x2fd   : > { %v2963_v17 = vpop.f32.mrf.mxu2  ;;  %v2619_v12 = vadd.f32 %v5033_v39, %v2401_v1  ;;  %v2620_v40 = vadd.f32 %v5039_v14, %v2402_v52 }
 0x2ff   : > { %v2769_v44 = vpop.f32.mrf.mxu1 }
 0x300   : > { %v2826_v19 = vadd.f32 %v2769_v44, %v2615_v45 }
 0x302   : > { %2808 = vmatmul.bf16.gmra.mxu1 %v5527_v54  ;;  %v3015_v55 = vadd.f32 %v2958_v50, %v2826_v19  ;;  %v5300_v54 = vpop.f32.mrf.mxu3 }
 0x304   : > { %v3043_v4 = vmul.f32 %v5191_v35, %v3015_v55 }
 0x305   : > { %v2965_v46 = vpop.f32.mrf.mxu2 }
 0x306   : > { %v3071_v50 = vadd.f32 %v5202_v21, %v3043_v4 }
 0x307   : > { %v2771_v48 = vpop.f32.mrf.mxu1 }
 0x308   : > { %v2827_v61 = vadd.f32 %v2771_v48, %v2616_v26  ;;  %v3095_v45 = vmax.f32 %v3071_v50, 0.0 }
 0x30a   : > { %v3016_v16 = vadd.f32 %v2960_v18, %v2827_v61  ;;  %3007 = vmatmul.bf16.gmra.mxu2 %v2891_v33  ;;  %v5310_v33 = vpop.f32.mrf.mxu3 }
 0x30c   : > { %v3044_v9 = vmul.f32 %v5191_v35, %v3016_v16 }
 0x30d   : > { %v2968_v62 = vpop.f32.mrf.mxu2 }
 0x30e   : > { %v3072_v32 = vadd.f32 %v5202_v21, %v3044_v9 }
 0x30f   : > { %v2774_v63 = vpop.f32.mrf.mxu1 }
 0x310   : > { %v3096_v44 = vmax.f32 %v3072_v32, 0.0  ;;  %v2828_v19 = vadd.f32 %v2774_v63, %v2617_v28  ;;  %v2403_v32 = vadd.f32 %v5271_v27, %v5159_v47  ;;  %v4033_v28 = vld [vmem:[%s4218_s29 + $0x30] sm:$0xff] }
 0x312   : > { %v3118_v36 = vpack.c.bf16 %v3096_v44, %v3095_v45  ;;  %2813 = vmatmul.bf16.gmra.mxu1 %v4896_v6  ;;  %v3017_v18 = vadd.f32 %v2963_v17, %v2828_v19  ;;  %v2367_v15 = vpop.f32.mrf.mxu3  ;;  %v2621_v44 = vadd.f32 %v5045_v5, %v2403_v32 }
 0x314   : > { %3206 = vmatmul.bf16.vlgmr.msra.gmra.mxu3 %v3118_v36  ;;  %v3045_v41 = vmul.f32 %v5191_v35, %v3017_v18  ;;  %v2404_v18 = vadd.f32 %v5282_v58, %v5172_v51 }
 0x315   : > { %v2970_v59 = vpop.f32.mrf.mxu2 }
 0x316   : > { %v3073_v6 = vadd.f32 %v5202_v21, %v3045_v41  ;;  %v2622_v5 = vadd.f32 %v5051_v7, %v2404_v18 }
 0x317   : > { %v2776_v55 = vpop.f32.mrf.mxu1 }
 0x318   : > { %v2829_v57 = vadd.f32 %v2776_v55, %v2618_v53  ;;  %v3097_v4 = vmax.f32 %v3073_v6, 0.0 }
 0x31a   : > { %v3018_v26 = vadd.f32 %v2965_v46, %v2829_v57  ;;  %v2370_v41 = vpop.f32.mrf.mxu3  ;;  %v4034_v57 = vld [vmem:[%s4218_s29 + $0x38] sm:$0xff] }
 0x31c   : > { %v3046_v3 = vmul.f32 %v5191_v35, %v3018_v26 }
 0x31d   : > { %v2973_v25 = vpop.f32.mrf.mxu2 }
 0x31e   : > { %v3074_v17 = vadd.f32 %v5202_v21, %v3046_v3 }
 0x31f   : > { %v2779_v48 = vpop.f32.mrf.mxu1 }
 0x320   : > { %v2830_v43 = vadd.f32 %v2779_v48, %v2619_v12  ;;  %v3098_v61 = vmax.f32 %v3074_v17, 0.0  ;;  %v2405_v17 = vadd.f32 %v5292_v29, %v5179_v10 }
 0x322   : > { %2818 = vmatmul.bf16.gmra.mxu1 %v4919_v0  ;;  %v3119_v11 = vpack.c.bf16 %v3098_v61, %v3097_v4  ;;  %v3019_v46 = vadd.f32 %v2968_v62, %v2830_v43  ;;  %v2623_v43 = vadd.f32 %v5057_v49, %v2405_v17  ;;  %v2372_v61 = vpop.f32.mrf.mxu3 }
 0x324   : > { %3211 = vmatmul.bf16.gmra.mxu3 %v3119_v11  ;;  %v3047_v50 = vmul.f32 %v5191_v35, %v3019_v46 }
 0x325   : > { %v2975_v39 = vpop.f32.mrf.mxu2 }
 0x326   : > { %v3075_v62 = vadd.f32 %v5202_v21, %v3047_v50 }
 0x327   : > { %v2781_v16 = vpop.f32.mrf.mxu1 }
 0x328   : > { %v2831_v9 = vadd.f32 %v2781_v16, %v2620_v40  ;;  %v3099_v31 = vmax.f32 %v3075_v62, 0.0  ;;  %v2406_v40 = vadd.f32 %v5300_v54, %v5184_v38 }
 0x32a   : > { %v3020_v22 = vadd.f32 %v2970_v59, %v2831_v9  ;;  %v2375_v32 = vpop.f32.mrf.mxu3 }
 0x32c   : > { %v3048_v0 = vmul.f32 %v5191_v35, %v3020_v22  ;;  %v3202_v14 = vpop.f32.mrf.mxu0  ;;  %v2407_v22 = vadd.f32 %v5310_v33, %v5196_v13  ;;  %v5528_v13 = vld [vmem:[#allocation20_spill] sm:$0xff] }
 0x32d   : > { %v3203_v63 = vadd.f32 %v4033_v28, %v3202_v14  ;;  %v2978_v45 = vpop.f32.mrf.mxu2 }
 0x32e   : > { %v3076_v47 = vadd.f32 %v5202_v21, %v3048_v0  ;;  %v2625_v54 = vadd.f32 %v5069_v23, %v2407_v22  ;;  %v2409_v23 = vadd.f32 %v2370_v41, %v5213_v30  ;;  %v5530_v30 = vld [vmem:[#allocation22_spill] sm:$0xff] }
 0x32f   : > { %3262 = vst [vmem:[%s5324_s28] sm:$0xff] %v3203_v63  ;;  %v2784_v27 = vpop.f32.mrf.mxu1 }
 0x330   : > { %v2832_v19 = vadd.f32 %v2784_v27, %v2621_v44  ;;  %v3100_v36 = vmax.f32 %v3076_v47, 0.0  ;;  %v2408_v47 = vadd.f32 %v2367_v15, %v5209_v20  ;;  %v5529_v20 = vld [vmem:[#allocation21_spill] sm:$0xff] }
 0x331   : > { %v2627_v15 = vadd.f32 %v5529_v20, %v2409_v23 }
 0x332   : > { %v3120_v59 = vpack.c.bf16 %v3100_v36, %v3099_v31  ;;  %v3021_v53 = vadd.f32 %v2973_v25, %v2832_v19  ;;  %v2377_v19 = vpop.f32.mrf.mxu3  ;;  %v2626_v33 = vadd.f32 %v5528_v13, %v2408_v47 }
 0x334   : > { %v3204_v55 = vpop.f32.mrf.mxu0  ;;  %3216 = vmatmul.bf16.gmra.mxu3 %v3120_v59  ;;  %v3049_v6 = vmul.f32 %v5191_v35, %v3021_v53 }
 0x335   : > { %v3205_v1 = vadd.f32 %v4034_v57, %v3204_v55  ;;  %v2980_v26 = vpop.f32.mrf.mxu2 }
 0x336   : > { %v3077_v58 = vadd.f32 %v5202_v21, %v3049_v6 }
 0x337   : > { %3263 = vst [vmem:[%s5324_s28 + $0x8] sm:$0xff] %v3205_v1  ;;  %v2786_v3 = vpop.f32.mrf.mxu1 }
 0x338   : > { %v2833_v12 = vadd.f32 %v2786_v3, %v2622_v5  ;;  %v3101_v11 = vmax.f32 %v3077_v58, 0.0 }
 0x33a   : > { %v3022_v48 = vadd.f32 %v2975_v39, %v2833_v12  ;;  %v2624_v39 = vadd.f32 %v5063_v34, %v2406_v40 }
 0x33c   : > { %v3050_v51 = vmul.f32 %v5191_v35, %v3022_v48  ;;  %v2410_v48 = vadd.f32 %v2372_v61, %v5217_v2  ;;  %v5531_v2 = vld [vmem:[#allocation14_spill] sm:$0xff] }
 0x33d   : > { %v2983_v25 = vpop.f32.mrf.mxu2 }
 0x33e   : > { %v3078_v4 = vadd.f32 %v5202_v21, %v3050_v51  ;;  %v2628_v41 = vadd.f32 %v5530_v30, %v2410_v48 }
 0x33f   : > { %v2789_v7 = vpop.f32.mrf.mxu1 }
 0x340   : > { %v2834_v52 = vadd.f32 %v2789_v7, %v2623_v43  ;;  %v3102_v46 = vmax.f32 %v3078_v4, 0.0 }
 0x342   : > { %v3121_v16 = vpack.c.bf16 %v3102_v46, %v3101_v11  ;;  %v3023_v10 = vadd.f32 %v2978_v45, %v2834_v52  ;;  %v2411_v11 = vadd.f32 %v2375_v32, %v5223_v24  ;;  %v5532_v32 = vld [vmem:[#allocation11_spill] sm:$0xff] }
 0x344   : > { %3221 = vmatmul.bf16.gmra.mxu3 %v3121_v16  ;;  %v3051_v9 = vmul.f32 %v5191_v35, %v3023_v10  ;;  %v2629_v61 = vadd.f32 %v5531_v2, %v2411_v11 }
 0x345   : > { %v2985_v29 = vpop.f32.mrf.mxu2 }
 0x346   : > { %v3079_v62 = vadd.f32 %v5202_v21, %v3051_v9 }
 0x347   : > { %v2791_v50 = vpop.f32.mrf.mxu1 }
 0x348   : > { %v2835_v49 = vadd.f32 %v2791_v50, %v2624_v39  ;;  %v3103_v45 = vmax.f32 %v3079_v62, 0.0 }
 0x34a   : > { %v3024_v0 = vadd.f32 %v2980_v26, %v2835_v49  ;;  %v2380_v26 = vpop.f32.mrf.mxu3 }
 0x34c   : > { %v3052_v14 = vmul.f32 %v5191_v35, %v3024_v0  ;;  %v2412_v0 = vadd.f32 %v2377_v19, %v5229_v42 }
 0x34d   : > { %v2988_v38 = vpop.f32.mrf.mxu2 }
 0x34e   : > { %v3080_v28 = vadd.f32 %v5202_v21, %v3052_v14 }
 0x34f   : > { %v2794_v63 = vpop.f32.mrf.mxu1 }
 0x350   : > { %v2836_v34 = vadd.f32 %v2794_v63, %v2625_v54  ;;  %v3104_v44 = vmax.f32 %v3080_v28, 0.0 }
 0x352   : > { %v3122_v27 = vpack.c.bf16 %v3104_v44, %v3103_v45  ;;  %v3025_v31 = vadd.f32 %v2983_v25, %v2836_v34  ;;  %v2382_v43 = vpop.f32.mrf.mxu3  ;;  %v2413_v34 = vadd.f32 %v2380_v26, %v5235_v37 }
 0x354   : > { %3226 = vmatmul.bf16.gmra.mxu3 %v3122_v27  ;;  %v3053_v18 = vmul.f32 %v5191_v35, %v3025_v31  ;;  %v5533_v31 = vld [vmem:[#allocation19_spill] sm:$0xff] }
 0x355   : > { %v2990_v59 = vpop.f32.mrf.mxu2  ;;  %v2631_v42 = vadd.f32 %v5533_v31, %v2413_v34  ;;  %v4036_v34 = vld [vmem:[%s4218_s29 + $0x48] sm:$0xff] }
 0x356   : > { %v3081_v1 = vadd.f32 %v5202_v21, %v3053_v18 }
 0x357   : > { %v2796_v36 = vpop.f32.mrf.mxu1 }
 0x358   : > { %v2837_v53 = vadd.f32 %v2796_v36, %v2626_v33  ;;  %v3105_v12 = vmax.f32 %v3081_v1, 0.0 }
 0x35a   : > { %v3026_v55 = vadd.f32 %v2985_v29, %v2837_v53  ;;  %v2385_v22 = vpop.f32.mrf.mxu3  ;;  %v2414_v53 = vadd.f32 %v2382_v43, %v5239_v60 }
 0x35c   : > { %v3054_v57 = vmul.f32 %v5191_v35, %v3026_v55 }
 0x35d   : > { %v2993_v51 = vpop.f32.mrf.mxu2 }
 0x35e   : > { %v3082_v5 = vadd.f32 %v5202_v21, %v3054_v57  ;;  %v5534_v57 = vld [vmem:[#allocation13_spill] sm:$0xff] }
 0x35f   : > { %v2799_v3 = vpop.f32.mrf.mxu1  ;;  %v2632_v1 = vadd.f32 %v5534_v57, %v2414_v53 }
 0x360   : > { %v2838_v6 = vadd.f32 %v2799_v3, %v2627_v15  ;;  %v3106_v17 = vmax.f32 %v3082_v5, 0.0  ;;  %v5535_v5 = vld [vmem:[#allocation3_spill] sm:$0xff] }
 0x361   : > { %v2415_v3 = vadd.f32 %v2385_v22, %v5535_v5 }
 0x362   : > { %v3123_v58 = vpack.c.bf16 %v3106_v17, %v3105_v12  ;;  %v3027_v25 = vadd.f32 %v2988_v38, %v2838_v6  ;;  %v2630_v38 = vadd.f32 %v5532_v32, %v2412_v0  ;;  %v2387_v44 = vpop.f32.mrf.mxu3 }
 0x364   : > { %3231 = vmatmul.bf16.gmra.mxu3 %v3123_v58  ;;  %v3055_v7 = vmul.f32 %v5191_v35, %v3027_v25 }
 0x365   : > { %v2995_v40 = vpop.f32.mrf.mxu2 }
 0x366   : > { %v3083_v10 = vadd.f32 %v5202_v21, %v3055_v7  ;;  %v5537_v7 = vld [vmem:[#allocation5_spill] sm:$0xff] }
 0x367   : > { %v2801_v4 = vpop.f32.mrf.mxu1 }
 0x368   : > { %v2839_v52 = vadd.f32 %v2801_v4, %v2628_v41  ;;  %v3107_v9 = vmax.f32 %v3083_v10, 0.0 }
 0x36a   : > { %v3028_v46 = vadd.f32 %v2990_v59, %v2839_v52  ;;  %v2390_v37 = vpop.f32.mrf.mxu3  ;;  %v2416_v52 = vadd.f32 %v2387_v44, %v5537_v7 }
 0x36c   : > { %v3056_v16 = vmul.f32 %v5191_v35, %v3028_v46 }
 0x36d   : > { %v2998_v24 = vpop.f32.mrf.mxu2 }
 0x36e   : > { %v3084_v29 = vadd.f32 %v5202_v21, %v3056_v16  ;;  %v5538_v16 = vld [vmem:[#allocation4_spill] sm:$0xff] }
 0x36f   : > { %v2804_v39 = vpop.f32.mrf.mxu1  ;;  %v2634_v10 = vadd.f32 %v5538_v16, %v2416_v52  ;;  %v4045_v16 = vld [vmem:[%s4218_s29 + $0x90] sm:$0xff] }
 0x370   : > { %v2840_v50 = vadd.f32 %v2804_v39, %v2629_v61  ;;  %v3108_v49 = vmax.f32 %v3084_v29, 0.0 }
 0x372   : > { %v3124_v14 = vpack.c.bf16 %v3108_v49, %v3107_v9  ;;  %v3029_v62 = vadd.f32 %v2993_v51, %v2840_v50  ;;  %v5536_v51 = vld [vmem:[#allocation16_spill] sm:$0xff]  ;;  %v2392_v25 = vpop.f32.mrf.mxu3  ;;  %v4035_v50 = vld [vmem:[%s4218_s29 + $0x40] sm:$0xff]  ;;  %v2417_v49 = vadd.f32 %v2390_v37, %v5267_v56 }
 0x373   : > { %v2633_v60 = vadd.f32 %v5536_v51, %v2415_v3 }
 0x374   : > { %3236 = vmatmul.bf16.gmra.mxu3 %v3124_v14  ;;  %v3057_v28 = vmul.f32 %v5191_v35, %v3029_v62 }
 0x375   : > { %v3000_v33 = vpop.f32.mrf.mxu2 }
 0x376   : > { %v3085_v27 = vadd.f32 %v5202_v21, %v3057_v28 }
 0x377   : > { %v2806_v54 = vpop.f32.mrf.mxu1 }
 0x378   : > { %v2841_v63 = vadd.f32 %v2806_v54, %v2630_v38  ;;  %v3109_v18 = vmax.f32 %v3085_v27, 0.0 }
 0x37a   : > { %v3030_v45 = vadd.f32 %v2995_v40, %v2841_v63 }
 0x37c   : > { %v3058_v47 = vmul.f32 %v5191_v35, %v3030_v45 }
 0x37d   : > { %v3003_v6 = vpop.f32.mrf.mxu2 }
 0x37e   : > { %v3086_v19 = vadd.f32 %v5202_v21, %v3058_v47  ;;  %v2418_v47 = vadd.f32 %v2392_v25, %v5276_v8 }
 0x37f   : > { %v2809_v13 = vpop.f32.mrf.mxu1 }
 0x380   : > { %v2842_v36 = vadd.f32 %v2809_v13, %v2631_v42  ;;  %v3110_v59 = vmax.f32 %v3086_v19, 0.0  ;;  %v5540_v42 = vld [vmem:[#allocation2_spill] sm:$0xff] }
 0x381   : > { %v2636_v19 = vadd.f32 %v5540_v42, %v2418_v47 }
 0x382   : > { %v3125_v23 = vpack.c.bf16 %v3110_v59, %v3109_v18  ;;  %v3031_v55 = vadd.f32 %v2998_v24, %v2842_v36  ;;  %v5539_v24 = vld [vmem:[#allocation6_spill] sm:$0xff]  ;;  %v4037_v59 = vld [vmem:[%s4218_s29 + $0x50] sm:$0xff] }
 0x383   : > { %v2635_v32 = vadd.f32 %v5539_v24, %v2417_v49 }
 0x384   : > { %3241 = vmatmul.bf16.gmra.mxu3 %v3125_v23  ;;  %v3059_v20 = vmul.f32 %v5191_v35, %v3031_v55 }
 0x385   : > { %v3005_v46 = vpop.f32.mrf.mxu2 }
 0x386   : > { %v3087_v48 = vadd.f32 %v5202_v21, %v3059_v20 }
 0x387   : > { %v2811_v26 = vpop.f32.mrf.mxu1 }
 0x388   : > { %v2843_v15 = vadd.f32 %v2811_v26, %v2632_v1  ;;  %v3111_v43 = vmax.f32 %v3087_v48, 0.0  ;;  %v4038_v26 = vld [vmem:[%s4218_s29 + $0x58] sm:$0xff] }
 0x38a   : > { %v3032_v12 = vadd.f32 %v3000_v33, %v2843_v15 }
 0x38c   : > { %v3060_v17 = vmul.f32 %v5191_v35, %v3032_v12 }
 0x38d   : > { %v3008_v62 = vpop.f32.mrf.mxu2 }
 0x38e   : > { %v3088_v58 = vadd.f32 %v5202_v21, %v3060_v17  ;;  %v4040_v17 = vld [vmem:[%s4218_s29 + $0x68] sm:$0xff] }
 0x38f   : > { %v2814_v30 = vpop.f32.mrf.mxu1 }
 0x390   : > { %v2844_v41 = vadd.f32 %v2814_v30, %v2633_v60  ;;  %v3112_v4 = vmax.f32 %v3088_v58, 0.0  ;;  %v4041_v60 = vld [vmem:[%s4218_s29 + $0x70] sm:$0xff]  ;;  %v4042_v30 = vld [vmem:[%s4218_s29 + $0x78] sm:$0xff] }
 0x392   : > { %v3126_v11 = vpack.c.bf16 %v3112_v4, %v3111_v43  ;;  %v3033_v40 = vadd.f32 %v3003_v6, %v2844_v41  ;;  %v4043_v4 = vld [vmem:[%s4218_s29 + $0x80] sm:$0xff] }
 0x394   : > { %3246 = vmatmul.bf16.gmra.mxu3 %v3126_v11  ;;  %v3061_v29 = vmul.f32 %v5191_v35, %v3033_v40  ;;  %v4044_v11 = vld [vmem:[%s4218_s29 + $0x88] sm:$0xff] }
 0x395   : > { %v3010_v23 = vpop.f32.mrf.mxu2 }
 0x396   : > { %v3089_v14 = vadd.f32 %v5202_v21, %v3061_v29 }
 0x397   : > { %v2816_v2 = vpop.f32.mrf.mxu1  ;;  %v3207_v61 = vpop.f32.mrf.mxu3 }
 0x398   : > { %v2845_v39 = vadd.f32 %v2816_v2, %v2634_v10  ;;  %v3208_v9 = vadd.f32 %v4035_v50, %v3207_v61  ;;  %v3113_v44 = vmax.f32 %v3089_v14, 0.0  ;;  %v4046_v61 = vld [vmem:[%s4218_s29 + $0x98] sm:$0xff]  ;;  %v4047_v50 = vld [vmem:[%s4218_s29 + $0xa0] sm:$0xff] }
 0x39a   : > { %v3034_v22 = vadd.f32 %v3005_v46, %v2845_v39  ;;  %3264 = vst [vmem:[%s5324_s28 + $0x10] sm:$0xff] %v3208_v9 }
 0x39c   : > { %v3062_v0 = vmul.f32 %v5191_v35, %v3034_v22  ;;  %v4048_v22 = vld [vmem:[%s4218_s29 + $0xa8] sm:$0xff] }
 0x39e   : > { %v3090_v38 = vadd.f32 %v5202_v21, %v3062_v0 }
 0x39f   : > { %v2819_v54 = vpop.f32.mrf.mxu1  ;;  %v3209_v28 = vpop.f32.mrf.mxu3 }
 0x3a0   : > { %v2846_v63 = vadd.f32 %v2819_v54, %v2635_v32  ;;  %v3210_v45 = vadd.f32 %v4036_v34, %v3209_v28  ;;  %v3114_v56 = vmax.f32 %v3090_v38, 0.0  ;;  %v4050_v38 = vld [vmem:[%s4218_s29 + $0xb8] sm:$0xff] }
 0x3a2   : > { %3265 = vst [vmem:[%s5324_s28 + $0x18] sm:$0xff] %v3210_v45  ;;  %v3127_v27 = vpack.c.bf16 %v3114_v56, %v3113_v44  ;;  %v3035_v31 = vadd.f32 %v3008_v62, %v2846_v63  ;;  %v4049_v62 = vld [vmem:[%s4218_s29 + $0xb0] sm:$0xff]  ;;  %v4051_v63 = vld [vmem:[%s4218_s29 + $0xc0] sm:$0xff]  ;;  %v4052_v44 = vld [vmem:[%s4218_s29 + $0xc8] sm:$0xff] }
 0x3a4   : > { %3251 = vmatmul.bf16.gmra.mxu3 %v3127_v27  ;;  %v3063_v36 = vmul.f32 %v5191_v35, %v3035_v31  ;;  %v4053_v27 = vld [vmem:[%s4218_s29 + $0xd0] sm:$0xff] }
 0x3a6   : > { %v3091_v37 = vadd.f32 %v5202_v21, %v3063_v36  ;;  %v4055_v36 = vld [vmem:[%s4218_s29 + $0xe0] sm:$0xff] }
 0x3a7   : > { %v2821_v13 = vpop.f32.mrf.mxu1  ;;  %v3212_v33 = vpop.f32.mrf.mxu3 }
 0x3a8   : > { %v2847_v18 = vadd.f32 %v2821_v13, %v2636_v19  ;;  %v3213_v53 = vadd.f32 %v4037_v59, %v3212_v33  ;;  %v3115_v15 = vmax.f32 %v3091_v37, 0.0  ;;  %v4054_v19 = vld [vmem:[%s4218_s29 + $0xd8] sm:$0xff] }
 0x3aa   : > { %v3036_v55 = vadd.f32 %v3010_v23, %v2847_v18  ;;  %3266 = vst [vmem:[%s5324_s28 + $0x20] sm:$0xff] %v3213_v53  ;;  %v4056_v53 = vld [vmem:[%s4218_s29 + $0xe8] sm:$0xff] }
 0x3ac   : > { %v3064_v8 = vmul.f32 %v5191_v35, %v3036_v55  ;;  %v4039_v35 = vld [vmem:[%s4218_s29 + $0x60] sm:$0xff] }
 0x3ae   : > { %v3092_v57 = vadd.f32 %v5202_v21, %v3064_v8 }
 0x3af   : > { %v3214_v1 = vpop.f32.mrf.mxu3 }
 0x3b0   : > { %v3215_v20 = vadd.f32 %v4038_v26, %v3214_v1  ;;  %v3116_v5 = vmax.f32 %v3092_v57, 0.0 }
 0x3b2   : > { %3267 = vst [vmem:[%s5324_s28 + $0x28] sm:$0xff] %v3215_v20  ;;  %v3128_v3 = vpack.c.bf16 %v3116_v5, %v3115_v15 }
 0x3b4   : > { %3256 = vmatmul.bf16.gmra.mxu3 %v3128_v3 }
 0x3b7   : > { %v3217_v6 = vpop.f32.mrf.mxu3 }
 0x3b8   : > { %v3218_v12 = vadd.f32 %v4039_v35, %v3217_v6 }
 0x3ba   : > { %3268 = vst [vmem:[%s5324_s28 + $0x30] sm:$0xff] %v3218_v12 }
 0x3bf   : > { %v3219_v21 = vpop.f32.mrf.mxu3 }
 0x3c0   : > { %v3220_v48 = vadd.f32 %v4040_v17, %v3219_v21 }
 0x3c2   : > { %3269 = vst [vmem:[%s5324_s28 + $0x38] sm:$0xff] %v3220_v48 }
 0x3c7   : > { %v3222_v51 = vpop.f32.mrf.mxu3 }
 0x3c8   : > { %v3223_v58 = vadd.f32 %v4041_v60, %v3222_v51 }
 0x3ca   : > { %3270 = vst [vmem:[%s5324_s28 + $0x40] sm:$0xff] %v3223_v58 }
 0x3cf   : > { %v3224_v25 = vpop.f32.mrf.mxu3 }
 0x3d0   : > { %v3225_v41 = vadd.f32 %v4042_v30, %v3224_v25 }
 0x3d2   : > { %3271 = vst [vmem:[%s5324_s28 + $0x48] sm:$0xff] %v3225_v41 }
 0x3d7   : > { %v3227_v43 = vpop.f32.mrf.mxu3 }
 0x3d8   : > { %v3228_v7 = vadd.f32 %v4043_v4, %v3227_v43 }
 0x3da   : > { %3272 = vst [vmem:[%s5324_s28 + $0x50] sm:$0xff] %v3228_v7 }
 0x3df   : > { %v3229_v52 = vpop.f32.mrf.mxu3 }
 0x3e0   : > { %v3230_v46 = vadd.f32 %v4044_v11, %v3229_v52 }
 0x3e2   : > { %3273 = vst [vmem:[%s5324_s28 + $0x58] sm:$0xff] %v3230_v46 }
 0x3e7   : > { %v3232_v40 = vpop.f32.mrf.mxu3 }
 0x3e8   : > { %v3233_v10 = vadd.f32 %v4045_v16, %v3232_v40 }
 0x3ea   : > { %3274 = vst [vmem:[%s5324_s28 + $0x60] sm:$0xff] %v3233_v10 }
 0x3ef   : > { %v3234_v2 = vpop.f32.mrf.mxu3 }
 0x3f0   : > { %v3235_v29 = vadd.f32 %v4046_v61, %v3234_v2 }
 0x3f2   : > { %3275 = vst [vmem:[%s5324_s28 + $0x68] sm:$0xff] %v3235_v29 }
 0x3f7   : > { %v3237_v39 = vpop.f32.mrf.mxu3 }
 0x3f8   : > { %v3238_v9 = vadd.f32 %v4047_v50, %v3237_v39 }
 0x3fa   : > { %3276 = vst [vmem:[%s5324_s28 + $0x70] sm:$0xff] %v3238_v9 }
 0x3ff   : > { %v3239_v49 = vpop.f32.mrf.mxu3 }
 0x400   : > { %v3240_v0 = vadd.f32 %v4048_v22, %v3239_v49 }
 0x402   : > { %3277 = vst [vmem:[%s5324_s28 + $0x78] sm:$0xff] %v3240_v0 }
 0x407   : > { %v3242_v14 = vpop.f32.mrf.mxu3 }
 0x408   : > { %v3243_v24 = vadd.f32 %v4049_v62, %v3242_v14 }
 0x40a   : > { %3278 = vst [vmem:[%s5324_s28 + $0x80] sm:$0xff] %v3243_v24 }
 0x40f   : > { %v3244_v32 = vpop.f32.mrf.mxu3 }
 0x410   : > { %v3245_v54 = vadd.f32 %v4050_v38, %v3244_v32 }
 0x412   : > { %3279 = vst [vmem:[%s5324_s28 + $0x88] sm:$0xff] %v3245_v54 }
 0x417   : > { %v3247_v28 = vpop.f32.mrf.mxu3 }
 0x418   : > { %v3248_v34 = vadd.f32 %v4051_v63, %v3247_v28 }
 0x41a   : > { %3280 = vst [vmem:[%s5324_s28 + $0x90] sm:$0xff] %v3248_v34 }
 0x41f   : > { %v3249_v45 = vpop.f32.mrf.mxu3 }
 0x420   : > { %v3250_v56 = vadd.f32 %v4052_v44, %v3249_v45 }
 0x422   : > { %3281 = vst [vmem:[%s5324_s28 + $0x98] sm:$0xff] %v3250_v56 }
 0x427   : > { %v3252_v47 = vpop.f32.mrf.mxu3 }
 0x428   : > { %v3253_v31 = vadd.f32 %v4053_v27, %v3252_v47 }
 0x42a   : > { %3282 = vst [vmem:[%s5324_s28 + $0xa0] sm:$0xff] %v3253_v31 }
 0x42f   : > { %v3254_v42 = vpop.f32.mrf.mxu3 }
 0x430   : > { %v3255_v13 = vadd.f32 %v4054_v19, %v3254_v42 }
 0x432   : > { %3283 = vst [vmem:[%s5324_s28 + $0xa8] sm:$0xff] %v3255_v13 }
 0x437   : > { %v3257_v33 = vpop.f32.mrf.mxu3 }
 0x438   : > { %v3258_v18 = vadd.f32 %v4055_v36, %v3257_v33 }
 0x43a   : > { %3284 = vst [vmem:[%s5324_s28 + $0xb0] sm:$0xff] %v3258_v18 }
 0x43f   : > { %v3259_v59 = vpop.f32.mrf.mxu3 }
 0x440   : > { %v3260_v23 = vadd.f32 %v4056_v53, %v3259_v59 }
 0x442   : > { %3285 = vst [vmem:[%s5324_s28 + $0xb8] sm:$0xff] %v3260_v23 }
 0x443 PF: > { %s21_s21 = sadd.s32 1, %s4095_s21   ;;  %s5541_s17 = smov %s4087_s19 }
 0x444   : > { %p18_p7 = scmp.ge.s32.totalorder %s21_s21, 6   ;;  %s5542_s18 = smov %s4091_s20 }
 0x445   : > { %s5543_s19 = smov %s5546_s22  ;;  %s5544_s20 = smov %s5550_s23 }
 0x446   :  { %20 = sbr.rel (!%p18_p7) target bundleno = 3 (0x3), region = 104 }

</bundles_post_ra>
